<compile_context>
chip_gen: v7x
topology: tpu7x:2x2x1
jax: 0.10.0
libtpu: 0.0.40
codegen_flags: <defaults>
</compile_context>

<pallas_src>
import functools

import jax
import jax.numpy as jnp
import numpy as np
from jax.experimental import pallas as pl
from jax.experimental.pallas import tpu as pltpu


# --------------------------- hardware knobs ----------------------------------

@functools.lru_cache(maxsize=1)
def _tpu_knobs():
    """Per-generation VMEM budget (v5e/v6e: 128 MiB, v7x: 64 MiB per core)."""
    try:
        cap = int(pltpu.get_tpu_info().vmem_capacity_bytes)
    except Exception:
        cap = 64 * 1024 * 1024  # conservative (v7x-sized) fallback, perf-only
    vmem_limit = max(32 * 1024 * 1024, min(cap * 3 // 4, 96 * 1024 * 1024))
    return {"big_vmem": cap >= 100 * 1024 * 1024, "vmem_limit": vmem_limit}


def _round_up(x, m):
    return (x + m - 1) // m * m


def _pad_to(a, shape):
    pads = [(0, s - d) for d, s in zip(a.shape, shape)]
    if any(p[1] for p in pads):
        a = jnp.pad(a, pads)
    return a


def _divisor_tiles(total, unit):
    """Divisors of `total` that are multiples of `unit` (plus `total`), descending."""
    tiles = {total}
    for cand in range(unit, total, unit):
        if total % cand == 0:
            tiles.add(cand)
    return sorted(tiles, reverse=True)


def _choose_tm(m, big_vmem):
    # Big row tiles amortize per-step overhead; cap at 256 on 64 MiB (v7x) chips
    # so wide-N tiles + f32 acc still fit, and keep >=2 M-blocks so the
    # "parallel" M axis can be sharded across TensorCores (v7x has 2 TCs).
    cands = (512, 256, 128, 64, 32, 16, 8) if big_vmem else (256, 128, 64, 32, 16, 8)
    for tm in cands:
        if m >= 2 * tm:
            return tm
    return 8


# --------------------------- Pallas kernels ----------------------------------

def _mm_bias_kernel(x_ref, w_ref, b_ref, o_ref, acc_ref, *, relu):
    """out = relu?(x @ w + b); K-tiled, f32 VMEM accumulator, bf16 operands."""
    @pl.when(pl.program_id(2) == 0)
    def _init():
        acc_ref[...] = jnp.zeros_like(acc_ref)

    acc_ref[...] += jnp.dot(x_ref[...], w_ref[...],
                            preferred_element_type=jnp.float32)

    @pl.when(pl.program_id(2) == pl.num_programs(2) - 1)
    def _finalize():
        y = acc_ref[...] + b_ref[...]
        if relu:
            y = jnp.maximum(y, 0.0)
        o_ref[...] = y.astype(o_ref.dtype)


def _mm_bias_res_relu_kernel(x_ref, w_ref, b_ref, r_ref, o_ref, acc_ref):
    """out = relu(x @ w + b + residual); fused ResBlock tail (residual in bf16)."""
    # TODO(synk): branch1's 1x1 conv could additionally be fused here (second dot
    # per tile) to remove its HBM intermediate entirely.
    @pl.when(pl.program_id(2) == 0)
    def _init():
        acc_ref[...] = jnp.zeros_like(acc_ref)

    acc_ref[...] += jnp.dot(x_ref[...], w_ref[...],
                            preferred_element_type=jnp.float32)

    @pl.when(pl.program_id(2) == pl.num_programs(2) - 1)
    def _finalize():
        y = acc_ref[...] + b_ref[...] + r_ref[...]
        o_ref[...] = jnp.maximum(y, 0.0).astype(o_ref.dtype)


def _convT_kernel(x_ref, w_ref, b_ref, o_ref, *, t_out, kt):
    """[kt,1,1] temporal conv + bias + ReLU, all kt taps fused in-kernel.

    x_ref: (1, t_out+kt-1, tm, cp)  w_ref: (kt, cp, tn)  o_ref: (1, t_out, tm, tn)
    """
    b = b_ref[...]
    for tt in range(t_out):
        acc = jnp.dot(x_ref[0, tt], w_ref[0], preferred_element_type=jnp.float32)
        for i in range(1, kt):
            acc += jnp.dot(x_ref[0, tt + i], w_ref[i],
                           preferred_element_type=jnp.float32)
        o_ref[0, tt] = jnp.maximum(acc + b, 0.0).astype(o_ref.dtype)


def _conv3x3_kernel(x_ref, w_ref, b_ref, o_ref, acc_ref, *, s, ho, wo):
    """3x3 spatial conv + bias + relu: the (n,t) slab stays in VMEM and the
    9 taps are accumulated in-kernel (no im2col materialization in HBM)."""
    cp = x_ref.shape[-1]

    def tap(i, j):
        # Tap (i, j) of a stride-s conv reads phase (i%s, j%s) at a unit-stride
        # offset (i//s, j//s) thanks to the host-side phase decomposition.
        # TODO(synk): the reshape forces an in-VMEM relayout per tap; a K=9*cp
        # in-VMEM im2col would also fill the 256-deep MXU on v6e/v7x.
        patch = x_ref[(i % s) * s + (j % s),
                      i // s:i // s + ho,
                      j // s:j // s + wo, :]
        return jnp.dot(patch.reshape(ho * wo, cp), w_ref[3 * i + j],
                       preferred_element_type=jnp.float32)

    acc_ref[...] = tap(0, 0)          # init from the first tap (no zero pass)
    for i in range(3):
        for j in range(3):
            if i == 0 and j == 0:
                continue
            acc_ref[...] += tap(i, j)
    y = jnp.maximum(acc_ref[...] + b_ref[...], 0.0)
    o_ref[...] = y.reshape(o_ref.shape).astype(o_ref.dtype)


# --------------------------- kernel wrappers ---------------------------------

def _mm_tiles(m, k, n_out, out_bytes, has_res):
    knobs = _tpu_knobs()
    budget = int(knobs["vmem_limit"] * 0.6)
    tm = _choose_tm(m, knobs["big_vmem"])

    np_ = _round_up(n_out, 128)
    # Keep the K grid short (1-2 steps): zero-padded K rows are nearly free MXU
    # work, and narrow K strips half-fill the 256-deep MXU on v6e/v7x.
    kp = _round_up(k, 128)
    if kp > 1024:
        kp = _round_up(k, 512)
        tk = 512
    else:
        tk = kp

    def footprint(tn_, tk_):
        f = (2 * tm * tk_ * 2          # x, double-buffered bf16
             + 2 * tk_ * tn_ * 2       # w, double-buffered bf16
             + 2 * tn_ * 4             # bias
             + tm * tn_ * 4            # f32 accumulator scratch
             + 2 * tm * tn_ * out_bytes)
        if has_res:
            f += 2 * tm * tn_ * 2      # bf16 residual
        return f

    # Widest lane-dense output tile (up to full padded N) that fits VMEM, so the
    # activation is streamed from HBM only once instead of once per N tile.
    tn = None
    for cand in _divisor_tiles(np_, 128):
        if footprint(cand, tk) <= budget:
            tn = cand
            break
    if tn is None:                     # extreme case: shrink the K strip too
        tn, tk, kp = 128, 128, _round_up(k, 128)
    return tm, tn, tk, kp, np_


def matmul_bias(x, w, bias, *, relu, residual=None, out_dtype=jnp.float32):
    """relu?(x @ w + bias [+ residual]) with bf16 MXU operands, f32 accum.

    Returns the ROW/CHANNEL-PADDED result (round_up(m, tm), round_up(n, 128));
    padded rows/cols hold relu(bias) garbage and must be ignored by the caller
    (un-pad once at the very end of the block).
    """
    m, k = x.shape
    n_out = w.shape[1]
    out_bytes = jnp.dtype(out_dtype).itemsize
    tm, tn, tk, kp, np_ = _mm_tiles(m, k, n_out, out_bytes, residual is not None)
    mp = _round_up(m, tm)

    xb = _pad_to(x.astype(jnp.bfloat16), (mp, kp))
    wb = _pad_to(w.astype(jnp.bfloat16), (kp, np_))
    bb = _pad_to(bias.reshape(1, -1).astype(jnp.float32), (1, np_))

    args = [xb, wb, bb]
    # TODO(synk): the bias / constant-index blocks could be single-buffered via
    # pipeline_mode=pl.Buffered(1) to reclaim a little VMEM.
    in_specs = [
        pl.BlockSpec((tm, tk), lambda i, j, kk: (i, kk)),
        pl.BlockSpec((tk, tn), lambda i, j, kk: (kk, j)),
        pl.BlockSpec((1, tn), lambda i, j, kk: (0, j)),
    ]
    if residual is not None:
        r = residual
        if r.shape[0] > mp:
            r = r[:mp]
        if r.shape[1] > np_:
            r = r[:, :np_]
        rb = _pad_to(r.astype(jnp.bfloat16), (mp, np_))   # bf16 residual: half the HBM traffic
        args.append(rb)
        in_specs.append(pl.BlockSpec((tm, tn), lambda i, j, kk: (i, j)))
        kernel = _mm_bias_res_relu_kernel
    else:
        kernel = functools.partial(_mm_bias_kernel, relu=relu)

    grid = (mp // tm, np_ // tn, kp // tk)
    out = pl.pallas_call(
        kernel,
        out_shape=jax.ShapeDtypeStruct((mp, np_), out_dtype),
        grid_spec=pltpu.PrefetchScalarGridSpec(
            num_scalar_prefetch=0,
            grid=grid,
            in_specs=in_specs,
            out_specs=pl.BlockSpec((tm, tn), lambda i, j, kk: (i, j)),
            scratch_shapes=[pltpu.VMEM((tm, tn), jnp.float32)]),
        compiler_params=pltpu.CompilerParams(
            dimension_semantics=("parallel", "parallel", "arbitrary"),
            vmem_limit_bytes=_tpu_knobs()["vmem_limit"]),
    )(*args)
    return out


def convT_bn_relu(x, w_taps, bias, *, out_dtype=jnp.bfloat16):
    """[kt,1,1] conv (stride 1, pad kt//2) + folded-BN bias + ReLU, taps fused.

    x: (N, T, H, W, C); w_taps: (kt, C, Cout); bias: (Cout,).
    Returns (N, T, H, W, Cout_padded) with Cout padded to a multiple of 128.
    """
    n, t, h, w, c = x.shape
    kt, _, co = w_taps.shape
    assert kt % 2 == 1, "odd temporal kernel size expected (SlowFast uses 1/3)"
    pad = kt // 2
    cp, cop = _round_up(c, 128), _round_up(co, 128)
    m_hw = h * w
    tp = t + 2 * pad

    xq = jnp.pad(x.astype(jnp.bfloat16),
                 ((0, 0), (pad, pad), (0, 0), (0, 0), (0, cp - c))
                 ).reshape(n, tp, m_hw, cp)
    wq = _pad_to(w_taps.astype(jnp.bfloat16), (kt, cp, cop))
    bq = _pad_to(bias.reshape(1, -1).astype(jnp.float32), (1, cop))

    knobs = _tpu_knobs()
    budget = int(knobs["vmem_limit"] * 0.6)
    outb = jnp.dtype(out_dtype).itemsize

    def footprint(tm_, tn_):
        return (2 * tp * tm_ * cp * 2      # x slab (whole T resident), dbl-buffered
                + 2 * kt * cp * tn_ * 2    # taps
                + 2 * t * tm_ * tn_ * outb # output block
                + 2 * tn_ * 4)

    tn = tmh = None
    for tn_c in _divisor_tiles(cop, 128):      # widest output-channel tile first
        for tm_c in _divisor_tiles(m_hw, 8):   # then the biggest spatial tile
            if footprint(tm_c, tn_c) <= budget:
                tn, tmh = tn_c, tm_c
                break
        if tn is not None:
            break
    if tn is None:  # TODO(synk): tile T with a halo for huge T*H*W*C slabs
        tn = 128
        tmh = min(_divisor_tiles(m_hw, 8))

    out = pl.pallas_call(
        functools.partial(_convT_kernel, t_out=t, kt=kt),
        out_shape=jax.ShapeDtypeStruct((n, t, m_hw, cop), out_dtype),
        grid_spec=pltpu.PrefetchScalarGridSpec(
            num_scalar_prefetch=0,
            grid=(n, m_hw // tmh, cop // tn),
            in_specs=[
                pl.BlockSpec((1, tp, tmh, cp), lambda b, mi, j: (b, 0, mi, 0)),
                pl.BlockSpec((kt, cp, tn), lambda b, mi, j: (0, 0, j)),
                pl.BlockSpec((1, tn), lambda b, mi, j: (0, j)),
            ],
            out_specs=pl.BlockSpec((1, t, tmh, tn), lambda b, mi, j: (b, 0, mi, j))),
        compiler_params=pltpu.CompilerParams(
            dimension_semantics=("parallel", "parallel", "parallel"),
            vmem_limit_bytes=knobs["vmem_limit"]),
    )(xq, wq, bq)
    return out.reshape(n, t, h, w, cop)


def conv3x3_bn_relu(ya, w_full, bias, s, *, out_dtype=jnp.bfloat16):
    """[1,3,3] conv (stride [1,s,s], pad 1) + folded-BN bias + ReLU.

    Returns (N, T, Ho, Wo, Cout_padded) with Cout padded to a multiple of 128.
    """
    n, t, h, w, c = ya.shape
    co = w_full.shape[-1]
    cp, cop = _round_up(c, 128), _round_up(co, 128)
    assert s in (1, 2, 3), "3x3 tap layout assumes spatial stride in {1,2,3}"
    ho, wo = (h - 1) // s + 1, (w - 1) // s + 1
    hp, wp = h + 2, w + 2                                   # after conv pad of 1
    # Phase slab extents: need ceil(hp/s) rows and room for the max tap offset.
    hq = max(-(-hp // s), ho + (2 // s))
    wq = max(-(-wp // s), wo + (2 // s))

    xpad = jnp.pad(ya.astype(jnp.bfloat16),
                   ((0, 0), (0, 0),
                    (1, hq * s - hp + 1), (1, wq * s - wp + 1),
                    (0, cp - c)))
    if s == 1:
        xph = xpad.reshape(n * t, hq, wq, cp)               # no phase relayout needed
    else:
        # Phase decomposition: (N,T,Hq*s,Wq*s,Cp) -> (N*T*s*s, Hq, Wq, Cp) so a
        # stride-s tap becomes a unit-stride slice of one phase inside the kernel.
        xph = xpad.reshape(n, t, hq, s, wq, s, cp)
        xph = jnp.transpose(xph, (0, 1, 3, 5, 2, 4, 6)).reshape(n * t * s * s, hq, wq, cp)

    wtap = _pad_to(w_full.astype(jnp.bfloat16), (3, 3, cp, cop)).reshape(9, cp, cop)
    bb = _pad_to(bias.reshape(1, -1).astype(jnp.float32), (1, cop))

    knobs = _tpu_knobs()
    # TODO(synk): for very large H*W*C on 64 MiB (v7x) parts, add an output-row
    # tile with a 1-row halo instead of keeping the whole slab resident.
    out = pl.pallas_call(
        functools.partial(_conv3x3_kernel, s=s, ho=ho, wo=wo),
        out_shape=jax.ShapeDtypeStruct((n * t, ho, wo, cop), out_dtype),
        grid_spec=pltpu.PrefetchScalarGridSpec(
            num_scalar_prefetch=0,
            grid=(n * t,),
            in_specs=[
                pl.BlockSpec((s * s, hq, wq, cp), lambda b: (b, 0, 0, 0)),
                pl.BlockSpec((9, cp, cop), lambda b: (0, 0, 0)),
                pl.BlockSpec((1, cop), lambda b: (0, 0)),
            ],
            out_specs=pl.BlockSpec((1, ho, wo, cop), lambda b: (b, 0, 0, 0)),
            scratch_shapes=[pltpu.VMEM((ho * wo, cop), jnp.float32)]),
        compiler_params=pltpu.CompilerParams(
            dimension_semantics=("parallel",),
            vmem_limit_bytes=knobs["vmem_limit"]),
    )(xph, wtap, bb)
    return out.reshape(n, t, ho, wo, cop)


# --------------------------- JAX glue (layout / folding) ---------------------

def fold_bn_scale_bias(bn, eps):
    scale = bn["gamma"] / jnp.sqrt(bn["var"] + eps)
    bias = bn["beta"] - bn["mean"] * scale
    return scale, bias


def w3d_to_mat(w):
    # torch layout (Cout, Cin, kt, kh, kw) -> im2col matrix (kt*kh*kw*Cin, Cout)
    cout, cin, kt, kh, kw = w.shape
    return jnp.transpose(w, (2, 3, 4, 1, 0)).reshape(kt * kh * kw * cin, cout)


def grouped_3x3_weight(w_b, num_groups):
    # torch layout (Cout=dn, Cin_g=dn//g, 1, 3, 3) -> dense (3, 3, dn_in, dn_out)
    dn, cg = w_b.shape[0], w_b.shape[1]
    wt = jnp.transpose(w_b[:, :, 0], (2, 3, 1, 0))          # (3, 3, cg, dn)
    if num_groups == 1:
        return wt
    # TODO(synk): groups > 1 are expressed as a block-diagonal dense weight
    # (keeps one lane-dense pallas_call; wastes FLOPs by a factor of g).
    full = jnp.zeros((3, 3, dn, dn), w_b.dtype)
    for gi in range(num_groups):
        sl = slice(gi * cg, (gi + 1) * cg)
        full = full.at[:, :, sl, sl].set(wt[:, :, :, sl])
    return full


def res_block_forward(x_nchw, params, cfg):
    stride = cfg["stride"]
    kt = cfg["temp_kernel_size"]
    g = cfg["num_groups"]
    dn = cfg["dim_inner"]
    do = cfg["dim_out"]
    eps = cfg["eps"]
    out_bf16 = cfg.get("out_bf16", False)   # optional bf16 tail writeback
    s1, s3 = (stride, 1) if cfg["stride_1x1"] else (1, stride)

    x = jnp.transpose(x_nchw, (0, 2, 3, 4, 1))               # (N,T,H,W,C)
    n, t, h, w, cin = x.shape

    # ---- branch2.a : [kt,1,1] conv, stride [1,s1,s1], BN, ReLU --------------
    xa = x[:, :, ::s1, ::s1, :].astype(jnp.bfloat16)
    ha, wa = xa.shape[2], xa.shape[3]
    sa, ba = fold_bn_scale_bias(params["bn_a"], eps)
    # torch (dn, cin, kt, 1, 1) -> taps (kt, cin, dn), BN scale folded into W.
    wa_taps = jnp.transpose(params["w_a"][:, :, :, 0, 0], (2, 1, 0)) * sa[None, None, :]
    ya = convT_bn_relu(xa, wa_taps, ba)                      # (N,T,ha,wa,Cpad) bf16

    # ---- branch2.b : [1,3,3] grouped conv, stride [1,s3,s3], BN, ReLU -------
    sb, bb = fold_bn_scale_bias(params["bn_b"], eps)
    wb_full = grouped_3x3_weight(params["w_b"], g) * sb[None, None, None, :]
    yb = conv3x3_bn_relu(ya, wb_full, bb, s3)                # (N,T,hb,wb,Cpad) bf16
    hb, wb_sp, cop_dn = yb.shape[2], yb.shape[3], yb.shape[4]
    m = n * t * hb * wb_sp

    # ---- residual branch (bf16, kept padded for the fused tail) -------------
    if "w_1" in params:
        xs = x[:, :, ::stride, ::stride, :].astype(jnp.bfloat16).reshape(-1, cin)
        s1s, b1s = fold_bn_scale_bias(params["bn_1"], eps)
        w1_mat = w3d_to_mat(params["w_1"]) * s1s[None, :]
        res = matmul_bias(xs, w1_mat, b1s, relu=False, out_dtype=jnp.bfloat16)
    else:
        assert cin == do and stride == 1, "identity residual needs matching dims"
        res = x.reshape(-1, cin).astype(jnp.bfloat16)

    # ---- branch2.c : 1x1x1 conv + BN, fused residual add + ReLU -------------
    sc, bc = fold_bn_scale_bias(params["bn_c"], eps)
    wc_mat = w3d_to_mat(params["w_c"]) * sc[None, :]         # (dn, do)
    out = matmul_bias(yb.reshape(m, cop_dn), wc_mat, bc, relu=True, residual=res,
                      out_dtype=jnp.bfloat16 if out_bf16 else jnp.float32)
    # Single un-pad at the very end (no slice/re-pad round trips in between).
    out = out[:m, :do].reshape(n, t, hb, wb_sp, do)
    return jnp.transpose(out, (0, 4, 1, 2, 3)).astype(jnp.float32)  # back to NCDHW


# --------------------------- Parameters --------------------------------------

def init_params(key, cfg):
    di, do, dn = cfg["dim_in"], cfg["dim_out"], cfg["dim_inner"]
    kt, g = cfg["temp_kernel_size"], cfg["num_groups"]
    keys = jax.random.split(key, 8)

    def conv_w(k, shape):
        return 0.1 * jax.random.normal(k, shape, jnp.float32)

    def bn(k, c):
        k1, k2, k3, k4 = jax.random.split(k, 4)
        return dict(
            gamma=1.0 + 0.1 * jax.random.normal(k1, (c,), jnp.float32),
            beta=0.1 * jax.random.normal(k2, (c,), jnp.float32),
            mean=0.1 * jax.random.normal(k3, (c,), jnp.float32),
            var=1.0 + 0.1 * jnp.abs(jax.random.normal(k4, (c,), jnp.float32)),
        )

    p = {
        "w_a": conv_w(keys[0], (dn, di, kt, 1, 1)),
        "bn_a": bn(keys[1], dn),
        "w_b": conv_w(keys[2], (dn, dn // g, 1, 3, 3)),
        "bn_b": bn(keys[3], dn),
        "w_c": conv_w(keys[4], (do, dn, 1, 1, 1)),
        "bn_c": bn(keys[5], do),
    }
    if di != do or cfg["stride"] != 1:
        p["w_1"] = conv_w(keys[6], (do, di, 1, 1, 1))
        p["bn_1"] = bn(keys[7], do)
    return p


# --------------------------- Pure-JAX reference -------------------------------

def _conv3d_ref(x, w, strides, pads, groups=1):
    return jax.lax.conv_general_dilated(
        x, w, window_strides=strides, padding=[(p, p) for p in pads],
        dimension_numbers=("NCDHW", "OIDHW", "NCDHW"),
        feature_group_count=groups)


def _bn_ref(y, bn, eps):
    scale = bn["gamma"] / jnp.sqrt(bn["var"] + eps)
    shift = bn["beta"] - bn["mean"] * scale
    shp = (1, -1, 1, 1, 1)
    return y * scale.reshape(shp) + shift.reshape(shp)


def ref_forward(x, p, cfg):
    stride, kt, g, eps = cfg["stride"], cfg["temp_kernel_size"], cfg["num_groups"], cfg["eps"]
    s1, s3 = (stride, 1) if cfg["stride_1x1"] else (1, stride)
    a = jnp.maximum(_bn_ref(_conv3d_ref(x, p["w_a"], (1, s1, s1), (kt // 2, 0, 0)),
                            p["bn_a"], eps), 0.0)
    b = jnp.maximum(_bn_ref(_conv3d_ref(a, p["w_b"], (1, s3, s3), (0, 1, 1), g),
                            p["bn_b"], eps), 0.0)
    c = _bn_ref(_conv3d_ref(b, p["w_c"], (1, 1, 1), (0, 0, 0)), p["bn_c"], eps)
    if "w_1" in p:
        r = _bn_ref(_conv3d_ref(x, p["w_1"], (1, stride, stride), (0, 0, 0)), p["bn_1"], eps)
    else:
        r = x
    return jnp.maximum(r + c, 0.0)


# --------------------------- main ---------------------------------------------

if __name__ == "__main__":
    cfg = dict(dim_in=4, dim_out=8, temp_kernel_size=3, stride=2,
               dim_inner=2, num_groups=1, stride_1x1=False, eps=1e-5)

    key = jax.random.PRNGKey(0)
    kx, kp = jax.random.split(key)
    # x in PyTorch NCDHW layout: (N, C, T, H, W)
    x = jax.random.normal(kx, (2, cfg["dim_in"], 4, 16, 16), jnp.float32)
    params = init_params(kp, cfg)

    fwd = jax.jit(functools.partial(res_block_forward, cfg=cfg))
    out = jax.block_until_ready(fwd(x, params))

    ref = jax.block_until_ready(ref_forward(x, params, cfg))
    assert out.shape == ref.shape, (out.shape, ref.shape)
    # bf16 MXU operands with f32 accumulation -> bf16-level tolerance vs f32 ref.
    np.testing.assert_allclose(np.asarray(out), np.asarray(ref), atol=2e-2, rtol=2e-2)

    print("KERNEL_OK")
</pallas_src>

<mosaic_0001>
module attributes {stable_mosaic.version = 11 : i64} {
  func.func @_convT_kernel(%arg0: i32, %arg1: i32, %arg2: i32, %arg3: memref<1x6x256x128xbf16, #tpu.memory_space<vmem>>, %arg4: memref<3x128x128xbf16, #tpu.memory_space<vmem>>, %arg5: memref<1x128xf32, #tpu.memory_space<vmem>>, %arg6: memref<1x4x256x128xbf16, #tpu.memory_space<vmem>>) attributes {dimension_semantics = [#tpu.dimension_semantics<parallel>, #tpu.dimension_semantics<parallel>, #tpu.dimension_semantics<parallel>], iteration_bounds = array<i64: 2, 1, 1>, scalar_prefetch = 0 : i64, scratch_operands = 0 : i64, tpu.core_type = #tpu.core_type<tc>, window_params = [{transform_indices = @transform_0, window_bounds = array<i64: 1, 6, 256, 128>}, {transform_indices = @transform_1, window_bounds = array<i64: 3, 128, 128>}, {transform_indices = @transform_2, window_bounds = array<i64: 1, 128>}, {transform_indices = @transform_3, window_bounds = array<i64: 1, 4, 256, 128>}]} {
    %c0 = arith.constant 0 : index
    %c0_0 = arith.constant 0 : index
    %0 = vector.load %arg5[%c0, %c0_0] : memref<1x128xf32, #tpu.memory_space<vmem>>, vector<1x128xf32>
    %c0_1 = arith.constant 0 : index
    %c0_2 = arith.constant 0 : index
    %c0_3 = arith.constant 0 : index
    %c0_4 = arith.constant 0 : index
    %1 = vector.load %arg3[%c0_1, %c0_2, %c0_3, %c0_4] : memref<1x6x256x128xbf16, #tpu.memory_space<vmem>>, vector<1x1x256x128xbf16>
    %2 = vector.shape_cast %1 : vector<1x1x256x128xbf16> to vector<256x128xbf16>
    %c0_5 = arith.constant 0 : index
    %c0_6 = arith.constant 0 : index
    %c0_7 = arith.constant 0 : index
    %3 = vector.load %arg4[%c0_5, %c0_6, %c0_7] : memref<3x128x128xbf16, #tpu.memory_space<vmem>>, vector<1x128x128xbf16>
    %4 = vector.shape_cast %3 : vector<1x128x128xbf16> to vector<128x128xbf16>
    %cst = arith.constant dense<0.000000e+00> : vector<256x128xf32>
    %5 = tpu.matmul %2, %4, %cst {dimension_numbers = #tpu.dot_dimension_numbers<[1], [0], [0], [1], [0, 0, 1, 1], [], []>} : vector<256x128xbf16>, vector<128x128xbf16>, vector<256x128xf32> -> vector<256x128xf32>
    %c0_8 = arith.constant 0 : index
    %c1 = arith.constant 1 : index
    %c0_9 = arith.constant 0 : index
    %c0_10 = arith.constant 0 : index
    %6 = vector.load %arg3[%c0_8, %c1, %c0_9, %c0_10] : memref<1x6x256x128xbf16, #tpu.memory_space<vmem>>, vector<1x1x256x128xbf16>
    %7 = vector.shape_cast %6 : vector<1x1x256x128xbf16> to vector<256x128xbf16>
    %c1_11 = arith.constant 1 : index
    %c0_12 = arith.constant 0 : index
    %c0_13 = arith.constant 0 : index
    %8 = vector.load %arg4[%c1_11, %c0_12, %c0_13] : memref<3x128x128xbf16, #tpu.memory_space<vmem>>, vector<1x128x128xbf16>
    %9 = vector.shape_cast %8 : vector<1x128x128xbf16> to vector<128x128xbf16>
    %cst_14 = arith.constant dense<0.000000e+00> : vector<256x128xf32>
    %10 = tpu.matmul %7, %9, %cst_14 {dimension_numbers = #tpu.dot_dimension_numbers<[1], [0], [0], [1], [0, 0, 1, 1], [], []>} : vector<256x128xbf16>, vector<128x128xbf16>, vector<256x128xf32> -> vector<256x128xf32>
    %11 = arith.addf %5, %10 : vector<256x128xf32>
    %c0_15 = arith.constant 0 : index
    %c2 = arith.constant 2 : index
    %c0_16 = arith.constant 0 : index
    %c0_17 = arith.constant 0 : index
    %12 = vector.load %arg3[%c0_15, %c2, %c0_16, %c0_17] : memref<1x6x256x128xbf16, #tpu.memory_space<vmem>>, vector<1x1x256x128xbf16>
    %13 = vector.shape_cast %12 : vector<1x1x256x128xbf16> to vector<256x128xbf16>
    %c2_18 = arith.constant 2 : index
    %c0_19 = arith.constant 0 : index
    %c0_20 = arith.constant 0 : index
    %14 = vector.load %arg4[%c2_18, %c0_19, %c0_20] : memref<3x128x128xbf16, #tpu.memory_space<vmem>>, vector<1x128x128xbf16>
    %15 = vector.shape_cast %14 : vector<1x128x128xbf16> to vector<128x128xbf16>
    %cst_21 = arith.constant dense<0.000000e+00> : vector<256x128xf32>
    %16 = tpu.matmul %13, %15, %cst_21 {dimension_numbers = #tpu.dot_dimension_numbers<[1], [0], [0], [1], [0, 0, 1, 1], [], []>} : vector<256x128xbf16>, vector<128x128xbf16>, vector<256x128xf32> -> vector<256x128xf32>
    %17 = arith.addf %11, %16 : vector<256x128xf32>
    %18 = vector.broadcast %0 : vector<1x128xf32> to vector<256x128xf32>
    %19 = arith.addf %17, %18 : vector<256x128xf32>
    %cst_22 = arith.constant 0.000000e+00 : f32
    %20 = vector.broadcast %cst_22 : f32 to vector<256x128xf32>
    %21 = arith.maximumf %19, %20 : vector<256x128xf32>
    %22 = arith.truncf %21 : vector<256x128xf32> to vector<256x128xbf16>
    %c0_23 = arith.constant 0 : index
    %c0_24 = arith.constant 0 : index
    %c0_25 = arith.constant 0 : index
    %c0_26 = arith.constant 0 : index
    %23 = vector.load %arg6[%c0_23, %c0_24, %c0_25, %c0_26] : memref<1x4x256x128xbf16, #tpu.memory_space<vmem>>, vector<1x1x256x128xbf16>
    %24 = vector.shape_cast %23 : vector<1x1x256x128xbf16> to vector<256x128xbf16>
    %25 = vector.shape_cast %22 : vector<256x128xbf16> to vector<1x1x256x128xbf16>
    tpu.vector_store %arg6[%c0_23, %c0_24, %c0_25, %c0_26], %25 {strides = array<i32>} : memref<1x4x256x128xbf16, #tpu.memory_space<vmem>>, vector<1x1x256x128xbf16>,
    %c0_27 = arith.constant 0 : index
    %c1_28 = arith.constant 1 : index
    %c0_29 = arith.constant 0 : index
    %c0_30 = arith.constant 0 : index
    %26 = vector.load %arg3[%c0_27, %c1_28, %c0_29, %c0_30] : memref<1x6x256x128xbf16, #tpu.memory_space<vmem>>, vector<1x1x256x128xbf16>
    %27 = vector.shape_cast %26 : vector<1x1x256x128xbf16> to vector<256x128xbf16>
    %c0_31 = arith.constant 0 : index
    %c0_32 = arith.constant 0 : index
    %c0_33 = arith.constant 0 : index
    %28 = vector.load %arg4[%c0_31, %c0_32, %c0_33] : memref<3x128x128xbf16, #tpu.memory_space<vmem>>, vector<1x128x128xbf16>
    %29 = vector.shape_cast %28 : vector<1x128x128xbf16> to vector<128x128xbf16>
    %cst_34 = arith.constant dense<0.000000e+00> : vector<256x128xf32>
    %30 = tpu.matmul %27, %29, %cst_34 {dimension_numbers = #tpu.dot_dimension_numbers<[1], [0], [0], [1], [0, 0, 1, 1], [], []>} : vector<256x128xbf16>, vector<128x128xbf16>, vector<256x128xf32> -> vector<256x128xf32>
    %c0_35 = arith.constant 0 : index
    %c2_36 = arith.constant 2 : index
    %c0_37 = arith.constant 0 : index
    %c0_38 = arith.constant 0 : index
    %31 = vector.load %arg3[%c0_35, %c2_36, %c0_37, %c0_38] : memref<1x6x256x128xbf16, #tpu.memory_space<vmem>>, vector<1x1x256x128xbf16>
    %32 = vector.shape_cast %31 : vector<1x1x256x128xbf16> to vector<256x128xbf16>
    %c1_39 = arith.constant 1 : index
    %c0_40 = arith.constant 0 : index
    %c0_41 = arith.constant 0 : index
    %33 = vector.load %arg4[%c1_39, %c0_40, %c0_41] : memref<3x128x128xbf16, #tpu.memory_space<vmem>>, vector<1x128x128xbf16>
    %34 = vector.shape_cast %33 : vector<1x128x128xbf16> to vector<128x128xbf16>
    %cst_42 = arith.constant dense<0.000000e+00> : vector<256x128xf32>
    %35 = tpu.matmul %32, %34, %cst_42 {dimension_numbers = #tpu.dot_dimension_numbers<[1], [0], [0], [1], [0, 0, 1, 1], [], []>} : vector<256x128xbf16>, vector<128x128xbf16>, vector<256x128xf32> -> vector<256x128xf32>
    %36 = arith.addf %30, %35 : vector<256x128xf32>
    %c0_43 = arith.constant 0 : index
    %c3 = arith.constant 3 : index
    %c0_44 = arith.constant 0 : index
    %c0_45 = arith.constant 0 : index
    %37 = vector.load %arg3[%c0_43, %c3, %c0_44, %c0_45] : memref<1x6x256x128xbf16, #tpu.memory_space<vmem>>, vector<1x1x256x128xbf16>
    %38 = vector.shape_cast %37 : vector<1x1x256x128xbf16> to vector<256x128xbf16>
    %c2_46 = arith.constant 2 : index
    %c0_47 = arith.constant 0 : index
    %c0_48 = arith.constant 0 : index
    %39 = vector.load %arg4[%c2_46, %c0_47, %c0_48] : memref<3x128x128xbf16, #tpu.memory_space<vmem>>, vector<1x128x128xbf16>
    %40 = vector.shape_cast %39 : vector<1x128x128xbf16> to vector<128x128xbf16>
    %cst_49 = arith.constant dense<0.000000e+00> : vector<256x128xf32>
    %41 = tpu.matmul %38, %40, %cst_49 {dimension_numbers = #tpu.dot_dimension_numbers<[1], [0], [0], [1], [0, 0, 1, 1], [], []>} : vector<256x128xbf16>, vector<128x128xbf16>, vector<256x128xf32> -> vector<256x128xf32>
    %42 = arith.addf %36, %41 : vector<256x128xf32>
    %43 = vector.broadcast %0 : vector<1x128xf32> to vector<256x128xf32>
    %44 = arith.addf %42, %43 : vector<256x128xf32>
    %cst_50 = arith.constant 0.000000e+00 : f32
    %45 = vector.broadcast %cst_50 : f32 to vector<256x128xf32>
    %46 = arith.maximumf %44, %45 : vector<256x128xf32>
    %47 = arith.truncf %46 : vector<256x128xf32> to vector<256x128xbf16>
    %c0_51 = arith.constant 0 : index
    %c1_52 = arith.constant 1 : index
    %c0_53 = arith.constant 0 : index
    %c0_54 = arith.constant 0 : index
    %48 = vector.load %arg6[%c0_51, %c1_52, %c0_53, %c0_54] : memref<1x4x256x128xbf16, #tpu.memory_space<vmem>>, vector<1x1x256x128xbf16>
    %49 = vector.shape_cast %48 : vector<1x1x256x128xbf16> to vector<256x128xbf16>
    %50 = vector.shape_cast %47 : vector<256x128xbf16> to vector<1x1x256x128xbf16>
    tpu.vector_store %arg6[%c0_51, %c1_52, %c0_53, %c0_54], %50 {strides = array<i32>} : memref<1x4x256x128xbf16, #tpu.memory_space<vmem>>, vector<1x1x256x128xbf16>,
    %c0_55 = arith.constant 0 : index
    %c2_56 = arith.constant 2 : index
    %c0_57 = arith.constant 0 : index
    %c0_58 = arith.constant 0 : index
    %51 = vector.load %arg3[%c0_55, %c2_56, %c0_57, %c0_58] : memref<1x6x256x128xbf16, #tpu.memory_space<vmem>>, vector<1x1x256x128xbf16>
    %52 = vector.shape_cast %51 : vector<1x1x256x128xbf16> to vector<256x128xbf16>
    %c0_59 = arith.constant 0 : index
    %c0_60 = arith.constant 0 : index
    %c0_61 = arith.constant 0 : index
    %53 = vector.load %arg4[%c0_59, %c0_60, %c0_61] : memref<3x128x128xbf16, #tpu.memory_space<vmem>>, vector<1x128x128xbf16>
    %54 = vector.shape_cast %53 : vector<1x128x128xbf16> to vector<128x128xbf16>
    %cst_62 = arith.constant dense<0.000000e+00> : vector<256x128xf32>
    %55 = tpu.matmul %52, %54, %cst_62 {dimension_numbers = #tpu.dot_dimension_numbers<[1], [0], [0], [1], [0, 0, 1, 1], [], []>} : vector<256x128xbf16>, vector<128x128xbf16>, vector<256x128xf32> -> vector<256x128xf32>
    %c0_63 = arith.constant 0 : index
    %c3_64 = arith.constant 3 : index
    %c0_65 = arith.constant 0 : index
    %c0_66 = arith.constant 0 : index
    %56 = vector.load %arg3[%c0_63, %c3_64, %c0_65, %c0_66] : memref<1x6x256x128xbf16, #tpu.memory_space<vmem>>, vector<1x1x256x128xbf16>
    %57 = vector.shape_cast %56 : vector<1x1x256x128xbf16> to vector<256x128xbf16>
    %c1_67 = arith.constant 1 : index
    %c0_68 = arith.constant 0 : index
    %c0_69 = arith.constant 0 : index
    %58 = vector.load %arg4[%c1_67, %c0_68, %c0_69] : memref<3x128x128xbf16, #tpu.memory_space<vmem>>, vector<1x128x128xbf16>
    %59 = vector.shape_cast %58 : vector<1x128x128xbf16> to vector<128x128xbf16>
    %cst_70 = arith.constant dense<0.000000e+00> : vector<256x128xf32>
    %60 = tpu.matmul %57, %59, %cst_70 {dimension_numbers = #tpu.dot_dimension_numbers<[1], [0], [0], [1], [0, 0, 1, 1], [], []>} : vector<256x128xbf16>, vector<128x128xbf16>, vector<256x128xf32> -> vector<256x128xf32>
    %61 = arith.addf %55, %60 : vector<256x128xf32>
    %c0_71 = arith.constant 0 : index
    %c4 = arith.constant 4 : index
    %c0_72 = arith.constant 0 : index
    %c0_73 = arith.constant 0 : index
    %62 = vector.load %arg3[%c0_71, %c4, %c0_72, %c0_73] : memref<1x6x256x128xbf16, #tpu.memory_space<vmem>>, vector<1x1x256x128xbf16>
    %63 = vector.shape_cast %62 : vector<1x1x256x128xbf16> to vector<256x128xbf16>
    %c2_74 = arith.constant 2 : index
    %c0_75 = arith.constant 0 : index
    %c0_76 = arith.constant 0 : index
    %64 = vector.load %arg4[%c2_74, %c0_75, %c0_76] : memref<3x128x128xbf16, #tpu.memory_space<vmem>>, vector<1x128x128xbf16>
    %65 = vector.shape_cast %64 : vector<1x128x128xbf16> to vector<128x128xbf16>
    %cst_77 = arith.constant dense<0.000000e+00> : vector<256x128xf32>
    %66 = tpu.matmul %63, %65, %cst_77 {dimension_numbers = #tpu.dot_dimension_numbers<[1], [0], [0], [1], [0, 0, 1, 1], [], []>} : vector<256x128xbf16>, vector<128x128xbf16>, vector<256x128xf32> -> vector<256x128xf32>
    %67 = arith.addf %61, %66 : vector<256x128xf32>
    %68 = vector.broadcast %0 : vector<1x128xf32> to vector<256x128xf32>
    %69 = arith.addf %67, %68 : vector<256x128xf32>
    %cst_78 = arith.constant 0.000000e+00 : f32
    %70 = vector.broadcast %cst_78 : f32 to vector<256x128xf32>
    %71 = arith.maximumf %69, %70 : vector<256x128xf32>
    %72 = arith.truncf %71 : vector<256x128xf32> to vector<256x128xbf16>
    %c0_79 = arith.constant 0 : index
    %c2_80 = arith.constant 2 : index
    %c0_81 = arith.constant 0 : index
    %c0_82 = arith.constant 0 : index
    %73 = vector.load %arg6[%c0_79, %c2_80, %c0_81, %c0_82] : memref<1x4x256x128xbf16, #tpu.memory_space<vmem>>, vector<1x1x256x128xbf16>
    %74 = vector.shape_cast %73 : vector<1x1x256x128xbf16> to vector<256x128xbf16>
    %75 = vector.shape_cast %72 : vector<256x128xbf16> to vector<1x1x256x128xbf16>
    tpu.vector_store %arg6[%c0_79, %c2_80, %c0_81, %c0_82], %75 {strides = array<i32>} : memref<1x4x256x128xbf16, #tpu.memory_space<vmem>>, vector<1x1x256x128xbf16>,
    %c0_83 = arith.constant 0 : index
    %c3_84 = arith.constant 3 : index
    %c0_85 = arith.constant 0 : index
    %c0_86 = arith.constant 0 : index
    %76 = vector.load %arg3[%c0_83, %c3_84, %c0_85, %c0_86] : memref<1x6x256x128xbf16, #tpu.memory_space<vmem>>, vector<1x1x256x128xbf16>
    %77 = vector.shape_cast %76 : vector<1x1x256x128xbf16> to vector<256x128xbf16>
    %c0_87 = arith.constant 0 : index
    %c0_88 = arith.constant 0 : index
    %c0_89 = arith.constant 0 : index
    %78 = vector.load %arg4[%c0_87, %c0_88, %c0_89] : memref<3x128x128xbf16, #tpu.memory_space<vmem>>, vector<1x128x128xbf16>
    %79 = vector.shape_cast %78 : vector<1x128x128xbf16> to vector<128x128xbf16>
    %cst_90 = arith.constant dense<0.000000e+00> : vector<256x128xf32>
    %80 = tpu.matmul %77, %79, %cst_90 {dimension_numbers = #tpu.dot_dimension_numbers<[1], [0], [0], [1], [0, 0, 1, 1], [], []>} : vector<256x128xbf16>, vector<128x128xbf16>, vector<256x128xf32> -> vector<256x128xf32>
    %c0_91 = arith.constant 0 : index
    %c4_92 = arith.constant 4 : index
    %c0_93 = arith.constant 0 : index
    %c0_94 = arith.constant 0 : index
    %81 = vector.load %arg3[%c0_91, %c4_92, %c0_93, %c0_94] : memref<1x6x256x128xbf16, #tpu.memory_space<vmem>>, vector<1x1x256x128xbf16>
    %82 = vector.shape_cast %81 : vector<1x1x256x128xbf16> to vector<256x128xbf16>
    %c1_95 = arith.constant 1 : index
    %c0_96 = arith.constant 0 : index
    %c0_97 = arith.constant 0 : index
    %83 = vector.load %arg4[%c1_95, %c0_96, %c0_97] : memref<3x128x128xbf16, #tpu.memory_space<vmem>>, vector<1x128x128xbf16>
    %84 = vector.shape_cast %83 : vector<1x128x128xbf16> to vector<128x128xbf16>
    %cst_98 = arith.constant dense<0.000000e+00> : vector<256x128xf32>
    %85 = tpu.matmul %82, %84, %cst_98 {dimension_numbers = #tpu.dot_dimension_numbers<[1], [0], [0], [1], [0, 0, 1, 1], [], []>} : vector<256x128xbf16>, vector<128x128xbf16>, vector<256x128xf32> -> vector<256x128xf32>
    %86 = arith.addf %80, %85 : vector<256x128xf32>
    %c0_99 = arith.constant 0 : index
    %c5 = arith.constant 5 : index
    %c0_100 = arith.constant 0 : index
    %c0_101 = arith.constant 0 : index
    %87 = vector.load %arg3[%c0_99, %c5, %c0_100, %c0_101] : memref<1x6x256x128xbf16, #tpu.memory_space<vmem>>, vector<1x1x256x128xbf16>
    %88 = vector.shape_cast %87 : vector<1x1x256x128xbf16> to vector<256x128xbf16>
    %c2_102 = arith.constant 2 : index
    %c0_103 = arith.constant 0 : index
    %c0_104 = arith.constant 0 : index
    %89 = vector.load %arg4[%c2_102, %c0_103, %c0_104] : memref<3x128x128xbf16, #tpu.memory_space<vmem>>, vector<1x128x128xbf16>
    %90 = vector.shape_cast %89 : vector<1x128x128xbf16> to vector<128x128xbf16>
    %cst_105 = arith.constant dense<0.000000e+00> : vector<256x128xf32>
    %91 = tpu.matmul %88, %90, %cst_105 {dimension_numbers = #tpu.dot_dimension_numbers<[1], [0], [0], [1], [0, 0, 1, 1], [], []>} : vector<256x128xbf16>, vector<128x128xbf16>, vector<256x128xf32> -> vector<256x128xf32>
    %92 = arith.addf %86, %91 : vector<256x128xf32>
    %93 = vector.broadcast %0 : vector<1x128xf32> to vector<256x128xf32>
    %94 = arith.addf %92, %93 : vector<256x128xf32>
    %cst_106 = arith.constant 0.000000e+00 : f32
    %95 = vector.broadcast %cst_106 : f32 to vector<256x128xf32>
    %96 = arith.maximumf %94, %95 : vector<256x128xf32>
    %97 = arith.truncf %96 : vector<256x128xf32> to vector<256x128xbf16>
    %c0_107 = arith.constant 0 : index
    %c3_108 = arith.constant 3 : index
    %c0_109 = arith.constant 0 : index
    %c0_110 = arith.constant 0 : index
    %98 = vector.load %arg6[%c0_107, %c3_108, %c0_109, %c0_110] : memref<1x4x256x128xbf16, #tpu.memory_space<vmem>>, vector<1x1x256x128xbf16>
    %99 = vector.shape_cast %98 : vector<1x1x256x128xbf16> to vector<256x128xbf16>
    %100 = vector.shape_cast %97 : vector<256x128xbf16> to vector<1x1x256x128xbf16>
    tpu.vector_store %arg6[%c0_107, %c3_108, %c0_109, %c0_110], %100 {strides = array<i32>} : memref<1x4x256x128xbf16, #tpu.memory_space<vmem>>, vector<1x1x256x128xbf16>,
    return
  }
  func.func @transform_0(%arg0: i32, %arg1: i32, %arg2: i32) -> (i32, i32, i32, i32) {
    %c0_i32 = arith.constant 0 : i32
    %c0_i32_0 = arith.constant 0 : i32
    %c0_i32_1 = arith.constant 0 : i32
    return %arg0, %c0_i32, %arg1, %c0_i32_0 : i32, i32, i32, i32
  }
  func.func @transform_1(%arg0: i32, %arg1: i32, %arg2: i32) -> (i32, i32, i32) {
    %c0_i32 = arith.constant 0 : i32
    %c0_i32_0 = arith.constant 0 : i32
    %c0_i32_1 = arith.constant 0 : i32
    return %c0_i32, %c0_i32_0, %arg2 : i32, i32, i32
  }
  func.func @transform_2(%arg0: i32, %arg1: i32, %arg2: i32) -> (i32, i32) {
    %c0_i32 = arith.constant 0 : i32
    %c0_i32_0 = arith.constant 0 : i32
    return %c0_i32, %arg2 : i32, i32
  }
  func.func @transform_3(%arg0: i32, %arg1: i32, %arg2: i32) -> (i32, i32, i32, i32) {
    %c0_i32 = arith.constant 0 : i32
    %c0_i32_0 = arith.constant 0 : i32
    return %arg0, %c0_i32, %arg1, %arg2 : i32, i32, i32, i32
  }
}

module attributes {stable_mosaic.version = 11 : i64} {
  func.func @_conv3x3_kernel(%arg0: i32, %arg1: memref<4x9x9x128xbf16, #tpu.memory_space<vmem>>, %arg2: memref<9x128x128xbf16, #tpu.memory_space<vmem>>, %arg3: memref<1x128xf32, #tpu.memory_space<vmem>>, %arg4: memref<1x8x8x128xbf16, #tpu.memory_space<vmem>>, %arg5: memref<64x128xf32, #tpu.memory_space<vmem>>) attributes {dimension_semantics = [#tpu.dimension_semantics<parallel>], iteration_bounds = array<i64: 8>, scalar_prefetch = 0 : i64, scratch_operands = 1 : i64, tpu.core_type = #tpu.core_type<tc>, window_params = [{transform_indices = @transform_0, window_bounds = array<i64: 4, 9, 9, 128>}, {pipeline_mode = #tpu.pipeline_mode<synchronous>, transform_indices = @transform_1, window_bounds = array<i64: 9, 128, 128>}, {pipeline_mode = #tpu.pipeline_mode<synchronous>, transform_indices = @transform_2, window_bounds = array<i64: 1, 128>}, {transform_indices = @transform_3, window_bounds = array<i64: 1, 8, 8, 128>}]} {
    %c0 = arith.constant 0 : index
    %c0_0 = arith.constant 0 : index
    %c0_1 = arith.constant 0 : index
    %c0_2 = arith.constant 0 : index
    %0 = vector.load %arg1[%c0, %c0_0, %c0_1, %c0_2] : memref<4x9x9x128xbf16, #tpu.memory_space<vmem>>, vector<1x8x8x128xbf16>
    %1 = vector.shape_cast %0 : vector<1x8x8x128xbf16> to vector<8x8x128xbf16>
    %2 = vector.shape_cast %1 : vector<8x8x128xbf16> to vector<64x128xbf16>
    %c0_3 = arith.constant 0 : index
    %c0_4 = arith.constant 0 : index
    %c0_5 = arith.constant 0 : index
    %3 = vector.load %arg2[%c0_3, %c0_4, %c0_5] : memref<9x128x128xbf16, #tpu.memory_space<vmem>>, vector<1x128x128xbf16>
    %4 = vector.shape_cast %3 : vector<1x128x128xbf16> to vector<128x128xbf16>
    %cst = arith.constant dense<0.000000e+00> : vector<64x128xf32>
    %5 = tpu.matmul %2, %4, %cst {dimension_numbers = #tpu.dot_dimension_numbers<[1], [0], [0], [1], [0, 0, 1, 1], [], []>} : vector<64x128xbf16>, vector<128x128xbf16>, vector<64x128xf32> -> vector<64x128xf32>
    %c0_6 = arith.constant 0 : index
    %c0_7 = arith.constant 0 : index
    %6 = vector.load %arg5[%c0_6, %c0_7] : memref<64x128xf32, #tpu.memory_space<vmem>>, vector<64x128xf32>
    tpu.vector_store %arg5[%c0_6, %c0_7], %5 {strides = array<i32>} : memref<64x128xf32, #tpu.memory_space<vmem>>, vector<64x128xf32>,
    %c0_8 = arith.constant 0 : index
    %c0_9 = arith.constant 0 : index
    %7 = vector.load %arg5[%c0_8, %c0_9] : memref<64x128xf32, #tpu.memory_space<vmem>>, vector<64x128xf32>
    %c1 = arith.constant 1 : index
    %c0_10 = arith.constant 0 : index
    %c0_11 = arith.constant 0 : index
    %c0_12 = arith.constant 0 : index
    %8 = vector.load %arg1[%c1, %c0_10, %c0_11, %c0_12] : memref<4x9x9x128xbf16, #tpu.memory_space<vmem>>, vector<1x8x8x128xbf16>
    %9 = vector.shape_cast %8 : vector<1x8x8x128xbf16> to vector<8x8x128xbf16>
    %10 = vector.shape_cast %9 : vector<8x8x128xbf16> to vector<64x128xbf16>
    %c1_13 = arith.constant 1 : index
    %c0_14 = arith.constant 0 : index
    %c0_15 = arith.constant 0 : index
    %11 = vector.load %arg2[%c1_13, %c0_14, %c0_15] : memref<9x128x128xbf16, #tpu.memory_space<vmem>>, vector<1x128x128xbf16>
    %12 = vector.shape_cast %11 : vector<1x128x128xbf16> to vector<128x128xbf16>
    %cst_16 = arith.constant dense<0.000000e+00> : vector<64x128xf32>
    %13 = tpu.matmul %10, %12, %cst_16 {dimension_numbers = #tpu.dot_dimension_numbers<[1], [0], [0], [1], [0, 0, 1, 1], [], []>} : vector<64x128xbf16>, vector<128x128xbf16>, vector<64x128xf32> -> vector<64x128xf32>
    %14 = arith.addf %7, %13 : vector<64x128xf32>
    %c0_17 = arith.constant 0 : index
    %c0_18 = arith.constant 0 : index
    %15 = vector.load %arg5[%c0_17, %c0_18] : memref<64x128xf32, #tpu.memory_space<vmem>>, vector<64x128xf32>
    tpu.vector_store %arg5[%c0_17, %c0_18], %14 {strides = array<i32>} : memref<64x128xf32, #tpu.memory_space<vmem>>, vector<64x128xf32>,
    %c0_19 = arith.constant 0 : index
    %c0_20 = arith.constant 0 : index
    %16 = vector.load %arg5[%c0_19, %c0_20] : memref<64x128xf32, #tpu.memory_space<vmem>>, vector<64x128xf32>
    %c0_21 = arith.constant 0 : index
    %c0_22 = arith.constant 0 : index
    %c1_23 = arith.constant 1 : index
    %c0_24 = arith.constant 0 : index
    %17 = vector.load %arg1[%c0_21, %c0_22, %c1_23, %c0_24] : memref<4x9x9x128xbf16, #tpu.memory_space<vmem>>, vector<1x8x8x128xbf16>
    %18 = vector.shape_cast %17 : vector<1x8x8x128xbf16> to vector<8x8x128xbf16>
    %19 = vector.shape_cast %18 : vector<8x8x128xbf16> to vector<64x128xbf16>
    %c2 = arith.constant 2 : index
    %c0_25 = arith.constant 0 : index
    %c0_26 = arith.constant 0 : index
    %20 = vector.load %arg2[%c2, %c0_25, %c0_26] : memref<9x128x128xbf16, #tpu.memory_space<vmem>>, vector<1x128x128xbf16>
    %21 = vector.shape_cast %20 : vector<1x128x128xbf16> to vector<128x128xbf16>
    %cst_27 = arith.constant dense<0.000000e+00> : vector<64x128xf32>
    %22 = tpu.matmul %19, %21, %cst_27 {dimension_numbers = #tpu.dot_dimension_numbers<[1], [0], [0], [1], [0, 0, 1, 1], [], []>} : vector<64x128xbf16>, vector<128x128xbf16>, vector<64x128xf32> -> vector<64x128xf32>
    %23 = arith.addf %16, %22 : vector<64x128xf32>
    %c0_28 = arith.constant 0 : index
    %c0_29 = arith.constant 0 : index
    %24 = vector.load %arg5[%c0_28, %c0_29] : memref<64x128xf32, #tpu.memory_space<vmem>>, vector<64x128xf32>
    tpu.vector_store %arg5[%c0_28, %c0_29], %23 {strides = array<i32>} : memref<64x128xf32, #tpu.memory_space<vmem>>, vector<64x128xf32>,
    %c0_30 = arith.constant 0 : index
    %c0_31 = arith.constant 0 : index
    %25 = vector.load %arg5[%c0_30, %c0_31] : memref<64x128xf32, #tpu.memory_space<vmem>>, vector<64x128xf32>
    %c2_32 = arith.constant 2 : index
    %c0_33 = arith.constant 0 : index
    %c0_34 = arith.constant 0 : index
    %c0_35 = arith.constant 0 : index
    %26 = vector.load %arg1[%c2_32, %c0_33, %c0_34, %c0_35] : memref<4x9x9x128xbf16, #tpu.memory_space<vmem>>, vector<1x8x8x128xbf16>
    %27 = vector.shape_cast %26 : vector<1x8x8x128xbf16> to vector<8x8x128xbf16>
    %28 = vector.shape_cast %27 : vector<8x8x128xbf16> to vector<64x128xbf16>
    %c3 = arith.constant 3 : index
    %c0_36 = arith.constant 0 : index
    %c0_37 = arith.constant 0 : index
    %29 = vector.load %arg2[%c3, %c0_36, %c0_37] : memref<9x128x128xbf16, #tpu.memory_space<vmem>>, vector<1x128x128xbf16>
    %30 = vector.shape_cast %29 : vector<1x128x128xbf16> to vector<128x128xbf16>
    %cst_38 = arith.constant dense<0.000000e+00> : vector<64x128xf32>
    %31 = tpu.matmul %28, %30, %cst_38 {dimension_numbers = #tpu.dot_dimension_numbers<[1], [0], [0], [1], [0, 0, 1, 1], [], []>} : vector<64x128xbf16>, vector<128x128xbf16>, vector<64x128xf32> -> vector<64x128xf32>
    %32 = arith.addf %25, %31 : vector<64x128xf32>
    %c0_39 = arith.constant 0 : index
    %c0_40 = arith.constant 0 : index
    %33 = vector.load %arg5[%c0_39, %c0_40] : memref<64x128xf32, #tpu.memory_space<vmem>>, vector<64x128xf32>
    tpu.vector_store %arg5[%c0_39, %c0_40], %32 {strides = array<i32>} : memref<64x128xf32, #tpu.memory_space<vmem>>, vector<64x128xf32>,
    %c0_41 = arith.constant 0 : index
    %c0_42 = arith.constant 0 : index
    %34 = vector.load %arg5[%c0_41, %c0_42] : memref<64x128xf32, #tpu.memory_space<vmem>>, vector<64x128xf32>
    %c3_43 = arith.constant 3 : index
    %c0_44 = arith.constant 0 : index
    %c0_45 = arith.constant 0 : index
    %c0_46 = arith.constant 0 : index
    %35 = vector.load %arg1[%c3_43, %c0_44, %c0_45, %c0_46] : memref<4x9x9x128xbf16, #tpu.memory_space<vmem>>, vector<1x8x8x128xbf16>
    %36 = vector.shape_cast %35 : vector<1x8x8x128xbf16> to vector<8x8x128xbf16>
    %37 = vector.shape_cast %36 : vector<8x8x128xbf16> to vector<64x128xbf16>
    %c4 = arith.constant 4 : index
    %c0_47 = arith.constant 0 : index
    %c0_48 = arith.constant 0 : index
    %38 = vector.load %arg2[%c4, %c0_47, %c0_48] : memref<9x128x128xbf16, #tpu.memory_space<vmem>>, vector<1x128x128xbf16>
    %39 = vector.shape_cast %38 : vector<1x128x128xbf16> to vector<128x128xbf16>
    %cst_49 = arith.constant dense<0.000000e+00> : vector<64x128xf32>
    %40 = tpu.matmul %37, %39, %cst_49 {dimension_numbers = #tpu.dot_dimension_numbers<[1], [0], [0], [1], [0, 0, 1, 1], [], []>} : vector<64x128xbf16>, vector<128x128xbf16>, vector<64x128xf32> -> vector<64x128xf32>
    %41 = arith.addf %34, %40 : vector<64x128xf32>
    %c0_50 = arith.constant 0 : index
    %c0_51 = arith.constant 0 : index
    %42 = vector.load %arg5[%c0_50, %c0_51] : memref<64x128xf32, #tpu.memory_space<vmem>>, vector<64x128xf32>
    tpu.vector_store %arg5[%c0_50, %c0_51], %41 {strides = array<i32>} : memref<64x128xf32, #tpu.memory_space<vmem>>, vector<64x128xf32>,
    %c0_52 = arith.constant 0 : index
    %c0_53 = arith.constant 0 : index
    %43 = vector.load %arg5[%c0_52, %c0_53] : memref<64x128xf32, #tpu.memory_space<vmem>>, vector<64x128xf32>
    %c2_54 = arith.constant 2 : index
    %c0_55 = arith.constant 0 : index
    %c1_56 = arith.constant 1 : index
    %c0_57 = arith.constant 0 : index
    %44 = vector.load %arg1[%c2_54, %c0_55, %c1_56, %c0_57] : memref<4x9x9x128xbf16, #tpu.memory_space<vmem>>, vector<1x8x8x128xbf16>
    %45 = vector.shape_cast %44 : vector<1x8x8x128xbf16> to vector<8x8x128xbf16>
    %46 = vector.shape_cast %45 : vector<8x8x128xbf16> to vector<64x128xbf16>
    %c5 = arith.constant 5 : index
    %c0_58 = arith.constant 0 : index
    %c0_59 = arith.constant 0 : index
    %47 = vector.load %arg2[%c5, %c0_58, %c0_59] : memref<9x128x128xbf16, #tpu.memory_space<vmem>>, vector<1x128x128xbf16>
    %48 = vector.shape_cast %47 : vector<1x128x128xbf16> to vector<128x128xbf16>
    %cst_60 = arith.constant dense<0.000000e+00> : vector<64x128xf32>
    %49 = tpu.matmul %46, %48, %cst_60 {dimension_numbers = #tpu.dot_dimension_numbers<[1], [0], [0], [1], [0, 0, 1, 1], [], []>} : vector<64x128xbf16>, vector<128x128xbf16>, vector<64x128xf32> -> vector<64x128xf32>
    %50 = arith.addf %43, %49 : vector<64x128xf32>
    %c0_61 = arith.constant 0 : index
    %c0_62 = arith.constant 0 : index
    %51 = vector.load %arg5[%c0_61, %c0_62] : memref<64x128xf32, #tpu.memory_space<vmem>>, vector<64x128xf32>
    tpu.vector_store %arg5[%c0_61, %c0_62], %50 {strides = array<i32>} : memref<64x128xf32, #tpu.memory_space<vmem>>, vector<64x128xf32>,
    %c0_63 = arith.constant 0 : index
    %c0_64 = arith.constant 0 : index
    %52 = vector.load %arg5[%c0_63, %c0_64] : memref<64x128xf32, #tpu.memory_space<vmem>>, vector<64x128xf32>
    %c0_65 = arith.constant 0 : index
    %c1_66 = arith.constant 1 : index
    %c0_67 = arith.constant 0 : index
    %c0_68 = arith.constant 0 : index
    %53 = vector.load %arg1[%c0_65, %c1_66, %c0_67, %c0_68] : memref<4x9x9x128xbf16, #tpu.memory_space<vmem>>, vector<1x8x8x128xbf16>
    %54 = vector.shape_cast %53 : vector<1x8x8x128xbf16> to vector<8x8x128xbf16>
    %55 = vector.shape_cast %54 : vector<8x8x128xbf16> to vector<64x128xbf16>
    %c6 = arith.constant 6 : index
    %c0_69 = arith.constant 0 : index
    %c0_70 = arith.constant 0 : index
    %56 = vector.load %arg2[%c6, %c0_69, %c0_70] : memref<9x128x128xbf16, #tpu.memory_space<vmem>>, vector<1x128x128xbf16>
    %57 = vector.shape_cast %56 : vector<1x128x128xbf16> to vector<128x128xbf16>
    %cst_71 = arith.constant dense<0.000000e+00> : vector<64x128xf32>
    %58 = tpu.matmul %55, %57, %cst_71 {dimension_numbers = #tpu.dot_dimension_numbers<[1], [0], [0], [1], [0, 0, 1, 1], [], []>} : vector<64x128xbf16>, vector<128x128xbf16>, vector<64x128xf32> -> vector<64x128xf32>
    %59 = arith.addf %52, %58 : vector<64x128xf32>
    %c0_72 = arith.constant 0 : index
    %c0_73 = arith.constant 0 : index
    %60 = vector.load %arg5[%c0_72, %c0_73] : memref<64x128xf32, #tpu.memory_space<vmem>>, vector<64x128xf32>
    tpu.vector_store %arg5[%c0_72, %c0_73], %59 {strides = array<i32>} : memref<64x128xf32, #tpu.memory_space<vmem>>, vector<64x128xf32>,
    %c0_74 = arith.constant 0 : index
    %c0_75 = arith.constant 0 : index
    %61 = vector.load %arg5[%c0_74, %c0_75] : memref<64x128xf32, #tpu.memory_space<vmem>>, vector<64x128xf32>
    %c1_76 = arith.constant 1 : index
    %c1_77 = arith.constant 1 : index
    %c0_78 = arith.constant 0 : index
    %c0_79 = arith.constant 0 : index
    %62 = vector.load %arg1[%c1_76, %c1_77, %c0_78, %c0_79] : memref<4x9x9x128xbf16, #tpu.memory_space<vmem>>, vector<1x8x8x128xbf16>
    %63 = vector.shape_cast %62 : vector<1x8x8x128xbf16> to vector<8x8x128xbf16>
    %64 = vector.shape_cast %63 : vector<8x8x128xbf16> to vector<64x128xbf16>
    %c7 = arith.constant 7 : index
    %c0_80 = arith.constant 0 : index
    %c0_81 = arith.constant 0 : index
    %65 = vector.load %arg2[%c7, %c0_80, %c0_81] : memref<9x128x128xbf16, #tpu.memory_space<vmem>>, vector<1x128x128xbf16>
    %66 = vector.shape_cast %65 : vector<1x128x128xbf16> to vector<128x128xbf16>
    %cst_82 = arith.constant dense<0.000000e+00> : vector<64x128xf32>
    %67 = tpu.matmul %64, %66, %cst_82 {dimension_numbers = #tpu.dot_dimension_numbers<[1], [0], [0], [1], [0, 0, 1, 1], [], []>} : vector<64x128xbf16>, vector<128x128xbf16>, vector<64x128xf32> -> vector<64x128xf32>
    %68 = arith.addf %61, %67 : vector<64x128xf32>
    %c0_83 = arith.constant 0 : index
    %c0_84 = arith.constant 0 : index
    %69 = vector.load %arg5[%c0_83, %c0_84] : memref<64x128xf32, #tpu.memory_space<vmem>>, vector<64x128xf32>
    tpu.vector_store %arg5[%c0_83, %c0_84], %68 {strides = array<i32>} : memref<64x128xf32, #tpu.memory_space<vmem>>, vector<64x128xf32>,
    %c0_85 = arith.constant 0 : index
    %c0_86 = arith.constant 0 : index
    %70 = vector.load %arg5[%c0_85, %c0_86] : memref<64x128xf32, #tpu.memory_space<vmem>>, vector<64x128xf32>
    %c0_87 = arith.constant 0 : index
    %c1_88 = arith.constant 1 : index
    %c1_89 = arith.constant 1 : index
    %c0_90 = arith.constant 0 : index
    %71 = vector.load %arg1[%c0_87, %c1_88, %c1_89, %c0_90] : memref<4x9x9x128xbf16, #tpu.memory_space<vmem>>, vector<1x8x8x128xbf16>
    %72 = vector.shape_cast %71 : vector<1x8x8x128xbf16> to vector<8x8x128xbf16>
    %73 = vector.shape_cast %72 : vector<8x8x128xbf16> to vector<64x128xbf16>
    %c8 = arith.constant 8 : index
    %c0_91 = arith.constant 0 : index
    %c0_92 = arith.constant 0 : index
    %74 = vector.load %arg2[%c8, %c0_91, %c0_92] : memref<9x128x128xbf16, #tpu.memory_space<vmem>>, vector<1x128x128xbf16>
    %75 = vector.shape_cast %74 : vector<1x128x128xbf16> to vector<128x128xbf16>
    %cst_93 = arith.constant dense<0.000000e+00> : vector<64x128xf32>
    %76 = tpu.matmul %73, %75, %cst_93 {dimension_numbers = #tpu.dot_dimension_numbers<[1], [0], [0], [1], [0, 0, 1, 1], [], []>} : vector<64x128xbf16>, vector<128x128xbf16>, vector<64x128xf32> -> vector<64x128xf32>
    %77 = arith.addf %70, %76 : vector<64x128xf32>
    %c0_94 = arith.constant 0 : index
    %c0_95 = arith.constant 0 : index
    %78 = vector.load %arg5[%c0_94, %c0_95] : memref<64x128xf32, #tpu.memory_space<vmem>>, vector<64x128xf32>
    tpu.vector_store %arg5[%c0_94, %c0_95], %77 {strides = array<i32>} : memref<64x128xf32, #tpu.memory_space<vmem>>, vector<64x128xf32>,
    %c0_96 = arith.constant 0 : index
    %c0_97 = arith.constant 0 : index
    %79 = vector.load %arg5[%c0_96, %c0_97] : memref<64x128xf32, #tpu.memory_space<vmem>>, vector<64x128xf32>
    %c0_98 = arith.constant 0 : index
    %c0_99 = arith.constant 0 : index
    %80 = vector.load %arg3[%c0_98, %c0_99] : memref<1x128xf32, #tpu.memory_space<vmem>>, vector<1x128xf32>
    %81 = vector.broadcast %80 : vector<1x128xf32> to vector<64x128xf32>
    %82 = arith.addf %79, %81 : vector<64x128xf32>
    %cst_100 = arith.constant 0.000000e+00 : f32
    %83 = vector.broadcast %cst_100 : f32 to vector<64x128xf32>
    %84 = arith.maximumf %82, %83 : vector<64x128xf32>
    %85 = vector.shape_cast %84 : vector<64x128xf32> to vector<1x8x8x128xf32>
    %86 = arith.truncf %85 : vector<1x8x8x128xf32> to vector<1x8x8x128xbf16>
    %c0_101 = arith.constant 0 : index
    %c0_102 = arith.constant 0 : index
    %c0_103 = arith.constant 0 : index
    %c0_104 = arith.constant 0 : index
    %87 = vector.load %arg4[%c0_101, %c0_102, %c0_103, %c0_104] : memref<1x8x8x128xbf16, #tpu.memory_space<vmem>>, vector<1x8x8x128xbf16>
    tpu.vector_store %arg4[%c0_101, %c0_102, %c0_103, %c0_104], %86 {strides = array<i32>} : memref<1x8x8x128xbf16, #tpu.memory_space<vmem>>, vector<1x8x8x128xbf16>,
    return
  }
  func.func @transform_0(%arg0: i32) -> (i32, i32, i32, i32) {
    %c0_i32 = arith.constant 0 : i32
    %c0_i32_0 = arith.constant 0 : i32
    %c0_i32_1 = arith.constant 0 : i32
    %c0_i32_2 = arith.constant 0 : i32
    return %arg0, %c0_i32, %c0_i32_0, %c0_i32_1 : i32, i32, i32, i32
  }
  func.func @transform_1(%arg0: i32) -> (i32, i32, i32) {
    %c0_i32 = arith.constant 0 : i32
    %c0_i32_0 = arith.constant 0 : i32
    %c0_i32_1 = arith.constant 0 : i32
    %c0_i32_2 = arith.constant 0 : i32
    return %c0_i32, %c0_i32_0, %c0_i32_1 : i32, i32, i32
  }
  func.func @transform_2(%arg0: i32) -> (i32, i32) {
    %c0_i32 = arith.constant 0 : i32
    %c0_i32_0 = arith.constant 0 : i32
    %c0_i32_1 = arith.constant 0 : i32
    return %c0_i32, %c0_i32_0 : i32, i32
  }
  func.func @transform_3(%arg0: i32) -> (i32, i32, i32, i32) {
    %c0_i32 = arith.constant 0 : i32
    %c0_i32_0 = arith.constant 0 : i32
    %c0_i32_1 = arith.constant 0 : i32
    %c0_i32_2 = arith.constant 0 : i32
    return %arg0, %c0_i32, %c0_i32_0, %c0_i32_1 : i32, i32, i32, i32
  }
}

module attributes {stable_mosaic.version = 11 : i64} {
  func.func @_mm_bias_kernel(%arg0: i32, %arg1: i32, %arg2: i32, %arg3: memref<256x128xbf16, #tpu.memory_space<vmem>>, %arg4: memref<128x128xbf16, #tpu.memory_space<vmem>>, %arg5: memref<1x128xf32, #tpu.memory_space<vmem>>, %arg6: memref<256x128xbf16, #tpu.memory_space<vmem>>, %arg7: memref<256x128xf32, #tpu.memory_space<vmem>>) attributes {dimension_semantics = [#tpu.dimension_semantics<parallel>, #tpu.dimension_semantics<parallel>, #tpu.dimension_semantics<arbitrary>], iteration_bounds = array<i64: 2, 1, 1>, scalar_prefetch = 0 : i64, scratch_operands = 1 : i64, tpu.core_type = #tpu.core_type<tc>, window_params = [{transform_indices = @transform_0, window_bounds = array<i64: 256, 128>}, {transform_indices = @transform_1, window_bounds = array<i64: 128, 128>}, {transform_indices = @transform_2, window_bounds = array<i64: 1, 128>}, {transform_indices = @transform_3, window_bounds = array<i64: 256, 128>}]} {
    %c0_i32 = arith.constant 0 : i32
    %0 = arith.cmpi eq, %arg2, %c0_i32 : i32
    %1 = arith.extui %0 : i1 to i32
    %c0_i32_0 = arith.constant 0 : i32
    %2 = arith.cmpi ne, %1, %c0_i32_0 : i32
    scf.if %2 {
      %cst_10 = arith.constant 0.000000e+00 : f32
      %12 = vector.broadcast %cst_10 : f32 to vector<256x128xf32>
      %c0_11 = arith.constant 0 : index
      %c0_12 = arith.constant 0 : index
      %13 = vector.load %arg7[%c0_11, %c0_12] : memref<256x128xf32, #tpu.memory_space<vmem>>, vector<256x128xf32>
      tpu.vector_store %arg7[%c0_11, %c0_12], %12 {strides = array<i32>} : memref<256x128xf32, #tpu.memory_space<vmem>>, vector<256x128xf32>,
    } else {
    }
    %c0 = arith.constant 0 : index
    %c0_1 = arith.constant 0 : index
    %3 = vector.load %arg7[%c0, %c0_1] : memref<256x128xf32, #tpu.memory_space<vmem>>, vector<256x128xf32>
    %c0_2 = arith.constant 0 : index
    %c0_3 = arith.constant 0 : index
    %4 = vector.load %arg3[%c0_2, %c0_3] : memref<256x128xbf16, #tpu.memory_space<vmem>>, vector<256x128xbf16>
    %c0_4 = arith.constant 0 : index
    %c0_5 = arith.constant 0 : index
    %5 = vector.load %arg4[%c0_4, %c0_5] : memref<128x128xbf16, #tpu.memory_space<vmem>>, vector<128x128xbf16>
    %cst = arith.constant dense<0.000000e+00> : vector<256x128xf32>
    %6 = tpu.matmul %4, %5, %cst {dimension_numbers = #tpu.dot_dimension_numbers<[1], [0], [0], [1], [0, 0, 1, 1], [], []>} : vector<256x128xbf16>, vector<128x128xbf16>, vector<256x128xf32> -> vector<256x128xf32>
    %7 = arith.addf %3, %6 : vector<256x128xf32>
    %c0_6 = arith.constant 0 : index
    %c0_7 = arith.constant 0 : index
    %8 = vector.load %arg7[%c0_6, %c0_7] : memref<256x128xf32, #tpu.memory_space<vmem>>, vector<256x128xf32>
    tpu.vector_store %arg7[%c0_6, %c0_7], %7 {strides = array<i32>} : memref<256x128xf32, #tpu.memory_space<vmem>>, vector<256x128xf32>,
    %c0_i32_8 = arith.constant 0 : i32
    %9 = arith.cmpi eq, %arg2, %c0_i32_8 : i32
    %10 = arith.extui %9 : i1 to i32
    %c0_i32_9 = arith.constant 0 : i32
    %11 = arith.cmpi ne, %10, %c0_i32_9 : i32
    scf.if %11 {
      %c0_10 = arith.constant 0 : index
      %c0_11 = arith.constant 0 : index
      %12 = vector.load %arg7[%c0_10, %c0_11] : memref<256x128xf32, #tpu.memory_space<vmem>>, vector<256x128xf32>
      %c0_12 = arith.constant 0 : index
      %c0_13 = arith.constant 0 : index
      %13 = vector.load %arg5[%c0_12, %c0_13] : memref<1x128xf32, #tpu.memory_space<vmem>>, vector<1x128xf32>
      %14 = vector.broadcast %13 : vector<1x128xf32> to vector<256x128xf32>
      %15 = arith.addf %12, %14 : vector<256x128xf32>
      %16 = arith.truncf %15 : vector<256x128xf32> to vector<256x128xbf16>
      %c0_14 = arith.constant 0 : index
      %c0_15 = arith.constant 0 : index
      %17 = vector.load %arg6[%c0_14, %c0_15] : memref<256x128xbf16, #tpu.memory_space<vmem>>, vector<256x128xbf16>
      tpu.vector_store %arg6[%c0_14, %c0_15], %16 {strides = array<i32>} : memref<256x128xbf16, #tpu.memory_space<vmem>>, vector<256x128xbf16>,
    } else {
    }
    return
  }
  func.func @transform_0(%arg0: i32, %arg1: i32, %arg2: i32) -> (i32, i32) {
    %c0_i32 = arith.constant 0 : i32
    return %arg0, %arg2 : i32, i32
  }
  func.func @transform_1(%arg0: i32, %arg1: i32, %arg2: i32) -> (i32, i32) {
    %c0_i32 = arith.constant 0 : i32
    return %arg2, %arg1 : i32, i32
  }
  func.func @transform_2(%arg0: i32, %arg1: i32, %arg2: i32) -> (i32, i32) {
    %c0_i32 = arith.constant 0 : i32
    %c0_i32_0 = arith.constant 0 : i32
    return %c0_i32, %arg1 : i32, i32
  }
  func.func @transform_3(%arg0: i32, %arg1: i32, %arg2: i32) -> (i32, i32) {
    %c0_i32 = arith.constant 0 : i32
    return %arg0, %arg1 : i32, i32
  }
}

module attributes {stable_mosaic.version = 11 : i64} {
  func.func @_mm_bias_res_relu_kernel(%arg0: i32, %arg1: i32, %arg2: i32, %arg3: memref<256x128xbf16, #tpu.memory_space<vmem>>, %arg4: memref<128x128xbf16, #tpu.memory_space<vmem>>, %arg5: memref<1x128xf32, #tpu.memory_space<vmem>>, %arg6: memref<256x128xbf16, #tpu.memory_space<vmem>>, %arg7: memref<256x128xf32, #tpu.memory_space<vmem>>, %arg8: memref<256x128xf32, #tpu.memory_space<vmem>>) attributes {dimension_semantics = [#tpu.dimension_semantics<parallel>, #tpu.dimension_semantics<parallel>, #tpu.dimension_semantics<arbitrary>], iteration_bounds = array<i64: 2, 1, 1>, scalar_prefetch = 0 : i64, scratch_operands = 1 : i64, tpu.core_type = #tpu.core_type<tc>, window_params = [{transform_indices = @transform_0, window_bounds = array<i64: 256, 128>}, {transform_indices = @transform_1, window_bounds = array<i64: 128, 128>}, {transform_indices = @transform_2, window_bounds = array<i64: 1, 128>}, {transform_indices = @transform_3, window_bounds = array<i64: 256, 128>}, {transform_indices = @transform_4, window_bounds = array<i64: 256, 128>}]} {
    %c0_i32 = arith.constant 0 : i32
    %0 = arith.cmpi eq, %arg2, %c0_i32 : i32
    %1 = arith.extui %0 : i1 to i32
    %c0_i32_0 = arith.constant 0 : i32
    %2 = arith.cmpi ne, %1, %c0_i32_0 : i32
    scf.if %2 {
      %cst_10 = arith.constant 0.000000e+00 : f32
      %12 = vector.broadcast %cst_10 : f32 to vector<256x128xf32>
      %c0_11 = arith.constant 0 : index
      %c0_12 = arith.constant 0 : index
      %13 = vector.load %arg8[%c0_11, %c0_12] : memref<256x128xf32, #tpu.memory_space<vmem>>, vector<256x128xf32>
      tpu.vector_store %arg8[%c0_11, %c0_12], %12 {strides = array<i32>} : memref<256x128xf32, #tpu.memory_space<vmem>>, vector<256x128xf32>,
    } else {
    }
    %c0 = arith.constant 0 : index
    %c0_1 = arith.constant 0 : index
    %3 = vector.load %arg8[%c0, %c0_1] : memref<256x128xf32, #tpu.memory_space<vmem>>, vector<256x128xf32>
    %c0_2 = arith.constant 0 : index
    %c0_3 = arith.constant 0 : index
    %4 = vector.load %arg3[%c0_2, %c0_3] : memref<256x128xbf16, #tpu.memory_space<vmem>>, vector<256x128xbf16>
    %c0_4 = arith.constant 0 : index
    %c0_5 = arith.constant 0 : index
    %5 = vector.load %arg4[%c0_4, %c0_5] : memref<128x128xbf16, #tpu.memory_space<vmem>>, vector<128x128xbf16>
    %cst = arith.constant dense<0.000000e+00> : vector<256x128xf32>
    %6 = tpu.matmul %4, %5, %cst {dimension_numbers = #tpu.dot_dimension_numbers<[1], [0], [0], [1], [0, 0, 1, 1], [], []>} : vector<256x128xbf16>, vector<128x128xbf16>, vector<256x128xf32> -> vector<256x128xf32>
    %7 = arith.addf %3, %6 : vector<256x128xf32>
    %c0_6 = arith.constant 0 : index
    %c0_7 = arith.constant 0 : index
    %8 = vector.load %arg8[%c0_6, %c0_7] : memref<256x128xf32, #tpu.memory_space<vmem>>, vector<256x128xf32>
    tpu.vector_store %arg8[%c0_6, %c0_7], %7 {strides = array<i32>} : memref<256x128xf32, #tpu.memory_space<vmem>>, vector<256x128xf32>,
    %c0_i32_8 = arith.constant 0 : i32
    %9 = arith.cmpi eq, %arg2, %c0_i32_8 : i32
    %10 = arith.extui %9 : i1 to i32
    %c0_i32_9 = arith.constant 0 : i32
    %11 = arith.cmpi ne, %10, %c0_i32_9 : i32
    scf.if %11 {
      %c0_10 = arith.constant 0 : index
      %c0_11 = arith.constant 0 : index
      %12 = vector.load %arg8[%c0_10, %c0_11] : memref<256x128xf32, #tpu.memory_space<vmem>>, vector<256x128xf32>
      %c0_12 = arith.constant 0 : index
      %c0_13 = arith.constant 0 : index
      %13 = vector.load %arg5[%c0_12, %c0_13] : memref<1x128xf32, #tpu.memory_space<vmem>>, vector<1x128xf32>
      %14 = vector.broadcast %13 : vector<1x128xf32> to vector<256x128xf32>
      %15 = arith.addf %12, %14 : vector<256x128xf32>
      %c0_14 = arith.constant 0 : index
      %c0_15 = arith.constant 0 : index
      %16 = vector.load %arg6[%c0_14, %c0_15] : memref<256x128xbf16, #tpu.memory_space<vmem>>, vector<256x128xbf16>
      %17 = arith.extf %16 : vector<256x128xbf16> to vector<256x128xf32>
      %18 = arith.addf %15, %17 : vector<256x128xf32>
      %cst_16 = arith.constant 0.000000e+00 : f32
      %19 = vector.broadcast %cst_16 : f32 to vector<256x128xf32>
      %20 = arith.maximumf %18, %19 : vector<256x128xf32>
      %c0_17 = arith.constant 0 : index
      %c0_18 = arith.constant 0 : index
      %21 = vector.load %arg7[%c0_17, %c0_18] : memref<256x128xf32, #tpu.memory_space<vmem>>, vector<256x128xf32>
      tpu.vector_store %arg7[%c0_17, %c0_18], %20 {strides = array<i32>} : memref<256x128xf32, #tpu.memory_space<vmem>>, vector<256x128xf32>,
    } else {
    }
    return
  }
  func.func @transform_0(%arg0: i32, %arg1: i32, %arg2: i32) -> (i32, i32) {
    %c0_i32 = arith.constant 0 : i32
    return %arg0, %arg2 : i32, i32
  }
  func.func @transform_1(%arg0: i32, %arg1: i32, %arg2: i32) -> (i32, i32) {
    %c0_i32 = arith.constant 0 : i32
    return %arg2, %arg1 : i32, i32
  }
  func.func @transform_2(%arg0: i32, %arg1: i32, %arg2: i32) -> (i32, i32) {
    %c0_i32 = arith.constant 0 : i32
    %c0_i32_0 = arith.constant 0 : i32
    return %c0_i32, %arg1 : i32, i32
  }
  func.func @transform_3(%arg0: i32, %arg1: i32, %arg2: i32) -> (i32, i32) {
    %c0_i32 = arith.constant 0 : i32
    return %arg0, %arg1 : i32, i32
  }
  func.func @transform_4(%arg0: i32, %arg1: i32, %arg2: i32) -> (i32, i32) {
    %c0_i32 = arith.constant 0 : i32
    return %arg0, %arg1 : i32, i32
  }
}

</mosaic_0001>

<bundles_post_ra>
// kernel: res_block_forward.4
= control target key start
LH: loop header
LB: loop body
LE: loop exit
PB: predicated region body
PF: predicated region fallthrough
CT: control target
= control target key end

     0   :  { %s8656_s12 = smov 0   ;;  %s8658_s13 = smov 0   ;;  %s9369_s0 = inlined_call_operand.vmem [shape: bf16[2,6,256,128], index: 0, kind: input, shape index: {}]   ;;  %s9370_s1 = inlined_call_operand.vmem [shape: bf16[3,128,128], index: 1, kind: input, shape index: {}]   ;;  %s9371_s2 = inlined_call_operand.vmem [shape: f32[1,128], index: 2, kind: input, shape index: {}]   ;;  %s9372_s3 = inlined_call_operand.vmem [shape: bf16[2,4,256,128], index: 3, kind: output, shape index: {}]  }
   0x1   :  { %s8660_s14 = smov 0  }
   0x2 LB: > { %s32_s15 = sadd.s32 1, %s8630_s13  ;;  %p5667_p0 = scmp.ge.s32.totalorder %s8634_s14, 1  ;;  %s8634_s14 = sphi %s8660_s14, %s13_s14   ;;  %s8630_s13 = sphi %s8658_s13, %s9374_s13   ;;  %s8626_s12 = sphi %s8656_s12, %s9373_s12  }
   0x3   : > { %p34_p1 = scmp.ge.s32.totalorder %s32_s15, 2  ;;  %p184_p2 = scmp.lt.s32.totalorder %s8634_s14, 3 }
   0x5   : > { %s9376_s15 = smov (%p34_p1, %s32_s15), 0  ;;  %p185_p3 = pnand %p5667_p0, %p184_p2 }
   0x6   : > { %v8323_v0 = vld [vmem:[%s9370_s1 + $0x40] sm:$0xff] (!%p185_p3)   ;;  %p227_p4 = scmp.lt.s32.totalorder (!%p185_p3), %s8626_s12, 1  ;;  %v8325_v2 = vld [vmem:[%s9370_s1 + $0x48] sm:$0xff] (!%p185_p3)   ;;  %v8327_v4 = vld [vmem:[%s9370_s1 + $0x50] sm:$0xff] (!%p185_p3)  }
   0x7   : > { %188 = sbr.rel (%p185_p3) target bundleno = 638 (0x27e), region = 32  ;;  %v8324_v1 = vld [vmem:[%s9370_s1 + $0x40] sm:$0xff] (!%p185_p3)   ;;  %7466 = vmatprep.subr.bf16.mxu0 (!%p185_p3), %v8323_v0  ;;  %v8326_v3 = vld [vmem:[%s9370_s1 + $0x48] sm:$0xff] (!%p185_p3)   ;;  %v8328_v5 = vld [vmem:[%s9370_s1 + $0x50] sm:$0xff] (!%p185_p3)  }
   0x8   : > { %7610 = vmatprep.subr.bf16.mxu1 (!%p185_p3), %v8324_v1  ;;  %7467 = vmatpush3.bf16.msra.mxu0 (!%p185_p3), %v8323_v0  ;;  %v8329_v6 = vld [vmem:[%s9370_s1 + $0x58] sm:$0xff] (!%p185_p3)   ;;  %v8331_v8 = vld [vmem:[%s9370_s1 + $0x60] sm:$0xff] (!%p185_p3)   ;;  %v8333_v10 = vld [vmem:[%s9370_s1 + $0x68] sm:$0xff] (!%p185_p3)  }
   0x9   : > { %7611 = vmatpush3.bf16.msra.mxu1 (!%p185_p3), %v8324_v1  ;;  %7468 = vmatprep.subr.bf16.mxu0 (!%p185_p3), %v8325_v2  ;;  %v8330_v7 = vld [vmem:[%s9370_s1 + $0x58] sm:$0xff] (!%p185_p3)   ;;  %v8332_v9 = vld [vmem:[%s9370_s1 + $0x60] sm:$0xff] (!%p185_p3)   ;;  %v8334_v11 = vld [vmem:[%s9370_s1 + $0x68] sm:$0xff] (!%p185_p3)  }
   0xa   : > { %7612 = vmatprep.subr.bf16.mxu1 (!%p185_p3), %v8326_v3  ;;  %v8335_v14 = vld [vmem:[%s9370_s1 + $0x70] sm:$0xff] (!%p185_p3)   ;;  %v8337_v16 = vld [vmem:[%s9370_s1 + $0x78] sm:$0xff] (!%p185_p3)   ;;  %v8342_v19 = vld [vmem:[%s9370_s1] sm:$0xff] (!%p185_p3)  }
   0xb   : > { %v8336_v15 = vld [vmem:[%s9370_s1 + $0x70] sm:$0xff] (!%p185_p3)   ;;  %v8338_v17 = vld [vmem:[%s9370_s1 + $0x78] sm:$0xff] (!%p185_p3)   ;;  %v8344_v20 = vld [vmem:[%s9370_s1] sm:$0xff] (!%p185_p3)  }
   0xc   : > { %7469 = vmatpush3.bf16.msra.mxu0 (!%p185_p3), %v8325_v2  ;;  %v8348_v24 = vld [vmem:[%s9370_s1 + $0x8] sm:$0xff] (!%p185_p3)   ;;  %v8354_v27 = vld [vmem:[%s9370_s1 + $0x10] sm:$0xff] (!%p185_p3)   ;;  %v8360_v32 = vld [vmem:[%s9370_s1 + $0x18] sm:$0xff] (!%p185_p3)  }
   0xd   : > { %7613 = vmatpush3.bf16.msra.mxu1 (!%p185_p3), %v8326_v3  ;;  %7470 = vmatprep.subr.bf16.mxu0 (!%p185_p3), %v8327_v4  ;;  %v8350_v25 = vld [vmem:[%s9370_s1 + $0x8] sm:$0xff] (!%p185_p3)   ;;  %v8356_v28 = vld [vmem:[%s9370_s1 + $0x10] sm:$0xff] (!%p185_p3)   ;;  %v8362_v33 = vld [vmem:[%s9370_s1 + $0x18] sm:$0xff] (!%p185_p3)  }
   0xe   : > { %s9378_s12 = smov (!%p227_p4, %s8626_s12), 1  ;;  %7614 = vmatprep.subr.bf16.mxu1 %v8328_v5  ;;  %v8366_v36 = vld [vmem:[%s9370_s1 + $0x20] sm:$0xff]   ;;  %v8372_v40 = vld [vmem:[%s9370_s1 + $0x28] sm:$0xff]   ;;  %v8378_v45 = vld [vmem:[%s9370_s1 + $0x30] sm:$0xff]  }
   0xf   : > { %s8298_s5 = smul.u32 768, %s9378_s12  ;;  %v8368_v37 = vld [vmem:[%s9370_s1 + $0x20] sm:$0xff]   ;;  %v8374_v41 = vld [vmem:[%s9370_s1 + $0x28] sm:$0xff]   ;;  %v8380_v47 = vld [vmem:[%s9370_s1 + $0x30] sm:$0xff]   ;;  %s6666_s10 = sshll.u32 %s9378_s12, 9 }
  0x10   : > { %7471 = vmatpush3.bf16.msra.mxu0 %v8327_v4  ;;  %v8384_v50 = vld [vmem:[%s9370_s1 + $0x38] sm:$0xff]   ;;  %v8390_v54 = vld [vmem:[%s9370_s1 + $0x80] sm:$0xff]   ;;  %s9165_s12 = scalar_lea.vmem %s9372_s3, %s6666_s10 }
  0x11   : > { %7615 = vmatpush3.bf16.msra.mxu1 %v8328_v5  ;;  %7472 = vmatprep.subr.bf16.mxu0 %v8329_v6  ;;  %s8710_s16 = scalar_lea.vmem %s9369_s0, %s8298_s5  ;;  %v8386_v52 = vld [vmem:[%s9370_s1 + $0x38] sm:$0xff]   ;;  %v8392_v56 = vld [vmem:[%s9370_s1 + $0x80] sm:$0xff]  }
  0x12   : > { %7616 = vmatprep.subr.bf16.mxu1 %v8330_v7  ;;  %v8339_v12 = vld [vmem:[%s8710_s16 + $0x80] sm:$0xff]   ;;  %v8341_v18 = vld [vmem:[%s8710_s16 + $0x88] sm:$0xff]   ;;  %v8345_v22 = vld [vmem:[%s8710_s16 + $0x90] sm:$0xff]  }
  0x13   : > { %v8340_v13 = vld [vmem:[%s8710_s16 + $0x100] sm:$0xff]   ;;  %7482 = vmatprep.mubr.bf16.mxu0 %v8339_v12  ;;  %v8343_v21 = vld [vmem:[%s8710_s16 + $0x108] sm:$0xff]   ;;  %v8346_v23 = vld [vmem:[%s8710_s16 + $0x110] sm:$0xff]  }
  0x14   : > { %7473 = vmatpush3.bf16.msra.mxu0 %v8329_v6  ;;  %7626 = vmatprep.mubr.bf16.mxu1 %v8340_v13  ;;  %v8347_v26 = vld [vmem:[%s8710_s16 + $0x98] sm:$0xff]   ;;  %v8351_v30 = vld [vmem:[%s8710_s16 + $0xa0] sm:$0xff]   ;;  %v8353_v34 = vld [vmem:[%s8710_s16 + $0xa8] sm:$0xff]  }
  0x15   : > { %7617 = vmatpush3.bf16.msra.mxu1 %v8330_v7  ;;  %7474 = vmatprep.subr.bf16.mxu0 %v8331_v8  ;;  %v8349_v29 = vld [vmem:[%s8710_s16 + $0x118] sm:$0xff]   ;;  %v8352_v31 = vld [vmem:[%s8710_s16 + $0x120] sm:$0xff]   ;;  %v8355_v35 = vld [vmem:[%s8710_s16 + $0x128] sm:$0xff]  }
  0x16   : > { %7618 = vmatprep.subr.bf16.mxu1 %v8332_v9  ;;  %v8357_v38 = vld [vmem:[%s8710_s16 + $0xb0] sm:$0xff]   ;;  %v8359_v42 = vld [vmem:[%s8710_s16 + $0xb8] sm:$0xff]   ;;  %v8363_v44 = vld [vmem:[%s8710_s16 + $0xc0] sm:$0xff]  }
  0x17   : > { %v8358_v39 = vld [vmem:[%s8710_s16 + $0x130] sm:$0xff]   ;;  %v8361_v43 = vld [vmem:[%s8710_s16 + $0x138] sm:$0xff]   ;;  %v8364_v46 = vld [vmem:[%s8710_s16 + $0x140] sm:$0xff]  }
  0x18   : > { %7475 = vmatpush3.bf16.msra.mxu0 %v8331_v8  ;;  %v8365_v48 = vld [vmem:[%s8710_s16 + $0xc8] sm:$0xff]   ;;  %v8369_v51 = vld [vmem:[%s8710_s16 + $0xd0] sm:$0xff]   ;;  %v8371_v55 = vld [vmem:[%s8710_s16 + $0xd8] sm:$0xff]  }
  0x19   : > { %7619 = vmatpush3.bf16.msra.mxu1 %v8332_v9  ;;  %7476 = vmatprep.subr.bf16.mxu0 %v8333_v10  ;;  %v8367_v49 = vld [vmem:[%s8710_s16 + $0x148] sm:$0xff]   ;;  %v8370_v53 = vld [vmem:[%s8710_s16 + $0x150] sm:$0xff]   ;;  %v8373_v57 = vld [vmem:[%s8710_s16 + $0x158] sm:$0xff]  }
  0x1a   : > { %7620 = vmatprep.subr.bf16.mxu1 %v8334_v11  ;;  %v8375_v58 = vld [vmem:[%s8710_s16 + $0xe0] sm:$0xff]   ;;  %v8377_v60 = vld [vmem:[%s8710_s16 + $0xe8] sm:$0xff]   ;;  %v8381_v62 = vld [vmem:[%s8710_s16 + $0xf0] sm:$0xff]  }
  0x1b   : > { %v8376_v59 = vld [vmem:[%s8710_s16 + $0x160] sm:$0xff]   ;;  %v8379_v61 = vld [vmem:[%s8710_s16 + $0x168] sm:$0xff]   ;;  %v8382_v63 = vld [vmem:[%s8710_s16 + $0x170] sm:$0xff]  }
  0x1c   : > { %7477 = vmatpush3.bf16.msra.mxu0 %v8333_v10  ;;  %v8383_v0 = vld [vmem:[%s8710_s16 + $0xf8] sm:$0xff]   ;;  %v8387_v2 = vld [vmem:[%s8710_s16] sm:$0xff]   ;;  %v8389_v4 = vld [vmem:[%s8710_s16 + $0x8] sm:$0xff]  }
  0x1d   : > { %7621 = vmatpush3.bf16.msra.mxu1 %v8334_v11  ;;  %7478 = vmatprep.subr.bf16.mxu0 %v8335_v14  ;;  %v8385_v1 = vld [vmem:[%s8710_s16 + $0x178] sm:$0xff]   ;;  %v8388_v3 = vld [vmem:[%s8710_s16 + $0x80] sm:$0xff]   ;;  %v8391_v5 = vld [vmem:[%s8710_s16 + $0x88] sm:$0xff]  }
  0x1e   : > { %7622 = vmatprep.subr.bf16.mxu1 %v8336_v15  ;;  %v8393_v6 = vld [vmem:[%s8710_s16 + $0x10] sm:$0xff]   ;;  %v8396_v8 = vld [vmem:[%s9370_s1 + $0x88] sm:$0xff]   ;;  %v8395_v10 = vld [vmem:[%s8710_s16 + $0x18] sm:$0xff]  }
  0x1f   : > { %v8394_v7 = vld [vmem:[%s8710_s16 + $0x90] sm:$0xff]   ;;  %v8398_v9 = vld [vmem:[%s9370_s1 + $0x88] sm:$0xff]   ;;  %v8397_v13 = vld [vmem:[%s8710_s16 + $0x98] sm:$0xff]  }
  0x20   : > { %7479 = vmatpush3.bf16.msra.mxu0 %v8335_v14  ;;  %v8402_v11 = vld [vmem:[%s9370_s1 + $0x90] sm:$0xff]   ;;  %v8399_v14 = vld [vmem:[%s8710_s16 + $0x20] sm:$0xff]  }
  0x21   : > { %7623 = vmatpush3.bf16.msra.mxu1 %v8336_v15  ;;  %7480 = vmatprep.subr.bf16.mxu0 %v8337_v16  ;;  %v8404_v12 = vld [vmem:[%s9370_s1 + $0x90] sm:$0xff]   ;;  %v8400_v15 = vld [vmem:[%s8710_s16 + $0xa0] sm:$0xff]  }
  0x22   : > { %7624 = vmatprep.subr.bf16.mxu1 %v8338_v17 }
  0x24   : > { %7481 = vmatpush3.bf16.msra.mxu0 %v8337_v16  ;;  %v8408_v16 = vld [vmem:[%s9370_s1 + $0x98] sm:$0xff]  }
  0x25   : > { %7625 = vmatpush3.bf16.msra.mxu1 %v8338_v17  ;;  %7514 = vmatprep.subr.bf16.mxu0 %v8342_v19  ;;  %v8410_v17 = vld [vmem:[%s9370_s1 + $0x98] sm:$0xff]  }
  0x26   : > { %7658 = vmatprep.subr.bf16.mxu1 %v8344_v20 }
  0x27   : > { %7483 = vmatmul.mubr.bf16.vlgmr.msra.gmra.mrb[0].mxu0 %v8341_v18  ;;  %v8401_v18 = vld [vmem:[%s8710_s16 + $0x28] sm:$0xff]  }
  0x28   : > { %7627 = vmatmul.mubr.bf16.vlgmr.msra.gmra.mrb[0].mxu1 %v8343_v21  ;;  %7515 = vmatpush3.bf16.msra.mxu0 %v8342_v19  ;;  %v8403_v19 = vld [vmem:[%s8710_s16 + $0xa8] sm:$0xff]   ;;  %v8416_v21 = vld [vmem:[%s9370_s1 + $0xa0] sm:$0xff]  }
  0x29   : > { %7659 = vmatpush3.bf16.msra.mxu1 %v8344_v20  ;;  %7486 = vmatprep.mubr.bf16.mxu0 %v8345_v22  ;;  %v8414_v20 = vld [vmem:[%s9370_s1 + $0xa0] sm:$0xff]   ;;  %v8405_v22 = vld [vmem:[%s8710_s16 + $0x30] sm:$0xff]  }
  0x2a   : > { %7630 = vmatprep.mubr.bf16.mxu1 %v8346_v23  ;;  %7516 = vmatprep.subr.bf16.mxu0 %v8348_v24  ;;  %v8406_v23 = vld [vmem:[%s8710_s16 + $0xb0] sm:$0xff]  }
  0x2b   : > { %7660 = vmatprep.subr.bf16.mxu1 %v8350_v25 }
  0x2c   : > { %7517 = vmatpush3.bf16.msra.mxu0 %v8348_v24  ;;  %v8420_v24 = vld [vmem:[%s9370_s1 + $0xa8] sm:$0xff]  }
  0x2d   : > { %7661 = vmatpush3.bf16.msra.mxu1 %v8350_v25  ;;  %7518 = vmatprep.subr.bf16.mxu0 %v8354_v27  ;;  %v8422_v25 = vld [vmem:[%s9370_s1 + $0xa8] sm:$0xff]  }
  0x2e   : > { %7662 = vmatprep.subr.bf16.mxu1 %v8356_v28 }
  0x2f   : > { %7487 = vmatmul.mubr.bf16.gmra.mrb[4].mxu0 %v8347_v26  ;;  %v8407_v26 = vld [vmem:[%s8710_s16 + $0x38] sm:$0xff]  }
  0x30   : > { %7631 = vmatmul.mubr.bf16.gmra.mrb[4].mxu1 %v8349_v29  ;;  %7490 = vmatprep.mubr.bf16.mxu0 %v8351_v30  ;;  %v8428_v29 = vld [vmem:[%s9370_s1 + $0xb0] sm:$0xff]   ;;  %v8411_v30 = vld [vmem:[%s8710_s16 + $0x40] sm:$0xff]  }
  0x31   : > { %7634 = vmatprep.mubr.bf16.mxu1 %v8352_v31  ;;  %7519 = vmatpush3.bf16.msra.mxu0 %v8354_v27  ;;  %v8409_v27 = vld [vmem:[%s8710_s16 + $0xb8] sm:$0xff]   ;;  %v8412_v31 = vld [vmem:[%s8710_s16 + $0xc0] sm:$0xff]  }
  0x32   : > { %7663 = vmatpush3.bf16.msra.mxu1 %v8356_v28  ;;  %7520 = vmatprep.subr.bf16.mxu0 %v8360_v32  ;;  %v8426_v28 = vld [vmem:[%s9370_s1 + $0xb0] sm:$0xff]  }
  0x33   : > { %7664 = vmatprep.subr.bf16.mxu1 %v8362_v33 }
  0x35   : > { %7521 = vmatpush3.bf16.msra.mxu0 %v8360_v32  ;;  %v8432_v32 = vld [vmem:[%s9370_s1 + $0xb8] sm:$0xff]  }
  0x36   : > { %7665 = vmatpush3.bf16.msra.mxu1 %v8362_v33  ;;  %7522 = vmatprep.subr.bf16.mxu0 %v8366_v36  ;;  %v8434_v33 = vld [vmem:[%s9370_s1 + $0xb8] sm:$0xff]  }
  0x37   : > { %7491 = vmatmul.mubr.bf16.gmra.mrb[8].mxu0 %v8353_v34  ;;  %7666 = vmatprep.subr.bf16.mxu1 %v8368_v37  ;;  %v8413_v34 = vld [vmem:[%s8710_s16 + $0x48] sm:$0xff]  }
  0x38   : > { %7635 = vmatmul.mubr.bf16.gmra.mrb[8].mxu1 %v8355_v35  ;;  %7494 = vmatprep.mubr.bf16.mxu0 %v8357_v38  ;;  %v8415_v35 = vld [vmem:[%s8710_s16 + $0xc8] sm:$0xff]   ;;  %v8417_v38 = vld [vmem:[%s8710_s16 + $0x50] sm:$0xff]  }
  0x39   : > { %7638 = vmatprep.mubr.bf16.mxu1 %v8358_v39  ;;  %7523 = vmatpush3.bf16.msra.mxu0 %v8366_v36  ;;  %v8439_v36 = vld [vmem:[%s9370_s1 + $0x40] sm:$0xff]   ;;  %v8418_v39 = vld [vmem:[%s8710_s16 + $0xd0] sm:$0xff]  }
  0x3a   : > { %7667 = vmatpush3.bf16.msra.mxu1 %v8368_v37  ;;  %7524 = vmatprep.subr.bf16.mxu0 %v8372_v40  ;;  %v8440_v37 = vld [vmem:[%s9370_s1 + $0x40] sm:$0xff]  }
  0x3b   : > { %7668 = vmatprep.subr.bf16.mxu1 %v8374_v41 }
  0x3d   : > { %7525 = vmatpush3.bf16.msra.mxu0 %v8372_v40  ;;  %v8419_v40 = vld [vmem:[%s8710_s16 + $0x58] sm:$0xff]  }
  0x3e   : > { %7669 = vmatpush3.bf16.msra.mxu1 %v8374_v41  ;;  %7526 = vmatprep.subr.bf16.mxu0 %v8378_v45  ;;  %v8421_v41 = vld [vmem:[%s8710_s16 + $0xd8] sm:$0xff]  }
  0x3f   : > { %7495 = vmatmul.mubr.bf16.gmra.mrb[12].mxu0 %v8359_v42  ;;  %7670 = vmatprep.subr.bf16.mxu1 %v8380_v47  ;;  %v8423_v42 = vld [vmem:[%s8710_s16 + $0x60] sm:$0xff]  }
  0x40   : > { %7639 = vmatmul.mubr.bf16.gmra.mrb[12].mxu1 %v8361_v43  ;;  %7498 = vmatprep.mubr.bf16.mxu0 %v8363_v44  ;;  %v8424_v43 = vld [vmem:[%s8710_s16 + $0xe0] sm:$0xff]   ;;  %v8425_v44 = vld [vmem:[%s8710_s16 + $0x68] sm:$0xff]  }
  0x41   : > { %7642 = vmatprep.mubr.bf16.mxu1 %v8364_v46  ;;  %7527 = vmatpush3.bf16.msra.mxu0 %v8378_v45  ;;  %v8427_v45 = vld [vmem:[%s8710_s16 + $0xe8] sm:$0xff]   ;;  %v8429_v46 = vld [vmem:[%s8710_s16 + $0x70] sm:$0xff]  }
  0x42   : > { %7671 = vmatpush3.bf16.msra.mxu1 %v8380_v47  ;;  %7528 = vmatprep.subr.bf16.mxu0 %v8384_v50  ;;  %v8430_v47 = vld [vmem:[%s8710_s16 + $0xf0] sm:$0xff]  }
  0x43   : > { %7672 = vmatprep.subr.bf16.mxu1 %v8386_v52 }
  0x45   : > { %7529 = vmatpush3.bf16.msra.mxu0 %v8384_v50  ;;  %v8435_v50 = vld [vmem:[%s8710_s16 + $0x100] sm:$0xff]  }
  0x46   : > { %7673 = vmatpush3.bf16.msra.mxu1 %v8386_v52  ;;  %7562 = vmatprep.subr.bf16.mxu0 %v8390_v54  ;;  %v8437_v52 = vld [vmem:[%s8710_s16 + $0x108] sm:$0xff]  }
  0x47   : > { %7499 = vmatmul.mubr.bf16.gmra.mrb[16].mxu0 %v8365_v48  ;;  %7706 = vmatprep.subr.bf16.mxu1 %v8392_v56  ;;  %v8431_v48 = vld [vmem:[%s8710_s16 + $0x78] sm:$0xff]  }
  0x48   : > { %7643 = vmatmul.mubr.bf16.gmra.mrb[16].mxu1 %v8367_v49  ;;  %7502 = vmatprep.mubr.bf16.mxu0 %v8369_v51  ;;  %v8433_v49 = vld [vmem:[%s8710_s16 + $0xf8] sm:$0xff]   ;;  %v8436_v51 = vld [vmem:[%s8710_s16 + $0x180] sm:$0xff]  }
  0x49   : > { %7646 = vmatprep.mubr.bf16.mxu1 %v8370_v53  ;;  %v8438_v53 = vld [vmem:[%s8710_s16 + $0x188] sm:$0xff]  }
  0x4f   : > { %7503 = vmatmul.mubr.bf16.gmra.mrb[20].mxu0 %v8371_v55  ;;  %v8442_v55 = vld [vmem:[%s8710_s16 + $0x190] sm:$0xff]  }
  0x50   : > { %7647 = vmatmul.mubr.bf16.gmra.mrb[20].mxu1 %v8373_v57  ;;  %7506 = vmatprep.mubr.bf16.mxu0 %v8375_v58  ;;  %v8446_v57 = vld [vmem:[%s9370_s1 + $0x48] sm:$0xff]   ;;  %v8443_v58 = vld [vmem:[%s8710_s16 + $0x118] sm:$0xff]  }
  0x51   : > { %7650 = vmatprep.mubr.bf16.mxu1 %v8376_v59  ;;  %v8451_v59 = vld [vmem:[%s9370_s1 + $0x50] sm:$0xff]  }
  0x57   : > { %7507 = vmatmul.mubr.bf16.gmra.mrb[24].mxu0 %v8377_v60  ;;  %v8452_v60 = vld [vmem:[%s9370_s1 + $0x50] sm:$0xff]  }
  0x58   : > { %7651 = vmatmul.mubr.bf16.gmra.mrb[24].mxu1 %v8379_v61  ;;  %7510 = vmatprep.mubr.bf16.mxu0 %v8381_v62  ;;  %v8444_v61 = vld [vmem:[%s8710_s16 + $0x198] sm:$0xff]   ;;  %v8447_v62 = vld [vmem:[%s8710_s16 + $0x120] sm:$0xff]  }
  0x59   : > { %7654 = vmatprep.mubr.bf16.mxu1 %v8382_v63  ;;  %v8448_v63 = vld [vmem:[%s8710_s16 + $0x1a0] sm:$0xff]  }
  0x5f   : > { %7511 = vmatmul.mubr.bf16.gmra.mrb[28].mxu0 %v8383_v0  ;;  %v8457_v0 = vld [vmem:[%s9370_s1 + $0x58] sm:$0xff]  }
  0x60   : > { %7655 = vmatmul.mubr.bf16.gmra.mrb[28].mxu1 %v8385_v1  ;;  %7530 = vmatprep.mubr.bf16.mxu0 %v8387_v2  ;;  %v8458_v1 = vld [vmem:[%s9370_s1 + $0x58] sm:$0xff]   ;;  %v8449_v2 = vld [vmem:[%s8710_s16 + $0x128] sm:$0xff]  }
  0x61   : > { %7674 = vmatprep.mubr.bf16.mxu1 %v8388_v3  ;;  %v8450_v3 = vld [vmem:[%s8710_s16 + $0x1a8] sm:$0xff]  }
  0x67   : > { %7531 = vmatmul.mubr.bf16.vlgmr.msra.gmra.mrb[0].mxu0 %v8389_v4  ;;  %v8463_v4 = vld [vmem:[%s9370_s1 + $0x60] sm:$0xff]  }
  0x68   : > { %7675 = vmatmul.mubr.bf16.vlgmr.msra.gmra.mrb[0].mxu1 %v8391_v5  ;;  %7563 = vmatpush3.bf16.msra.mxu0 %v8390_v54  ;;  %v8441_v54 = vld [vmem:[%s8710_s16 + $0x110] sm:$0xff]   ;;  %v8464_v5 = vld [vmem:[%s9370_s1 + $0x60] sm:$0xff]  }
  0x69   : > { %7707 = vmatpush3.bf16.msra.mxu1 %v8392_v56  ;;  %7534 = vmatprep.mubr.bf16.mxu0 %v8393_v6  ;;  %v8445_v56 = vld [vmem:[%s9370_s1 + $0x48] sm:$0xff]   ;;  %v8453_v6 = vld [vmem:[%s8710_s16 + $0x130] sm:$0xff]  }
  0x6a   : > { %7678 = vmatprep.mubr.bf16.mxu1 %v8394_v7  ;;  %7564 = vmatprep.subr.bf16.mxu0 %v8396_v8  ;;  %v8454_v7 = vld [vmem:[%s8710_s16 + $0x1b0] sm:$0xff]  }
  0x6b   : > { %7708 = vmatprep.subr.bf16.mxu1 %v8398_v9 }
  0x6c   : > { %7565 = vmatpush3.bf16.msra.mxu0 %v8396_v8  ;;  %v8469_v8 = vld [vmem:[%s9370_s1 + $0x68] sm:$0xff]  }
  0x6d   : > { %7709 = vmatpush3.bf16.msra.mxu1 %v8398_v9  ;;  %7566 = vmatprep.subr.bf16.mxu0 %v8402_v11  ;;  %v8470_v9 = vld [vmem:[%s9370_s1 + $0x68] sm:$0xff]  }
  0x6e   : > { %7710 = vmatprep.subr.bf16.mxu1 %v8404_v12 }
  0x6f   : > { %7535 = vmatmul.mubr.bf16.gmra.mrb[4].mxu0 %v8395_v10  ;;  %v8455_v10 = vld [vmem:[%s8710_s16 + $0x138] sm:$0xff]  }
  0x70   : > { %7679 = vmatmul.mubr.bf16.gmra.mrb[4].mxu1 %v8397_v13  ;;  %7538 = vmatprep.mubr.bf16.mxu0 %v8399_v14  ;;  %v8476_v13 = vld [vmem:[%s9370_s1 + $0x70] sm:$0xff]   ;;  %v8459_v14 = vld [vmem:[%s8710_s16 + $0x140] sm:$0xff]  }
  0x71   : > { %7682 = vmatprep.mubr.bf16.mxu1 %v8400_v15  ;;  %7567 = vmatpush3.bf16.msra.mxu0 %v8402_v11  ;;  %v8456_v11 = vld [vmem:[%s8710_s16 + $0x1b8] sm:$0xff]   ;;  %v8460_v15 = vld [vmem:[%s8710_s16 + $0x1c0] sm:$0xff]  }
  0x72   : > { %7711 = vmatpush3.bf16.msra.mxu1 %v8404_v12  ;;  %7568 = vmatprep.subr.bf16.mxu0 %v8408_v16  ;;  %v8475_v12 = vld [vmem:[%s9370_s1 + $0x70] sm:$0xff]  }
  0x73   : > { %7712 = vmatprep.subr.bf16.mxu1 %v8410_v17 }
  0x75   : > { %7569 = vmatpush3.bf16.msra.mxu0 %v8408_v16  ;;  %v8481_v16 = vld [vmem:[%s9370_s1 + $0x78] sm:$0xff]  }
  0x76   : > { %7713 = vmatpush3.bf16.msra.mxu1 %v8410_v17  ;;  %7570 = vmatprep.subr.bf16.mxu0 %v8414_v20  ;;  %v8482_v17 = vld [vmem:[%s9370_s1 + $0x78] sm:$0xff]  }
  0x77   : > { %7539 = vmatmul.mubr.bf16.gmra.mrb[8].mxu0 %v8401_v18  ;;  %7714 = vmatprep.subr.bf16.mxu1 %v8416_v21  ;;  %v8461_v18 = vld [vmem:[%s8710_s16 + $0x148] sm:$0xff]  }
  0x78   : > { %7683 = vmatmul.mubr.bf16.gmra.mrb[8].mxu1 %v8403_v19  ;;  %7542 = vmatprep.mubr.bf16.mxu0 %v8405_v22  ;;  %v8462_v19 = vld [vmem:[%s8710_s16 + $0x1c8] sm:$0xff]   ;;  %v8465_v22 = vld [vmem:[%s8710_s16 + $0x150] sm:$0xff]  }
  0x79   : > { %7686 = vmatprep.mubr.bf16.mxu1 %v8406_v23  ;;  %7571 = vmatpush3.bf16.msra.mxu0 %v8414_v20  ;;  %v8486_v20 = vld [vmem:[%s9370_s1] sm:$0xff]   ;;  %v8466_v23 = vld [vmem:[%s8710_s16 + $0x1d0] sm:$0xff]  }
  0x7a   : > { %7715 = vmatpush3.bf16.msra.mxu1 %v8416_v21  ;;  %7572 = vmatprep.subr.bf16.mxu0 %v8420_v24  ;;  %v8488_v21 = vld [vmem:[%s9370_s1] sm:$0xff]  }
  0x7b   : > { %7716 = vmatprep.subr.bf16.mxu1 %v8422_v25 }
  0x7d   : > { %7573 = vmatpush3.bf16.msra.mxu0 %v8420_v24  ;;  %v8467_v24 = vld [vmem:[%s8710_s16 + $0x158] sm:$0xff]  }
  0x7e   : > { %7717 = vmatpush3.bf16.msra.mxu1 %v8422_v25  ;;  %7574 = vmatprep.subr.bf16.mxu0 %v8426_v28  ;;  %v8468_v25 = vld [vmem:[%s8710_s16 + $0x1d8] sm:$0xff]  }
  0x7f   : > { %7543 = vmatmul.mubr.bf16.gmra.mrb[12].mxu0 %v8407_v26  ;;  %7718 = vmatprep.subr.bf16.mxu1 %v8428_v29  ;;  %v8471_v26 = vld [vmem:[%s8710_s16 + $0x160] sm:$0xff]  }
  0x80   : > { %7687 = vmatmul.mubr.bf16.gmra.mrb[12].mxu1 %v8409_v27  ;;  %7546 = vmatprep.mubr.bf16.mxu0 %v8411_v30  ;;  %v8472_v27 = vld [vmem:[%s8710_s16 + $0x1e0] sm:$0xff]   ;;  %v8477_v30 = vld [vmem:[%s8710_s16 + $0x170] sm:$0xff]  }
  0x81   : > { %7690 = vmatprep.mubr.bf16.mxu1 %v8412_v31  ;;  %7575 = vmatpush3.bf16.msra.mxu0 %v8426_v28  ;;  %v8473_v28 = vld [vmem:[%s8710_s16 + $0x168] sm:$0xff]   ;;  %v8478_v31 = vld [vmem:[%s8710_s16 + $0x1f0] sm:$0xff]  }
  0x82   : > { %7719 = vmatpush3.bf16.msra.mxu1 %v8428_v29  ;;  %7576 = vmatprep.subr.bf16.mxu0 %v8432_v32  ;;  %v8474_v29 = vld [vmem:[%s8710_s16 + $0x1e8] sm:$0xff]  }
  0x83   : > { %7720 = vmatprep.subr.bf16.mxu1 %v8434_v33 }
  0x85   : > { %7577 = vmatpush3.bf16.msra.mxu0 %v8432_v32  ;;  %v8479_v32 = vld [vmem:[%s8710_s16 + $0x178] sm:$0xff]  }
  0x86   : > { %7721 = vmatpush3.bf16.msra.mxu1 %v8434_v33  ;;  %7754 = vmatprep.subr.bf16.mxu0 %v8439_v36  ;;  %v8480_v33 = vld [vmem:[%s8710_s16 + $0x1f8] sm:$0xff]  }
  0x87   : > { %7547 = vmatmul.mubr.bf16.gmra.mrb[16].mxu0 %v8413_v34  ;;  %7898 = vmatprep.subr.bf16.mxu1 %v8440_v37  ;;  %v8483_v34 = vld [vmem:[%s8710_s16 + $0x180] sm:$0xff]  }
  0x88   : > { %7691 = vmatmul.mubr.bf16.gmra.mrb[16].mxu1 %v8415_v35  ;;  %7550 = vmatprep.mubr.bf16.mxu0 %v8417_v38  ;;  %v8484_v35 = vld [vmem:[%s8710_s16 + $0x200] sm:$0xff]   ;;  %v8489_v38 = vld [vmem:[%s8710_s16 + $0x190] sm:$0xff]  }
  0x89   : > { %7694 = vmatprep.mubr.bf16.mxu1 %v8418_v39  ;;  %v8490_v39 = vld [vmem:[%s8710_s16 + $0x210] sm:$0xff]  }
  0x8f   : > { %7551 = vmatmul.mubr.bf16.gmra.mrb[20].mxu0 %v8419_v40  ;;  %v8492_v40 = vld [vmem:[%s9370_s1 + $0x8] sm:$0xff]  }
  0x90   : > { %7695 = vmatmul.mubr.bf16.gmra.mrb[20].mxu1 %v8421_v41  ;;  %7554 = vmatprep.mubr.bf16.mxu0 %v8423_v42  ;;  %v8494_v41 = vld [vmem:[%s9370_s1 + $0x8] sm:$0xff]   ;;  %v8491_v42 = vld [vmem:[%s8710_s16 + $0x198] sm:$0xff]  }
  0x91   : > { %7698 = vmatprep.mubr.bf16.mxu1 %v8424_v43  ;;  %v8498_v43 = vld [vmem:[%s9370_s1 + $0x10] sm:$0xff]  }
  0x97   : > { %7555 = vmatmul.mubr.bf16.gmra.mrb[24].mxu0 %v8425_v44  ;;  %v8500_v44 = vld [vmem:[%s9370_s1 + $0x10] sm:$0xff]  }
  0x98   : > { %7699 = vmatmul.mubr.bf16.gmra.mrb[24].mxu1 %v8427_v45  ;;  %7558 = vmatprep.mubr.bf16.mxu0 %v8429_v46  ;;  %v8493_v45 = vld [vmem:[%s8710_s16 + $0x218] sm:$0xff]   ;;  %v8495_v46 = vld [vmem:[%s8710_s16 + $0x1a0] sm:$0xff]  }
  0x99   : > { %7702 = vmatprep.mubr.bf16.mxu1 %v8430_v47  ;;  %v8496_v47 = vld [vmem:[%s8710_s16 + $0x220] sm:$0xff]  }
  0x9f   : > { %7559 = vmatmul.mubr.bf16.gmra.mrb[28].mxu0 %v8431_v48  ;;  %v8504_v48 = vld [vmem:[%s9370_s1 + $0x18] sm:$0xff]  }
  0xa0   : > { %7703 = vmatmul.mubr.bf16.gmra.mrb[28].mxu1 %v8433_v49  ;;  %7578 = vmatprep.mubr.bf16.mxu0 %v8435_v50  ;;  %v8506_v49 = vld [vmem:[%s9370_s1 + $0x18] sm:$0xff]   ;;  %v8497_v50 = vld [vmem:[%s8710_s16 + $0x1a8] sm:$0xff]  }
  0xa1   : > { %7722 = vmatprep.mubr.bf16.mxu1 %v8436_v51  ;;  %v8499_v51 = vld [vmem:[%s8710_s16 + $0x228] sm:$0xff]  }
  0xa7   : > { %7579 = vmatmul.mubr.bf16.vlgmr.msra.gmra.mrb[0].mxu0 %v8437_v52  ;;  %v8510_v52 = vld [vmem:[%s9370_s1 + $0x20] sm:$0xff]  }
  0xa8   : > { %7723 = vmatmul.mubr.bf16.vlgmr.msra.gmra.mrb[0].mxu1 %v8438_v53  ;;  %7755 = vmatpush3.bf16.msra.mxu0 %v8439_v36  ;;  %v8485_v36 = vld [vmem:[%s8710_s16 + $0x188] sm:$0xff]   ;;  %v8512_v53 = vld [vmem:[%s9370_s1 + $0x20] sm:$0xff]  }
  0xa9   : > { %7899 = vmatpush3.bf16.msra.mxu1 %v8440_v37  ;;  %7582 = vmatprep.mubr.bf16.mxu0 %v8441_v54  ;;  %v8487_v37 = vld [vmem:[%s8710_s16 + $0x208] sm:$0xff]   ;;  %v8501_v54 = vld [vmem:[%s8710_s16 + $0x1b0] sm:$0xff]  }
  0xaa   : > { %7726 = vmatprep.mubr.bf16.mxu1 %v8442_v55  ;;  %7756 = vmatprep.subr.bf16.mxu0 %v8445_v56  ;;  %v8502_v55 = vld [vmem:[%s8710_s16 + $0x230] sm:$0xff]  }
  0xab   : > { %7900 = vmatprep.subr.bf16.mxu1 %v8446_v57 }
  0xac   : > { %7757 = vmatpush3.bf16.msra.mxu0 %v8445_v56  ;;  %v8516_v56 = vld [vmem:[%s9370_s1 + $0x28] sm:$0xff]  }
  0xad   : > { %7901 = vmatpush3.bf16.msra.mxu1 %v8446_v57  ;;  %7758 = vmatprep.subr.bf16.mxu0 %v8451_v59  ;;  %v8518_v57 = vld [vmem:[%s9370_s1 + $0x28] sm:$0xff]  }
  0xae   : > { %7902 = vmatprep.subr.bf16.mxu1 %v8452_v60 }
  0xaf   : > { %7583 = vmatmul.mubr.bf16.gmra.mrb[4].mxu0 %v8443_v58  ;;  %v8503_v58 = vld [vmem:[%s8710_s16 + $0x1b8] sm:$0xff]  }
  0xb0   : > { %7727 = vmatmul.mubr.bf16.gmra.mrb[4].mxu1 %v8444_v61  ;;  %7586 = vmatprep.mubr.bf16.mxu0 %v8447_v62  ;;  %v8524_v61 = vld [vmem:[%s9370_s1 + $0x30] sm:$0xff]   ;;  %v8507_v62 = vld [vmem:[%s8710_s16 + $0x1c0] sm:$0xff]  }
  0xb1   : > { %7730 = vmatprep.mubr.bf16.mxu1 %v8448_v63  ;;  %7759 = vmatpush3.bf16.msra.mxu0 %v8451_v59  ;;  %v8505_v59 = vld [vmem:[%s8710_s16 + $0x238] sm:$0xff]   ;;  %v8508_v63 = vld [vmem:[%s8710_s16 + $0x240] sm:$0xff]  }
  0xb2   : > { %7903 = vmatpush3.bf16.msra.mxu1 %v8452_v60  ;;  %7760 = vmatprep.subr.bf16.mxu0 %v8457_v0  ;;  %v8522_v60 = vld [vmem:[%s9370_s1 + $0x30] sm:$0xff]  }
  0xb3   : > { %7904 = vmatprep.subr.bf16.mxu1 %v8458_v1 }
  0xb5   : > { %7761 = vmatpush3.bf16.msra.mxu0 %v8457_v0  ;;  %v8528_v0 = vld [vmem:[%s9370_s1 + $0x38] sm:$0xff]  }
  0xb6   : > { %7905 = vmatpush3.bf16.msra.mxu1 %v8458_v1  ;;  %7762 = vmatprep.subr.bf16.mxu0 %v8463_v4  ;;  %v8530_v1 = vld [vmem:[%s9370_s1 + $0x38] sm:$0xff]  }
  0xb7   : > { %7587 = vmatmul.mubr.bf16.gmra.mrb[8].mxu0 %v8449_v2  ;;  %7906 = vmatprep.subr.bf16.mxu1 %v8464_v5  ;;  %v8509_v2 = vld [vmem:[%s8710_s16 + $0x1c8] sm:$0xff]  }
  0xb8   : > { %7731 = vmatmul.mubr.bf16.gmra.mrb[8].mxu1 %v8450_v3  ;;  %7590 = vmatprep.mubr.bf16.mxu0 %v8453_v6  ;;  %v8511_v3 = vld [vmem:[%s8710_s16 + $0x248] sm:$0xff]   ;;  %v8513_v6 = vld [vmem:[%s8710_s16 + $0x1d0] sm:$0xff]  }
  0xb9   : > { %7734 = vmatprep.mubr.bf16.mxu1 %v8454_v7  ;;  %7763 = vmatpush3.bf16.msra.mxu0 %v8463_v4  ;;  %v8534_v4 = vld [vmem:[%s9370_s1 + $0x80] sm:$0xff]   ;;  %v8514_v7 = vld [vmem:[%s8710_s16 + $0x250] sm:$0xff]  }
  0xba   : > { %7907 = vmatpush3.bf16.msra.mxu1 %v8464_v5  ;;  %7764 = vmatprep.subr.bf16.mxu0 %v8469_v8  ;;  %v8536_v5 = vld [vmem:[%s9370_s1 + $0x80] sm:$0xff]  }
  0xbb   : > { %7908 = vmatprep.subr.bf16.mxu1 %v8470_v9 }
  0xbd   : > { %7765 = vmatpush3.bf16.msra.mxu0 %v8469_v8  ;;  %v8515_v8 = vld [vmem:[%s8710_s16 + $0x1d8] sm:$0xff]  }
  0xbe   : > { %7909 = vmatpush3.bf16.msra.mxu1 %v8470_v9  ;;  %7766 = vmatprep.subr.bf16.mxu0 %v8475_v12  ;;  %v8517_v9 = vld [vmem:[%s8710_s16 + $0x258] sm:$0xff]  }
  0xbf   : > { %7591 = vmatmul.mubr.bf16.gmra.mrb[12].mxu0 %v8455_v10  ;;  %7910 = vmatprep.subr.bf16.mxu1 %v8476_v13  ;;  %v8519_v10 = vld [vmem:[%s8710_s16 + $0x1e0] sm:$0xff]  }
  0xc0   : > { %7735 = vmatmul.mubr.bf16.gmra.mrb[12].mxu1 %v8456_v11  ;;  %7594 = vmatprep.mubr.bf16.mxu0 %v8459_v14  ;;  %v8520_v11 = vld [vmem:[%s8710_s16 + $0x260] sm:$0xff]   ;;  %v8525_v14 = vld [vmem:[%s8710_s16 + $0x1f0] sm:$0xff]  }
  0xc1   : > { %7738 = vmatprep.mubr.bf16.mxu1 %v8460_v15  ;;  %7767 = vmatpush3.bf16.msra.mxu0 %v8475_v12  ;;  %v8521_v12 = vld [vmem:[%s8710_s16 + $0x1e8] sm:$0xff]   ;;  %v8526_v15 = vld [vmem:[%s8710_s16 + $0x270] sm:$0xff]  }
  0xc2   : > { %7911 = vmatpush3.bf16.msra.mxu1 %v8476_v13  ;;  %7768 = vmatprep.subr.bf16.mxu0 %v8481_v16  ;;  %v8523_v13 = vld [vmem:[%s8710_s16 + $0x268] sm:$0xff]  }
  0xc3   : > { %7912 = vmatprep.subr.bf16.mxu1 %v8482_v17 }
  0xc5   : > { %7769 = vmatpush3.bf16.msra.mxu0 %v8481_v16  ;;  %v8527_v16 = vld [vmem:[%s8710_s16 + $0x1f8] sm:$0xff]  }
  0xc6   : > { %7913 = vmatpush3.bf16.msra.mxu1 %v8482_v17  ;;  %7802 = vmatprep.subr.bf16.mxu0 %v8486_v20  ;;  %v8529_v17 = vld [vmem:[%s8710_s16 + $0x278] sm:$0xff]  }
  0xc7   : > { %7595 = vmatmul.mubr.bf16.gmra.mrb[16].mxu0 %v8461_v18  ;;  %7946 = vmatprep.subr.bf16.mxu1 %v8488_v21  ;;  %v8531_v18 = vld [vmem:[%s8710_s16 + $0x100] sm:$0xff]  }
  0xc8   : > { %7739 = vmatmul.mubr.bf16.gmra.mrb[16].mxu1 %v8462_v19  ;;  %7598 = vmatprep.mubr.bf16.mxu0 %v8465_v22  ;;  %v8532_v19 = vld [vmem:[%s8710_s16 + $0x180] sm:$0xff]   ;;  %v8537_v22 = vld [vmem:[%s8710_s16 + $0x110] sm:$0xff]  }
  0xc9   : > { %7742 = vmatprep.mubr.bf16.mxu1 %v8466_v23  ;;  %v8538_v23 = vld [vmem:[%s8710_s16 + $0x190] sm:$0xff]  }
  0xcf   : > { %7599 = vmatmul.mubr.bf16.gmra.mrb[20].mxu0 %v8467_v24  ;;  %v8540_v24 = vld [vmem:[%s9370_s1 + $0x88] sm:$0xff]  }
  0xd0   : > { %7743 = vmatmul.mubr.bf16.gmra.mrb[20].mxu1 %v8468_v25  ;;  %7602 = vmatprep.mubr.bf16.mxu0 %v8471_v26  ;;  %v8542_v25 = vld [vmem:[%s9370_s1 + $0x88] sm:$0xff]   ;;  %v8546_v26 = vld [vmem:[%s9370_s1 + $0x90] sm:$0xff]  }
  0xd1   : > { %7746 = vmatprep.mubr.bf16.mxu1 %v8472_v27  ;;  %v8548_v27 = vld [vmem:[%s9370_s1 + $0x90] sm:$0xff]  }
  0xd7   : > { %7603 = vmatmul.mubr.bf16.gmra.mrb[24].mxu0 %v8473_v28  ;;  %v8539_v28 = vld [vmem:[%s8710_s16 + $0x118] sm:$0xff]  }
  0xd8   : > { %7747 = vmatmul.mubr.bf16.gmra.mrb[24].mxu1 %v8474_v29  ;;  %7606 = vmatprep.mubr.bf16.mxu0 %v8477_v30  ;;  %v8541_v29 = vld [vmem:[%s8710_s16 + $0x198] sm:$0xff]   ;;  %v8543_v30 = vld [vmem:[%s8710_s16 + $0x120] sm:$0xff]  }
  0xd9   : > { %7750 = vmatprep.mubr.bf16.mxu1 %v8478_v31  ;;  %v8544_v31 = vld [vmem:[%s8710_s16 + $0x1a0] sm:$0xff]  }
  0xdf   : > { %7607 = vmatmul.mubr.bf16.gmra.mrb[28].mxu0 %v8479_v32  ;;  %v8552_v32 = vld [vmem:[%s9370_s1 + $0x98] sm:$0xff]  }
  0xe0   : > { %7751 = vmatmul.mubr.bf16.gmra.mrb[28].mxu1 %v8480_v33  ;;  %7770 = vmatprep.mubr.bf16.mxu0 %v8483_v34  ;;  %v8554_v33 = vld [vmem:[%s9370_s1 + $0x98] sm:$0xff]   ;;  %v8558_v34 = vld [vmem:[%s9370_s1 + $0xa0] sm:$0xff]  }
  0xe1   : > { %7914 = vmatprep.mubr.bf16.mxu1 %v8484_v35  ;;  %v8545_v35 = vld [vmem:[%s8710_s16 + $0x128] sm:$0xff]  }
  0xe7   : > { %7771 = vmatmul.mubr.bf16.vlgmr.msra.gmra.mrb[32].mxu0 %v8485_v36  ;;  %v8560_v36 = vld [vmem:[%s9370_s1 + $0xa0] sm:$0xff]  }
  0xe8   : > { %7915 = vmatmul.mubr.bf16.vlgmr.msra.gmra.mrb[32].mxu1 %v8487_v37  ;;  %7803 = vmatpush3.bf16.msra.mxu0 %v8486_v20  ;;  %v8533_v20 = vld [vmem:[%s8710_s16 + $0x108] sm:$0xff]  }
  0xe9   : > { %7947 = vmatpush3.bf16.msra.mxu1 %v8488_v21  ;;  %7774 = vmatprep.mubr.bf16.mxu0 %v8489_v38  ;;  %v8535_v21 = vld [vmem:[%s8710_s16 + $0x188] sm:$0xff]   ;;  %v8549_v38 = vld [vmem:[%s8710_s16 + $0x130] sm:$0xff]  }
  0xea   : > { %7918 = vmatprep.mubr.bf16.mxu1 %v8490_v39  ;;  %7804 = vmatprep.subr.bf16.mxu0 %v8492_v40  ;;  %v8547_v37 = vld [vmem:[%s8710_s16 + $0x1a8] sm:$0xff]   ;;  %v8550_v39 = vld [vmem:[%s8710_s16 + $0x1b0] sm:$0xff]  }
  0xeb   : > { %7948 = vmatprep.subr.bf16.mxu1 %v8494_v41 }
  0xec   : > { %7805 = vmatpush3.bf16.msra.mxu0 %v8492_v40  ;;  %v8564_v40 = vld [vmem:[%s9370_s1 + $0xa8] sm:$0xff]  }
  0xed   : > { %7949 = vmatpush3.bf16.msra.mxu1 %v8494_v41  ;;  %7806 = vmatprep.subr.bf16.mxu0 %v8498_v43  ;;  %v8566_v41 = vld [vmem:[%s9370_s1 + $0xa8] sm:$0xff]  }
  0xee   : > { %7950 = vmatprep.subr.bf16.mxu1 %v8500_v44 }
  0xef   : > { %7775 = vmatmul.mubr.bf16.gmra.mrb[36].mxu0 %v8491_v42  ;;  %v8570_v42 = vld [vmem:[%s9370_s1 + $0xb0] sm:$0xff]  }
  0xf0   : > { %7919 = vmatmul.mubr.bf16.gmra.mrb[36].mxu1 %v8493_v45  ;;  %7778 = vmatprep.mubr.bf16.mxu0 %v8495_v46  ;;  %v8553_v45 = vld [vmem:[%s8710_s16 + $0x1b8] sm:$0xff]   ;;  %v8555_v46 = vld [vmem:[%s8710_s16 + $0x140] sm:$0xff]  }
  0xf1   : > { %7922 = vmatprep.mubr.bf16.mxu1 %v8496_v47  ;;  %7807 = vmatpush3.bf16.msra.mxu0 %v8498_v43  ;;  %v8551_v43 = vld [vmem:[%s8710_s16 + $0x138] sm:$0xff]   ;;  %v8556_v47 = vld [vmem:[%s8710_s16 + $0x1c0] sm:$0xff]  }
  0xf2   : > { %7951 = vmatpush3.bf16.msra.mxu1 %v8500_v44  ;;  %7808 = vmatprep.subr.bf16.mxu0 %v8504_v48  ;;  %v8572_v44 = vld [vmem:[%s9370_s1 + $0xb0] sm:$0xff]  }
  0xf3   : > { %7952 = vmatprep.subr.bf16.mxu1 %v8506_v49 }
  0xf5   : > { %7809 = vmatpush3.bf16.msra.mxu0 %v8504_v48  ;;  %v8576_v48 = vld [vmem:[%s9370_s1 + $0xb8] sm:$0xff]  }
  0xf6   : > { %7953 = vmatpush3.bf16.msra.mxu1 %v8506_v49  ;;  %7810 = vmatprep.subr.bf16.mxu0 %v8510_v52  ;;  %v8578_v49 = vld [vmem:[%s9370_s1 + $0xb8] sm:$0xff]  }
  0xf7   : > { %7779 = vmatmul.mubr.bf16.gmra.mrb[40].mxu0 %v8497_v50  ;;  %7954 = vmatprep.subr.bf16.mxu1 %v8512_v53  ;;  %v8557_v50 = vld [vmem:[%s8710_s16 + $0x148] sm:$0xff]  }
  0xf8   : > { %7923 = vmatmul.mubr.bf16.gmra.mrb[40].mxu1 %v8499_v51  ;;  %7782 = vmatprep.mubr.bf16.mxu0 %v8501_v54  ;;  %v8559_v51 = vld [vmem:[%s8710_s16 + $0x1c8] sm:$0xff]   ;;  %v8563_v54 = vld [vmem:[%s8710_s16 + $0x158] sm:$0xff]  }
  0xf9   : > { %7926 = vmatprep.mubr.bf16.mxu1 %v8502_v55  ;;  %7811 = vmatpush3.bf16.msra.mxu0 %v8510_v52  ;;  %v8561_v52 = vld [vmem:[%s8710_s16 + $0x150] sm:$0xff]   ;;  %v8565_v55 = vld [vmem:[%s8710_s16 + $0x1d8] sm:$0xff]  }
  0xfa   : > { %7955 = vmatpush3.bf16.msra.mxu1 %v8512_v53  ;;  %7812 = vmatprep.subr.bf16.mxu0 %v8516_v56  ;;  %v8562_v53 = vld [vmem:[%s8710_s16 + $0x1d0] sm:$0xff]  }
  0xfb   : > { %7956 = vmatprep.subr.bf16.mxu1 %v8518_v57 }
  0xfd   : > { %7813 = vmatpush3.bf16.msra.mxu0 %v8516_v56  ;;  %v8567_v56 = vld [vmem:[%s8710_s16 + $0x160] sm:$0xff]  }
  0xfe   : > { %7957 = vmatpush3.bf16.msra.mxu1 %v8518_v57  ;;  %7814 = vmatprep.subr.bf16.mxu0 %v8522_v60  ;;  %v8568_v57 = vld [vmem:[%s8710_s16 + $0x1e0] sm:$0xff]  }
  0xff   : > { %7783 = vmatmul.mubr.bf16.gmra.mrb[44].mxu0 %v8503_v58  ;;  %7958 = vmatprep.subr.bf16.mxu1 %v8524_v61  ;;  %v8569_v58 = vld [vmem:[%s8710_s16 + $0x168] sm:$0xff]  }
 0x100   : > { %7927 = vmatmul.mubr.bf16.gmra.mrb[44].mxu1 %v8505_v59  ;;  %7786 = vmatprep.mubr.bf16.mxu0 %v8507_v62  ;;  %v8571_v59 = vld [vmem:[%s8710_s16 + $0x1e8] sm:$0xff]   ;;  %v8575_v62 = vld [vmem:[%s8710_s16 + $0x178] sm:$0xff]  }
 0x101   : > { %7930 = vmatprep.mubr.bf16.mxu1 %v8508_v63  ;;  %7815 = vmatpush3.bf16.msra.mxu0 %v8522_v60  ;;  %v8573_v60 = vld [vmem:[%s8710_s16 + $0x170] sm:$0xff]   ;;  %v8577_v63 = vld [vmem:[%s8710_s16 + $0x1f8] sm:$0xff]  }
 0x102   : > { %7959 = vmatpush3.bf16.msra.mxu1 %v8524_v61  ;;  %7816 = vmatprep.subr.bf16.mxu0 %v8528_v0  ;;  %v8574_v61 = vld [vmem:[%s8710_s16 + $0x1f0] sm:$0xff]  }
 0x103   : > { %7960 = vmatprep.subr.bf16.mxu1 %v8530_v1 }
 0x105   : > { %7817 = vmatpush3.bf16.msra.mxu0 %v8528_v0  ;;  %v8579_v0 = vld [vmem:[%s8710_s16 + $0x200] sm:$0xff]  }
 0x106   : > { %7961 = vmatpush3.bf16.msra.mxu1 %v8530_v1  ;;  %7850 = vmatprep.subr.bf16.mxu0 %v8534_v4  ;;  %v8580_v1 = vld [vmem:[%s8710_s16 + $0x280] sm:$0xff]  }
 0x107   : > { %7787 = vmatmul.mubr.bf16.gmra.mrb[48].mxu0 %v8509_v2  ;;  %7994 = vmatprep.subr.bf16.mxu1 %v8536_v5  ;;  %v8581_v2 = vld [vmem:[%s8710_s16 + $0x208] sm:$0xff]  }
 0x108   : > { %7931 = vmatmul.mubr.bf16.gmra.mrb[48].mxu1 %v8511_v3  ;;  %7790 = vmatprep.mubr.bf16.mxu0 %v8513_v6  ;;  %v8582_v3 = vld [vmem:[%s8710_s16 + $0x288] sm:$0xff]   ;;  %v8585_v6 = vld [vmem:[%s8710_s16 + $0x218] sm:$0xff]  }
 0x109   : > { %7934 = vmatprep.mubr.bf16.mxu1 %v8514_v7  ;;  %v8586_v7 = vld [vmem:[%s8710_s16 + $0x298] sm:$0xff]  }
 0x10f   : > { %7791 = vmatmul.mubr.bf16.gmra.mrb[52].mxu0 %v8515_v8  ;;  %v8587_v8 = vld [vmem:[%s8710_s16 + $0x220] sm:$0xff]  }
 0x110   : > { %7935 = vmatmul.mubr.bf16.gmra.mrb[52].mxu1 %v8517_v9  ;;  %7794 = vmatprep.mubr.bf16.mxu0 %v8519_v10  ;;  %v8588_v9 = vld [vmem:[%s8710_s16 + $0x2a0] sm:$0xff]   ;;  %v8589_v10 = vld [vmem:[%s8710_s16 + $0x228] sm:$0xff]  }
 0x111   : > { %7938 = vmatprep.mubr.bf16.mxu1 %v8520_v11  ;;  %v8590_v11 = vld [vmem:[%s8710_s16 + $0x2a8] sm:$0xff]  }
 0x117   : > { %7795 = vmatmul.mubr.bf16.gmra.mrb[56].mxu0 %v8521_v12  ;;  %v8591_v12 = vld [vmem:[%s8710_s16 + $0x230] sm:$0xff]  }
 0x118   : > { %7939 = vmatmul.mubr.bf16.gmra.mrb[56].mxu1 %v8523_v13  ;;  %7798 = vmatprep.mubr.bf16.mxu0 %v8525_v14  ;;  %v8592_v13 = vld [vmem:[%s8710_s16 + $0x2b0] sm:$0xff]   ;;  %v9147_v14 = vld [vmem:[%s9371_s2] ss:$0 sm:$0xff] }
 0x119   : > { %7942 = vmatprep.mubr.bf16.mxu1 %v8526_v15 }
 0x11f   : > { %7799 = vmatmul.mubr.bf16.gmra.mrb[60].mxu0 %v8527_v16 }
 0x120   : > { %7943 = vmatmul.mubr.bf16.gmra.mrb[60].mxu1 %v8529_v17  ;;  %7818 = vmatprep.mubr.bf16.mxu0 %v8531_v18 }
 0x121   : > { %7962 = vmatprep.mubr.bf16.mxu1 %v8532_v19  ;;  %v8593_v19 = vld [vmem:[%s8710_s16 + $0x238] sm:$0xff]  }
 0x127   : > { %7819 = vmatmul.mubr.bf16.vlgmr.msra.gmra.mrb[32].mxu0 %v8533_v20 }
 0x128   : > { %7963 = vmatmul.mubr.bf16.vlgmr.msra.gmra.mrb[32].mxu1 %v8535_v21  ;;  %7851 = vmatpush3.bf16.msra.mxu0 %v8534_v4  ;;  %v8583_v4 = vld [vmem:[%s8710_s16 + $0x210] sm:$0xff]  }
 0x129   : > { %7995 = vmatpush3.bf16.msra.mxu1 %v8536_v5  ;;  %7822 = vmatprep.mubr.bf16.mxu0 %v8537_v22  ;;  %v8584_v5 = vld [vmem:[%s8710_s16 + $0x290] sm:$0xff]  }
 0x12a   : > { %7966 = vmatprep.mubr.bf16.mxu1 %v8538_v23  ;;  %7852 = vmatprep.subr.bf16.mxu0 %v8540_v24 }
 0x12b   : > { %7996 = vmatprep.subr.bf16.mxu1 %v8542_v25 }
 0x12c   : > { %7853 = vmatpush3.bf16.msra.mxu0 %v8540_v24  ;;  %v8594_v24 = vld [vmem:[%s8710_s16 + $0x2b8] sm:$0xff]  }
 0x12d   : > { %7997 = vmatpush3.bf16.msra.mxu1 %v8542_v25  ;;  %7854 = vmatprep.subr.bf16.mxu0 %v8546_v26  ;;  %v8595_v25 = vld [vmem:[%s8710_s16 + $0x240] sm:$0xff]  }
 0x12e   : > { %7998 = vmatprep.subr.bf16.mxu1 %v8548_v27 }
 0x12f   : > { %7823 = vmatmul.mubr.bf16.gmra.mrb[36].mxu0 %v8539_v28 }
 0x130   : > { %7967 = vmatmul.mubr.bf16.gmra.mrb[36].mxu1 %v8541_v29  ;;  %7826 = vmatprep.mubr.bf16.mxu0 %v8543_v30  ;;  %v8596_v30 = vld [vmem:[%s8710_s16 + $0x2c0] sm:$0xff]  }
 0x131   : > { %7970 = vmatprep.mubr.bf16.mxu1 %v8544_v31  ;;  %7855 = vmatpush3.bf16.msra.mxu0 %v8546_v26 }
 0x132   : > { %7999 = vmatpush3.bf16.msra.mxu1 %v8548_v27  ;;  %7856 = vmatprep.subr.bf16.mxu0 %v8552_v32 }
 0x133   : > { %8000 = vmatprep.subr.bf16.mxu1 %v8554_v33 }
 0x135   : > { %7857 = vmatpush3.bf16.msra.mxu0 %v8552_v32 }
 0x136   : > { %8001 = vmatpush3.bf16.msra.mxu1 %v8554_v33  ;;  %7858 = vmatprep.subr.bf16.mxu0 %v8558_v34 }
 0x137   : > { %7827 = vmatmul.mubr.bf16.gmra.mrb[40].mxu0 %v8545_v35  ;;  %8002 = vmatprep.subr.bf16.mxu1 %v8560_v36 }
 0x138   : > { %7971 = vmatmul.mubr.bf16.gmra.mrb[40].mxu1 %v8547_v37  ;;  %7830 = vmatprep.mubr.bf16.mxu0 %v8549_v38 }
 0x139   : > { %7974 = vmatprep.mubr.bf16.mxu1 %v8550_v39  ;;  %7859 = vmatpush3.bf16.msra.mxu0 %v8558_v34 }
 0x13a   : > { %8003 = vmatpush3.bf16.msra.mxu1 %v8560_v36  ;;  %7860 = vmatprep.subr.bf16.mxu0 %v8564_v40 }
 0x13b   : > { %8004 = vmatprep.subr.bf16.mxu1 %v8566_v41 }
 0x13d   : > { %7861 = vmatpush3.bf16.msra.mxu0 %v8564_v40 }
 0x13e   : > { %8005 = vmatpush3.bf16.msra.mxu1 %v8566_v41  ;;  %7862 = vmatprep.subr.bf16.mxu0 %v8570_v42 }
 0x13f   : > { %7831 = vmatmul.mubr.bf16.gmra.mrb[44].mxu0 %v8551_v43  ;;  %8006 = vmatprep.subr.bf16.mxu1 %v8572_v44 }
 0x140   : > { %7975 = vmatmul.mubr.bf16.gmra.mrb[44].mxu1 %v8553_v45  ;;  %7834 = vmatprep.mubr.bf16.mxu0 %v8555_v46 }
 0x141   : > { %7978 = vmatprep.mubr.bf16.mxu1 %v8556_v47  ;;  %7863 = vmatpush3.bf16.msra.mxu0 %v8570_v42 }
 0x142   : > { %8007 = vmatpush3.bf16.msra.mxu1 %v8572_v44  ;;  %7864 = vmatprep.subr.bf16.mxu0 %v8576_v48 }
 0x143   : > { %8008 = vmatprep.subr.bf16.mxu1 %v8578_v49 }
 0x145   : > { %7865 = vmatpush3.bf16.msra.mxu0 %v8576_v48 }
 0x146   : > { %8009 = vmatpush3.bf16.msra.mxu1 %v8578_v49 }
 0x147   : > { %7835 = vmatmul.mubr.bf16.gmra.mrb[48].mxu0 %v8557_v50 }
 0x148   : > { %7979 = vmatmul.mubr.bf16.gmra.mrb[48].mxu1 %v8559_v51  ;;  %7838 = vmatprep.mubr.bf16.mxu0 %v8561_v52  ;;  %v8597_v51 = vld [vmem:[%s8710_s16 + $0x248] sm:$0xff]  }
 0x149   : > { %7982 = vmatprep.mubr.bf16.mxu1 %v8562_v53 }
 0x14f   : > { %7839 = vmatmul.mubr.bf16.gmra.mrb[52].mxu0 %v8563_v54 }
 0x150   : > { %7983 = vmatmul.mubr.bf16.gmra.mrb[52].mxu1 %v8565_v55  ;;  %7842 = vmatprep.mubr.bf16.mxu0 %v8567_v56  ;;  %v8598_v56 = vld [vmem:[%s8710_s16 + $0x2c8] sm:$0xff]  }
 0x151   : > { %7986 = vmatprep.mubr.bf16.mxu1 %v8568_v57  ;;  %v8599_v57 = vld [vmem:[%s8710_s16 + $0x250] sm:$0xff]  }
 0x157   : > { %7843 = vmatmul.mubr.bf16.gmra.mrb[56].mxu0 %v8569_v58 }
 0x158   : > { %7987 = vmatmul.mubr.bf16.gmra.mrb[56].mxu1 %v8571_v59  ;;  %7846 = vmatprep.mubr.bf16.mxu0 %v8573_v60 }
 0x159   : > { %7990 = vmatprep.mubr.bf16.mxu1 %v8574_v61 }
 0x15f   : > { %7847 = vmatmul.mubr.bf16.gmra.mrb[60].mxu0 %v8575_v62  ;;  %v8600_v62 = vld [vmem:[%s8710_s16 + $0x2d0] sm:$0xff]  }
 0x160   : > { %7991 = vmatmul.mubr.bf16.gmra.mrb[60].mxu1 %v8577_v63  ;;  %7866 = vmatprep.mubr.bf16.mxu0 %v8579_v0 }
 0x161   : > { %8010 = vmatprep.mubr.bf16.mxu1 %v8580_v1 }
 0x167   : > { %7867 = vmatmul.mubr.bf16.vlgmr.msra.gmra.mrb[32].mxu0 %v8581_v2 }
 0x168   : > { %8011 = vmatmul.mubr.bf16.vlgmr.msra.gmra.mrb[32].mxu1 %v8582_v3  ;;  %7870 = vmatprep.mubr.bf16.mxu0 %v8583_v4 }
 0x169   : > { %8014 = vmatprep.mubr.bf16.mxu1 %v8584_v5 }
 0x16f   : > { %7871 = vmatmul.mubr.bf16.gmra.mrb[36].mxu0 %v8585_v6 }
 0x170   : > { %8015 = vmatmul.mubr.bf16.gmra.mrb[36].mxu1 %v8586_v7  ;;  %7874 = vmatprep.mubr.bf16.mxu0 %v8587_v8 }
 0x171   : > { %8018 = vmatprep.mubr.bf16.mxu1 %v8588_v9 }
 0x177   : > { %7875 = vmatmul.mubr.bf16.gmra.mrb[40].mxu0 %v8589_v10 }
 0x178   : > { %8019 = vmatmul.mubr.bf16.gmra.mrb[40].mxu1 %v8590_v11  ;;  %7878 = vmatprep.mubr.bf16.mxu0 %v8591_v12 }
 0x179   : > { %8022 = vmatprep.mubr.bf16.mxu1 %v8592_v13 }
 0x17a   : > { %v7580_v15 = vpop.f32.mrb[0].mxu0 }
 0x17b   : > { %v1361_v16 = vadd.f32 %v7580_v15, %v9147_v14  ;;  %v7724_v17 = vpop.f32.mrb[0].mxu1  ;;  %v1194_v18 = vpop.f32.mrb[1].mxu0 }
 0x17c   : > { %v2677_v20 = vadd.f32 %v7724_v17, %v9147_v14  ;;  %v1359_v21 = vadd.f32 %v9147_v14, %v1194_v18  ;;  %v2516_v22 = vpop.f32.mrb[1].mxu1  ;;  %v7581_v23 = vpop.f32.mrb[2].mxu0 }
 0x17d   : > { %v2675_v26 = vadd.f32 %v9147_v14, %v2516_v22  ;;  %v1362_v27 = vadd.f32 %v7581_v23, %v9147_v14  ;;  %v7725_v28 = vpop.f32.mrb[2].mxu1  ;;  %v1197_v29 = vpop.f32.mrb[3].mxu0  ;;  %v1393_v34 = vmax.f32 %v1361_v16, 0.0 }
 0x17e   : > { %v2678_v31 = vadd.f32 %v7725_v28, %v9147_v14  ;;  %v1360_v32 = vadd.f32 %v9147_v14, %v1197_v29  ;;  %v2519_v33 = vpop.f32.mrb[3].mxu1  ;;  %v2709_v37 = vmax.f32 %v2677_v20, 0.0  ;;  %v1391_v38 = vmax.f32 %v1359_v21, 0.0  ;;  %v8601_v20 = vld [vmem:[%s8710_s16 + $0x258] sm:$0xff]  }
 0x17f   : > { %v1394_v35 = vmax.f32 %v1362_v27, 0.0  ;;  %v2676_v36 = vadd.f32 %v9147_v14, %v2519_v33  ;;  %7879 = vmatmul.mubr.bf16.gmra.mrb[44].mxu0 %v8593_v19  ;;  %v2707_v41 = vmax.f32 %v2675_v26, 0.0  ;;  %v8603_v26 = vld [vmem:[%s8710_s16 + $0x260] sm:$0xff]  }
 0x180   : > { %v2710_v39 = vmax.f32 %v2678_v31, 0.0  ;;  %v1392_v40 = vmax.f32 %v1360_v32, 0.0  ;;  %8023 = vmatmul.mubr.bf16.gmra.mrb[44].mxu1 %v8594_v24  ;;  %7882 = vmatprep.mubr.bf16.mxu0 %v8595_v25  ;;  %v8602_v25 = vld [vmem:[%s8710_s16 + $0x2d8] sm:$0xff]   ;;  %v8604_v31 = vld [vmem:[%s8710_s16 + $0x2e0] sm:$0xff]  }
 0x181   : > { %v6803_v42 = vpack.c.bf16 %v1394_v35, %v1393_v34  ;;  %v2708_v43 = vmax.f32 %v2676_v36, 0.0  ;;  %8026 = vmatprep.mubr.bf16.mxu1 %v8596_v30 }
 0x182   : > { %v6883_v44 = vpack.c.bf16 %v2710_v39, %v2709_v37  ;;  %v6798_v45 = vpack.c.bf16 %v1392_v40, %v1391_v38  ;;  %v7584_v46 = vpop.f32.mrb[4].mxu0 }
 0x183   : > { %7115 = vst [vmem:[%s9165_s12 + $0x8] sm:$0xff] %v6803_v42   ;;  %v6878_v47 = vpack.c.bf16 %v2708_v43, %v2707_v41  ;;  %v1365_v48 = vadd.f32 %v7584_v46, %v9147_v14  ;;  %v7728_v49 = vpop.f32.mrb[4].mxu1  ;;  %v1210_v50 = vpop.f32.mrb[5].mxu0 }
 0x184   : > { %7131 = vst [vmem:[%s9165_s12 + $0x88] sm:$0xff] %v6883_v44   ;;  %6799 = vst [vmem:[%s9165_s12] sm:$0xff] %v6798_v45   ;;  %v2681_v52 = vadd.f32 %v7728_v49, %v9147_v14  ;;  %v1363_v53 = vadd.f32 %v9147_v14, %v1210_v50  ;;  %v2532_v54 = vpop.f32.mrb[5].mxu1  ;;  %v7585_v55 = vpop.f32.mrb[6].mxu0 }
 0x185   : > { %7130 = vst [vmem:[%s9165_s12 + $0x80] sm:$0xff] %v6878_v47   ;;  %v2679_v58 = vadd.f32 %v9147_v14, %v2532_v54  ;;  %v1366_v59 = vadd.f32 %v7585_v55, %v9147_v14  ;;  %v7729_v60 = vpop.f32.mrb[6].mxu1  ;;  %v1213_v61 = vpop.f32.mrb[7].mxu0  ;;  %v1397_v2 = vmax.f32 %v1365_v48, 0.0 }
 0x186   : > { %v2682_v63 = vadd.f32 %v7729_v60, %v9147_v14  ;;  %v1364_v0 = vadd.f32 %v9147_v14, %v1213_v61  ;;  %v2535_v1 = vpop.f32.mrb[7].mxu1  ;;  %v2713_v5 = vmax.f32 %v2681_v52, 0.0  ;;  %v1395_v6 = vmax.f32 %v1363_v53, 0.0  ;;  %v8605_v52 = vld [vmem:[%s8710_s16 + $0x268] sm:$0xff]  }
 0x187   : > { %v1398_v3 = vmax.f32 %v1366_v59, 0.0  ;;  %v2680_v4 = vadd.f32 %v9147_v14, %v2535_v1  ;;  %7883 = vmatmul.mubr.bf16.gmra.mrb[48].mxu0 %v8597_v51  ;;  %v2711_v9 = vmax.f32 %v2679_v58, 0.0  ;;  %v8607_v58 = vld [vmem:[%s8710_s16 + $0x270] sm:$0xff]  }
 0x188   : > { %v2714_v7 = vmax.f32 %v2682_v63, 0.0  ;;  %v1396_v8 = vmax.f32 %v1364_v0, 0.0  ;;  %8027 = vmatmul.mubr.bf16.gmra.mrb[48].mxu1 %v8598_v56  ;;  %7886 = vmatprep.mubr.bf16.mxu0 %v8599_v57  ;;  %v8606_v57 = vld [vmem:[%s8710_s16 + $0x2e8] sm:$0xff]   ;;  %v8608_v63 = vld [vmem:[%s8710_s16 + $0x2f0] sm:$0xff]  }
 0x189   : > { %v6813_v10 = vpack.c.bf16 %v1398_v3, %v1397_v2  ;;  %v2712_v11 = vmax.f32 %v2680_v4, 0.0  ;;  %8030 = vmatprep.mubr.bf16.mxu1 %v8600_v62 }
 0x18a   : > { %v6893_v12 = vpack.c.bf16 %v2714_v7, %v2713_v5  ;;  %v6808_v13 = vpack.c.bf16 %v1396_v8, %v1395_v6  ;;  %v7588_v15 = vpop.f32.mrb[8].mxu0 }
 0x18b   : > { %7117 = vst [vmem:[%s9165_s12 + $0x18] sm:$0xff] %v6813_v10   ;;  %v6888_v16 = vpack.c.bf16 %v2712_v11, %v2711_v9  ;;  %v1369_v17 = vadd.f32 %v7588_v15, %v9147_v14  ;;  %v7732_v18 = vpop.f32.mrb[8].mxu1  ;;  %v1226_v19 = vpop.f32.mrb[9].mxu0 }
 0x18c   : > { %7133 = vst [vmem:[%s9165_s12 + $0x98] sm:$0xff] %v6893_v12   ;;  %7116 = vst [vmem:[%s9165_s12 + $0x10] sm:$0xff] %v6808_v13   ;;  %v2685_v21 = vadd.f32 %v7732_v18, %v9147_v14  ;;  %v1367_v22 = vadd.f32 %v9147_v14, %v1226_v19  ;;  %v2548_v23 = vpop.f32.mrb[9].mxu1  ;;  %v7589_v24 = vpop.f32.mrb[10].mxu0 }
 0x18d   : > { %7132 = vst [vmem:[%s9165_s12 + $0x90] sm:$0xff] %v6888_v16   ;;  %v2683_v27 = vadd.f32 %v9147_v14, %v2548_v23  ;;  %v1370_v28 = vadd.f32 %v7589_v24, %v9147_v14  ;;  %v7733_v29 = vpop.f32.mrb[10].mxu1  ;;  %v1229_v30 = vpop.f32.mrb[11].mxu0  ;;  %v1401_v35 = vmax.f32 %v1369_v17, 0.0 }
 0x18e   : > { %v2686_v32 = vadd.f32 %v7733_v29, %v9147_v14  ;;  %v1368_v33 = vadd.f32 %v9147_v14, %v1229_v30  ;;  %v2551_v34 = vpop.f32.mrb[11].mxu1  ;;  %v2717_v38 = vmax.f32 %v2685_v21, 0.0  ;;  %v1399_v39 = vmax.f32 %v1367_v22, 0.0  ;;  %v8609_v21 = vld [vmem:[%s8710_s16 + $0x278] sm:$0xff]  }
 0x18f   : > { %v1402_v36 = vmax.f32 %v1370_v28, 0.0  ;;  %v2684_v37 = vadd.f32 %v9147_v14, %v2551_v34  ;;  %7887 = vmatmul.mubr.bf16.gmra.mrb[52].mxu0 %v8601_v20  ;;  %v2715_v42 = vmax.f32 %v2683_v27, 0.0 }
 0x190   : > { %v2718_v40 = vmax.f32 %v2686_v32, 0.0  ;;  %v1400_v41 = vmax.f32 %v1368_v33, 0.0  ;;  %8031 = vmatmul.mubr.bf16.gmra.mrb[52].mxu1 %v8602_v25  ;;  %7890 = vmatprep.mubr.bf16.mxu0 %v8603_v26  ;;  %v8610_v26 = vld [vmem:[%s8710_s16 + $0x2f8] sm:$0xff]  }
 0x191   : > { %v6823_v43 = vpack.c.bf16 %v1402_v36, %v1401_v35  ;;  %v2716_v44 = vmax.f32 %v2684_v37, 0.0  ;;  %8034 = vmatprep.mubr.bf16.mxu1 %v8604_v31 }
 0x192   : > { %v6903_v45 = vpack.c.bf16 %v2718_v40, %v2717_v38  ;;  %v6818_v46 = vpack.c.bf16 %v1400_v41, %v1399_v39  ;;  %v7592_v47 = vpop.f32.mrb[12].mxu0 }
 0x193   : > { %7119 = vst [vmem:[%s9165_s12 + $0x28] sm:$0xff] %v6823_v43   ;;  %v6898_v48 = vpack.c.bf16 %v2716_v44, %v2715_v42  ;;  %v1373_v49 = vadd.f32 %v7592_v47, %v9147_v14  ;;  %v7736_v50 = vpop.f32.mrb[12].mxu1  ;;  %v1242_v51 = vpop.f32.mrb[13].mxu0 }
 0x194   : > { %7135 = vst [vmem:[%s9165_s12 + $0xa8] sm:$0xff] %v6903_v45   ;;  %7118 = vst [vmem:[%s9165_s12 + $0x20] sm:$0xff] %v6818_v46   ;;  %v2689_v53 = vadd.f32 %v7736_v50, %v9147_v14  ;;  %v1371_v54 = vadd.f32 %v9147_v14, %v1242_v51  ;;  %v2564_v55 = vpop.f32.mrb[13].mxu1  ;;  %v7593_v56 = vpop.f32.mrb[14].mxu0 }
 0x195   : > { %7134 = vst [vmem:[%s9165_s12 + $0xa0] sm:$0xff] %v6898_v48   ;;  %v2687_v59 = vadd.f32 %v9147_v14, %v2564_v55  ;;  %v1374_v60 = vadd.f32 %v7593_v56, %v9147_v14  ;;  %v7737_v61 = vpop.f32.mrb[14].mxu1  ;;  %v1245_v62 = vpop.f32.mrb[15].mxu0  ;;  %v1405_v3 = vmax.f32 %v1373_v49, 0.0 }
 0x196   : > { %v2690_v0 = vadd.f32 %v7737_v61, %v9147_v14  ;;  %v1372_v1 = vadd.f32 %v9147_v14, %v1245_v62  ;;  %v2567_v2 = vpop.f32.mrb[15].mxu1  ;;  %v2721_v6 = vmax.f32 %v2689_v53, 0.0  ;;  %v1403_v7 = vmax.f32 %v1371_v54, 0.0 }
 0x197   : > { %v1406_v4 = vmax.f32 %v1374_v60, 0.0  ;;  %v2688_v5 = vadd.f32 %v9147_v14, %v2567_v2  ;;  %7891 = vmatmul.mubr.bf16.gmra.mrb[56].mxu0 %v8605_v52  ;;  %v2719_v10 = vmax.f32 %v2687_v59, 0.0 }
 0x198   : > { %v2722_v8 = vmax.f32 %v2690_v0, 0.0  ;;  %v1404_v9 = vmax.f32 %v1372_v1, 0.0  ;;  %8035 = vmatmul.mubr.bf16.gmra.mrb[56].mxu1 %v8606_v57  ;;  %7894 = vmatprep.mubr.bf16.mxu0 %v8607_v58 }
 0x199   : > { %v6833_v11 = vpack.c.bf16 %v1406_v4, %v1405_v3  ;;  %v2720_v12 = vmax.f32 %v2688_v5, 0.0  ;;  %8038 = vmatprep.mubr.bf16.mxu1 %v8608_v63 }
 0x19a   : > { %v6913_v13 = vpack.c.bf16 %v2722_v8, %v2721_v6  ;;  %v6828_v15 = vpack.c.bf16 %v1404_v9, %v1403_v7  ;;  %v7596_v16 = vpop.f32.mrb[16].mxu0 }
 0x19b   : > { %7121 = vst [vmem:[%s9165_s12 + $0x38] sm:$0xff] %v6833_v11   ;;  %v6908_v17 = vpack.c.bf16 %v2720_v12, %v2719_v10  ;;  %v1377_v18 = vadd.f32 %v7596_v16, %v9147_v14  ;;  %v7740_v19 = vpop.f32.mrb[16].mxu1  ;;  %v1258_v20 = vpop.f32.mrb[17].mxu0 }
 0x19c   : > { %7137 = vst [vmem:[%s9165_s12 + $0xb8] sm:$0xff] %v6913_v13   ;;  %7120 = vst [vmem:[%s9165_s12 + $0x30] sm:$0xff] %v6828_v15   ;;  %v2693_v22 = vadd.f32 %v7740_v19, %v9147_v14  ;;  %v1375_v23 = vadd.f32 %v9147_v14, %v1258_v20  ;;  %v2580_v24 = vpop.f32.mrb[17].mxu1  ;;  %v7597_v25 = vpop.f32.mrb[18].mxu0 }
 0x19d   : > { %7136 = vst [vmem:[%s9165_s12 + $0xb0] sm:$0xff] %v6908_v17   ;;  %v2691_v27 = vadd.f32 %v9147_v14, %v2580_v24  ;;  %v1378_v28 = vadd.f32 %v7597_v25, %v9147_v14  ;;  %v7741_v29 = vpop.f32.mrb[18].mxu1  ;;  %v1261_v30 = vpop.f32.mrb[19].mxu0  ;;  %v1409_v34 = vmax.f32 %v1377_v18, 0.0 }
 0x19e   : > { %v2694_v31 = vadd.f32 %v7741_v29, %v9147_v14  ;;  %v1376_v32 = vadd.f32 %v9147_v14, %v1261_v30  ;;  %v2583_v33 = vpop.f32.mrb[19].mxu1  ;;  %v2725_v37 = vmax.f32 %v2693_v22, 0.0  ;;  %v1407_v38 = vmax.f32 %v1375_v23, 0.0 }
 0x19f   : > { %v1410_v35 = vmax.f32 %v1378_v28, 0.0  ;;  %v2692_v36 = vadd.f32 %v9147_v14, %v2583_v33  ;;  %7895 = vmatmul.mubr.bf16.gmra.mrb[60].mxu0 %v8609_v21  ;;  %v2723_v41 = vmax.f32 %v2691_v27, 0.0 }
 0x1a0   : > { %v2726_v39 = vmax.f32 %v2694_v31, 0.0  ;;  %v1408_v40 = vmax.f32 %v1376_v32, 0.0  ;;  %8039 = vmatmul.mubr.bf16.gmra.mrb[60].mxu1 %v8610_v26 }
 0x1a1   : > { %v6843_v42 = vpack.c.bf16 %v1410_v35, %v1409_v34  ;;  %v2724_v43 = vmax.f32 %v2692_v36, 0.0 }
 0x1a2   : > { %v6923_v44 = vpack.c.bf16 %v2726_v39, %v2725_v37  ;;  %v6838_v45 = vpack.c.bf16 %v1408_v40, %v1407_v38  ;;  %v7600_v46 = vpop.f32.mrb[20].mxu0 }
 0x1a3   : > { %7123 = vst [vmem:[%s9165_s12 + $0x48] sm:$0xff] %v6843_v42   ;;  %v6918_v47 = vpack.c.bf16 %v2724_v43, %v2723_v41  ;;  %v1381_v48 = vadd.f32 %v7600_v46, %v9147_v14  ;;  %v7744_v49 = vpop.f32.mrb[20].mxu1  ;;  %v1274_v50 = vpop.f32.mrb[21].mxu0 }
 0x1a4   : > { %7139 = vst [vmem:[%s9165_s12 + $0xc8] sm:$0xff] %v6923_v44   ;;  %7122 = vst [vmem:[%s9165_s12 + $0x40] sm:$0xff] %v6838_v45   ;;  %v2697_v51 = vadd.f32 %v7744_v49, %v9147_v14  ;;  %v1379_v52 = vadd.f32 %v9147_v14, %v1274_v50  ;;  %v2596_v53 = vpop.f32.mrb[21].mxu1  ;;  %v7601_v54 = vpop.f32.mrb[22].mxu0 }
 0x1a5   : > { %7138 = vst [vmem:[%s9165_s12 + $0xc0] sm:$0xff] %v6918_v47   ;;  %v2695_v55 = vadd.f32 %v9147_v14, %v2596_v53  ;;  %v1382_v56 = vadd.f32 %v7601_v54, %v9147_v14  ;;  %v7745_v57 = vpop.f32.mrb[22].mxu1  ;;  %v1277_v58 = vpop.f32.mrb[23].mxu0  ;;  %v1413_v62 = vmax.f32 %v1381_v48, 0.0 }
 0x1a6   : > { %v2698_v59 = vadd.f32 %v7745_v57, %v9147_v14  ;;  %v1380_v60 = vadd.f32 %v9147_v14, %v1277_v58  ;;  %v2599_v61 = vpop.f32.mrb[23].mxu1  ;;  %v2729_v1 = vmax.f32 %v2697_v51, 0.0  ;;  %v1411_v2 = vmax.f32 %v1379_v52, 0.0 }
 0x1a7   : > { %v1414_v63 = vmax.f32 %v1382_v56, 0.0  ;;  %v2696_v0 = vadd.f32 %v9147_v14, %v2599_v61  ;;  %v2727_v5 = vmax.f32 %v2695_v55, 0.0 }
 0x1a8   : > { %v2730_v3 = vmax.f32 %v2698_v59, 0.0  ;;  %v1412_v4 = vmax.f32 %v1380_v60, 0.0 }
 0x1a9   : > { %v6853_v6 = vpack.c.bf16 %v1414_v63, %v1413_v62  ;;  %v2728_v7 = vmax.f32 %v2696_v0, 0.0 }
 0x1aa   : > { %v6933_v8 = vpack.c.bf16 %v2730_v3, %v2729_v1  ;;  %v6848_v9 = vpack.c.bf16 %v1412_v4, %v1411_v2  ;;  %v7604_v10 = vpop.f32.mrb[24].mxu0 }
 0x1ab   : > { %7125 = vst [vmem:[%s9165_s12 + $0x58] sm:$0xff] %v6853_v6   ;;  %v6928_v11 = vpack.c.bf16 %v2728_v7, %v2727_v5  ;;  %v1385_v12 = vadd.f32 %v7604_v10, %v9147_v14  ;;  %v7748_v13 = vpop.f32.mrb[24].mxu1  ;;  %v1290_v15 = vpop.f32.mrb[25].mxu0 }
 0x1ac   : > { %7141 = vst [vmem:[%s9165_s12 + $0xd8] sm:$0xff] %v6933_v8   ;;  %7124 = vst [vmem:[%s9165_s12 + $0x50] sm:$0xff] %v6848_v9   ;;  %v2701_v16 = vadd.f32 %v7748_v13, %v9147_v14  ;;  %v1383_v17 = vadd.f32 %v9147_v14, %v1290_v15  ;;  %v2612_v18 = vpop.f32.mrb[25].mxu1  ;;  %v7605_v19 = vpop.f32.mrb[26].mxu0 }
 0x1ad   : > { %7140 = vst [vmem:[%s9165_s12 + $0xd0] sm:$0xff] %v6928_v11   ;;  %v2699_v20 = vadd.f32 %v9147_v14, %v2612_v18  ;;  %v1386_v21 = vadd.f32 %v7605_v19, %v9147_v14  ;;  %v7749_v22 = vpop.f32.mrb[26].mxu1  ;;  %v1293_v23 = vpop.f32.mrb[27].mxu0  ;;  %v1417_v27 = vmax.f32 %v1385_v12, 0.0 }
 0x1ae   : > { %v2702_v24 = vadd.f32 %v7749_v22, %v9147_v14  ;;  %v1384_v25 = vadd.f32 %v9147_v14, %v1293_v23  ;;  %v2615_v26 = vpop.f32.mrb[27].mxu1  ;;  %v2733_v30 = vmax.f32 %v2701_v16, 0.0  ;;  %v1415_v31 = vmax.f32 %v1383_v17, 0.0 }
 0x1af   : > { %v1418_v28 = vmax.f32 %v1386_v21, 0.0  ;;  %v2700_v29 = vadd.f32 %v9147_v14, %v2615_v26  ;;  %v2731_v34 = vmax.f32 %v2699_v20, 0.0 }
 0x1b0   : > { %v2734_v32 = vmax.f32 %v2702_v24, 0.0  ;;  %v1416_v33 = vmax.f32 %v1384_v25, 0.0 }
 0x1b1   : > { %v6863_v35 = vpack.c.bf16 %v1418_v28, %v1417_v27  ;;  %v2732_v36 = vmax.f32 %v2700_v29, 0.0 }
 0x1b2   : > { %v6943_v37 = vpack.c.bf16 %v2734_v32, %v2733_v30  ;;  %v6858_v38 = vpack.c.bf16 %v1416_v33, %v1415_v31  ;;  %v7608_v39 = vpop.f32.mrb[28].mxu0 }
 0x1b3   : > { %7127 = vst [vmem:[%s9165_s12 + $0x68] sm:$0xff] %v6863_v35   ;;  %v6938_v40 = vpack.c.bf16 %v2732_v36, %v2731_v34  ;;  %v1389_v41 = vadd.f32 %v7608_v39, %v9147_v14  ;;  %v7752_v42 = vpop.f32.mrb[28].mxu1  ;;  %v1306_v43 = vpop.f32.mrb[29].mxu0 }
 0x1b4   : > { %7143 = vst [vmem:[%s9165_s12 + $0xe8] sm:$0xff] %v6943_v37   ;;  %7126 = vst [vmem:[%s9165_s12 + $0x60] sm:$0xff] %v6858_v38   ;;  %v2705_v44 = vadd.f32 %v7752_v42, %v9147_v14  ;;  %v1387_v45 = vadd.f32 %v9147_v14, %v1306_v43  ;;  %v2628_v46 = vpop.f32.mrb[29].mxu1  ;;  %v7609_v47 = vpop.f32.mrb[30].mxu0 }
 0x1b5   : > { %7142 = vst [vmem:[%s9165_s12 + $0xe0] sm:$0xff] %v6938_v40   ;;  %v2703_v48 = vadd.f32 %v9147_v14, %v2628_v46  ;;  %v1390_v49 = vadd.f32 %v7609_v47, %v9147_v14  ;;  %v7753_v50 = vpop.f32.mrb[30].mxu1  ;;  %v1309_v51 = vpop.f32.mrb[31].mxu0  ;;  %v1421_v55 = vmax.f32 %v1389_v41, 0.0 }
 0x1b6   : > { %v2706_v52 = vadd.f32 %v7753_v50, %v9147_v14  ;;  %v1388_v53 = vadd.f32 %v9147_v14, %v1309_v51  ;;  %v2631_v54 = vpop.f32.mrb[31].mxu1  ;;  %v2737_v58 = vmax.f32 %v2705_v44, 0.0  ;;  %v1419_v59 = vmax.f32 %v1387_v45, 0.0 }
 0x1b7   : > { %v1422_v56 = vmax.f32 %v1390_v49, 0.0  ;;  %v2704_v57 = vadd.f32 %v9147_v14, %v2631_v54  ;;  %v2735_v62 = vmax.f32 %v2703_v48, 0.0 }
 0x1b8   : > { %v2738_v60 = vmax.f32 %v2706_v52, 0.0  ;;  %v1420_v61 = vmax.f32 %v1388_v53, 0.0 }
 0x1b9   : > { %v6873_v63 = vpack.c.bf16 %v1422_v56, %v1421_v55  ;;  %v2736_v0 = vmax.f32 %v2704_v57, 0.0 }
 0x1ba   : > { %v6953_v1 = vpack.c.bf16 %v2738_v60, %v2737_v58  ;;  %v6868_v2 = vpack.c.bf16 %v1420_v61, %v1419_v59 }
 0x1bb   : > { %7129 = vst [vmem:[%s9165_s12 + $0x78] sm:$0xff] %v6873_v63   ;;  %v6948_v3 = vpack.c.bf16 %v2736_v0, %v2735_v62 }
 0x1bc   : > { %7145 = vst [vmem:[%s9165_s12 + $0xf8] sm:$0xff] %v6953_v1   ;;  %7128 = vst [vmem:[%s9165_s12 + $0x70] sm:$0xff] %v6868_v2  }
 0x1bd   : > { %7144 = vst [vmem:[%s9165_s12 + $0xf0] sm:$0xff] %v6948_v3  }
 0x23a   : > { %v7868_v4 = vpop.f32.mrb[32].mxu0 }
 0x23b   : > { %v3994_v5 = vadd.f32 %v7868_v4, %v9147_v14  ;;  %v8012_v6 = vpop.f32.mrb[32].mxu1  ;;  %v3833_v7 = vpop.f32.mrb[33].mxu0 }
 0x23c   : > { %v5311_v8 = vadd.f32 %v8012_v6, %v9147_v14  ;;  %v3992_v9 = vadd.f32 %v9147_v14, %v3833_v7  ;;  %v5150_v10 = vpop.f32.mrb[33].mxu1  ;;  %v7869_v11 = vpop.f32.mrb[34].mxu0 }
 0x23d   : > { %v5309_v12 = vadd.f32 %v9147_v14, %v5150_v10  ;;  %v3995_v13 = vadd.f32 %v7869_v11, %v9147_v14  ;;  %v8013_v15 = vpop.f32.mrb[34].mxu1  ;;  %v3836_v16 = vpop.f32.mrb[35].mxu0  ;;  %v4026_v20 = vmax.f32 %v3994_v5, 0.0 }
 0x23e   : > { %v5312_v17 = vadd.f32 %v8013_v15, %v9147_v14  ;;  %v3993_v18 = vadd.f32 %v9147_v14, %v3836_v16  ;;  %v5153_v19 = vpop.f32.mrb[35].mxu1  ;;  %v5343_v23 = vmax.f32 %v5311_v8, 0.0  ;;  %v4024_v24 = vmax.f32 %v3992_v9, 0.0 }
 0x23f   : > { %v4027_v21 = vmax.f32 %v3995_v13, 0.0  ;;  %v5310_v22 = vadd.f32 %v9147_v14, %v5153_v19  ;;  %v5341_v27 = vmax.f32 %v5309_v12, 0.0 }
 0x240   : > { %v5344_v25 = vmax.f32 %v5312_v17, 0.0  ;;  %v4025_v26 = vmax.f32 %v3993_v18, 0.0 }
 0x241   : > { %v6963_v28 = vpack.c.bf16 %v4027_v21, %v4026_v20  ;;  %v5342_v29 = vmax.f32 %v5310_v22, 0.0 }
 0x242   : > { %v7043_v30 = vpack.c.bf16 %v5344_v25, %v5343_v23  ;;  %v6958_v31 = vpack.c.bf16 %v4025_v26, %v4024_v24  ;;  %v7872_v32 = vpop.f32.mrb[36].mxu0 }
 0x243   : > { %7147 = vst [vmem:[%s9165_s12 + $0x108] sm:$0xff] %v6963_v28   ;;  %v7038_v33 = vpack.c.bf16 %v5342_v29, %v5341_v27  ;;  %v3998_v34 = vadd.f32 %v7872_v32, %v9147_v14  ;;  %v8016_v35 = vpop.f32.mrb[36].mxu1  ;;  %v3849_v36 = vpop.f32.mrb[37].mxu0 }
 0x244   : > { %7163 = vst [vmem:[%s9165_s12 + $0x188] sm:$0xff] %v7043_v30   ;;  %7146 = vst [vmem:[%s9165_s12 + $0x100] sm:$0xff] %v6958_v31   ;;  %v5315_v37 = vadd.f32 %v8016_v35, %v9147_v14  ;;  %v3996_v38 = vadd.f32 %v9147_v14, %v3849_v36  ;;  %v5166_v39 = vpop.f32.mrb[37].mxu1  ;;  %v7873_v40 = vpop.f32.mrb[38].mxu0 }
 0x245   : > { %7162 = vst [vmem:[%s9165_s12 + $0x180] sm:$0xff] %v7038_v33   ;;  %v5313_v41 = vadd.f32 %v9147_v14, %v5166_v39  ;;  %v3999_v42 = vadd.f32 %v7873_v40, %v9147_v14  ;;  %v8017_v43 = vpop.f32.mrb[38].mxu1  ;;  %v3852_v44 = vpop.f32.mrb[39].mxu0  ;;  %v4030_v48 = vmax.f32 %v3998_v34, 0.0 }
 0x246   : > { %v5316_v45 = vadd.f32 %v8017_v43, %v9147_v14  ;;  %v3997_v46 = vadd.f32 %v9147_v14, %v3852_v44  ;;  %v5169_v47 = vpop.f32.mrb[39].mxu1  ;;  %v5347_v51 = vmax.f32 %v5315_v37, 0.0  ;;  %v4028_v52 = vmax.f32 %v3996_v38, 0.0 }
 0x247   : > { %v4031_v49 = vmax.f32 %v3999_v42, 0.0  ;;  %v5314_v50 = vadd.f32 %v9147_v14, %v5169_v47  ;;  %v5345_v55 = vmax.f32 %v5313_v41, 0.0 }
 0x248   : > { %v5348_v53 = vmax.f32 %v5316_v45, 0.0  ;;  %v4029_v54 = vmax.f32 %v3997_v46, 0.0 }
 0x249   : > { %v6973_v56 = vpack.c.bf16 %v4031_v49, %v4030_v48  ;;  %v5346_v57 = vmax.f32 %v5314_v50, 0.0 }
 0x24a   : > { %v7053_v58 = vpack.c.bf16 %v5348_v53, %v5347_v51  ;;  %v6968_v59 = vpack.c.bf16 %v4029_v54, %v4028_v52  ;;  %v7876_v60 = vpop.f32.mrb[40].mxu0 }
 0x24b   : > { %7149 = vst [vmem:[%s9165_s12 + $0x118] sm:$0xff] %v6973_v56   ;;  %v7048_v61 = vpack.c.bf16 %v5346_v57, %v5345_v55  ;;  %v4002_v62 = vadd.f32 %v7876_v60, %v9147_v14  ;;  %v8020_v63 = vpop.f32.mrb[40].mxu1  ;;  %v3865_v0 = vpop.f32.mrb[41].mxu0 }
 0x24c   : > { %7165 = vst [vmem:[%s9165_s12 + $0x198] sm:$0xff] %v7053_v58   ;;  %7148 = vst [vmem:[%s9165_s12 + $0x110] sm:$0xff] %v6968_v59   ;;  %v5319_v1 = vadd.f32 %v8020_v63, %v9147_v14  ;;  %v4000_v2 = vadd.f32 %v9147_v14, %v3865_v0  ;;  %v5182_v3 = vpop.f32.mrb[41].mxu1  ;;  %v7877_v4 = vpop.f32.mrb[42].mxu0 }
 0x24d   : > { %7164 = vst [vmem:[%s9165_s12 + $0x190] sm:$0xff] %v7048_v61   ;;  %v5317_v5 = vadd.f32 %v9147_v14, %v5182_v3  ;;  %v4003_v6 = vadd.f32 %v7877_v4, %v9147_v14  ;;  %v8021_v7 = vpop.f32.mrb[42].mxu1  ;;  %v3868_v8 = vpop.f32.mrb[43].mxu0  ;;  %v4034_v12 = vmax.f32 %v4002_v62, 0.0 }
 0x24e   : > { %v5320_v9 = vadd.f32 %v8021_v7, %v9147_v14  ;;  %v4001_v10 = vadd.f32 %v9147_v14, %v3868_v8  ;;  %v5185_v11 = vpop.f32.mrb[43].mxu1  ;;  %v5351_v16 = vmax.f32 %v5319_v1, 0.0  ;;  %v4032_v17 = vmax.f32 %v4000_v2, 0.0 }
 0x24f   : > { %v4035_v13 = vmax.f32 %v4003_v6, 0.0  ;;  %v5318_v15 = vadd.f32 %v9147_v14, %v5185_v11  ;;  %v5349_v20 = vmax.f32 %v5317_v5, 0.0 }
 0x250   : > { %v5352_v18 = vmax.f32 %v5320_v9, 0.0  ;;  %v4033_v19 = vmax.f32 %v4001_v10, 0.0 }
 0x251   : > { %v6983_v21 = vpack.c.bf16 %v4035_v13, %v4034_v12  ;;  %v5350_v22 = vmax.f32 %v5318_v15, 0.0 }
 0x252   : > { %v7063_v23 = vpack.c.bf16 %v5352_v18, %v5351_v16  ;;  %v6978_v24 = vpack.c.bf16 %v4033_v19, %v4032_v17  ;;  %v7880_v25 = vpop.f32.mrb[44].mxu0 }
 0x253   : > { %7151 = vst [vmem:[%s9165_s12 + $0x128] sm:$0xff] %v6983_v21   ;;  %v7058_v26 = vpack.c.bf16 %v5350_v22, %v5349_v20  ;;  %v4006_v27 = vadd.f32 %v7880_v25, %v9147_v14  ;;  %v8024_v28 = vpop.f32.mrb[44].mxu1  ;;  %v3881_v29 = vpop.f32.mrb[45].mxu0 }
 0x254   : > { %7167 = vst [vmem:[%s9165_s12 + $0x1a8] sm:$0xff] %v7063_v23   ;;  %7150 = vst [vmem:[%s9165_s12 + $0x120] sm:$0xff] %v6978_v24   ;;  %v5323_v30 = vadd.f32 %v8024_v28, %v9147_v14  ;;  %v4004_v31 = vadd.f32 %v9147_v14, %v3881_v29  ;;  %v5198_v32 = vpop.f32.mrb[45].mxu1  ;;  %v7881_v33 = vpop.f32.mrb[46].mxu0 }
 0x255   : > { %7166 = vst [vmem:[%s9165_s12 + $0x1a0] sm:$0xff] %v7058_v26   ;;  %v5321_v34 = vadd.f32 %v9147_v14, %v5198_v32  ;;  %v4007_v35 = vadd.f32 %v7881_v33, %v9147_v14  ;;  %v8025_v36 = vpop.f32.mrb[46].mxu1  ;;  %v3884_v37 = vpop.f32.mrb[47].mxu0  ;;  %v4038_v41 = vmax.f32 %v4006_v27, 0.0 }
 0x256   : > { %v5324_v38 = vadd.f32 %v8025_v36, %v9147_v14  ;;  %v4005_v39 = vadd.f32 %v9147_v14, %v3884_v37  ;;  %v5201_v40 = vpop.f32.mrb[47].mxu1  ;;  %v5355_v44 = vmax.f32 %v5323_v30, 0.0  ;;  %v4036_v45 = vmax.f32 %v4004_v31, 0.0 }
 0x257   : > { %v4039_v42 = vmax.f32 %v4007_v35, 0.0  ;;  %v5322_v43 = vadd.f32 %v9147_v14, %v5201_v40  ;;  %v5353_v48 = vmax.f32 %v5321_v34, 0.0 }
 0x258   : > { %v5356_v46 = vmax.f32 %v5324_v38, 0.0  ;;  %v4037_v47 = vmax.f32 %v4005_v39, 0.0 }
 0x259   : > { %v6993_v49 = vpack.c.bf16 %v4039_v42, %v4038_v41  ;;  %v5354_v50 = vmax.f32 %v5322_v43, 0.0 }
 0x25a   : > { %v7073_v51 = vpack.c.bf16 %v5356_v46, %v5355_v44  ;;  %v6988_v52 = vpack.c.bf16 %v4037_v47, %v4036_v45  ;;  %v7884_v53 = vpop.f32.mrb[48].mxu0 }
 0x25b   : > { %7153 = vst [vmem:[%s9165_s12 + $0x138] sm:$0xff] %v6993_v49   ;;  %v7068_v54 = vpack.c.bf16 %v5354_v50, %v5353_v48  ;;  %v4010_v55 = vadd.f32 %v7884_v53, %v9147_v14  ;;  %v8028_v56 = vpop.f32.mrb[48].mxu1  ;;  %v3897_v57 = vpop.f32.mrb[49].mxu0 }
 0x25c   : > { %7169 = vst [vmem:[%s9165_s12 + $0x1b8] sm:$0xff] %v7073_v51   ;;  %7152 = vst [vmem:[%s9165_s12 + $0x130] sm:$0xff] %v6988_v52   ;;  %v5327_v58 = vadd.f32 %v8028_v56, %v9147_v14  ;;  %v4008_v59 = vadd.f32 %v9147_v14, %v3897_v57  ;;  %v5214_v60 = vpop.f32.mrb[49].mxu1  ;;  %v7885_v61 = vpop.f32.mrb[50].mxu0 }
 0x25d   : > { %7168 = vst [vmem:[%s9165_s12 + $0x1b0] sm:$0xff] %v7068_v54   ;;  %v5325_v62 = vadd.f32 %v9147_v14, %v5214_v60  ;;  %v4011_v63 = vadd.f32 %v7885_v61, %v9147_v14  ;;  %v8029_v0 = vpop.f32.mrb[50].mxu1  ;;  %v3900_v1 = vpop.f32.mrb[51].mxu0  ;;  %v4042_v5 = vmax.f32 %v4010_v55, 0.0 }
 0x25e   : > { %v5328_v2 = vadd.f32 %v8029_v0, %v9147_v14  ;;  %v4009_v3 = vadd.f32 %v9147_v14, %v3900_v1  ;;  %v5217_v4 = vpop.f32.mrb[51].mxu1  ;;  %v5359_v8 = vmax.f32 %v5327_v58, 0.0  ;;  %v4040_v9 = vmax.f32 %v4008_v59, 0.0 }
 0x25f   : > { %v4043_v6 = vmax.f32 %v4011_v63, 0.0  ;;  %v5326_v7 = vadd.f32 %v9147_v14, %v5217_v4  ;;  %v5357_v12 = vmax.f32 %v5325_v62, 0.0 }
 0x260   : > { %v5360_v10 = vmax.f32 %v5328_v2, 0.0  ;;  %v4041_v11 = vmax.f32 %v4009_v3, 0.0 }
 0x261   : > { %v7003_v13 = vpack.c.bf16 %v4043_v6, %v4042_v5  ;;  %v5358_v15 = vmax.f32 %v5326_v7, 0.0 }
 0x262   : > { %v7083_v16 = vpack.c.bf16 %v5360_v10, %v5359_v8  ;;  %v6998_v17 = vpack.c.bf16 %v4041_v11, %v4040_v9  ;;  %v7888_v18 = vpop.f32.mrb[52].mxu0 }
 0x263   : > { %7155 = vst [vmem:[%s9165_s12 + $0x148] sm:$0xff] %v7003_v13   ;;  %v7078_v19 = vpack.c.bf16 %v5358_v15, %v5357_v12  ;;  %v4014_v20 = vadd.f32 %v7888_v18, %v9147_v14  ;;  %v8032_v21 = vpop.f32.mrb[52].mxu1  ;;  %v3913_v22 = vpop.f32.mrb[53].mxu0  ;;  %v8611_v12 = vld [vmem:[%s9371_s2] ss:$0 sm:$0xff] }
 0x264   : > { %7171 = vst [vmem:[%s9165_s12 + $0x1c8] sm:$0xff] %v7083_v16   ;;  %7154 = vst [vmem:[%s9165_s12 + $0x140] sm:$0xff] %v6998_v17   ;;  %v5331_v23 = vadd.f32 %v8032_v21, %v9147_v14  ;;  %v4012_v24 = vadd.f32 %v9147_v14, %v3913_v22  ;;  %v5230_v25 = vpop.f32.mrb[53].mxu1  ;;  %v7889_v26 = vpop.f32.mrb[54].mxu0 }
 0x265   : > { %7170 = vst [vmem:[%s9165_s12 + $0x1c0] sm:$0xff] %v7078_v19   ;;  %v5329_v27 = vadd.f32 %v9147_v14, %v5230_v25  ;;  %v4015_v28 = vadd.f32 %v7889_v26, %v9147_v14  ;;  %v8033_v29 = vpop.f32.mrb[54].mxu1  ;;  %v3916_v30 = vpop.f32.mrb[55].mxu0  ;;  %v4046_v34 = vmax.f32 %v4014_v20, 0.0 }
 0x266   : > { %v5332_v31 = vadd.f32 %v8033_v29, %v9147_v14  ;;  %v4013_v32 = vadd.f32 %v9147_v14, %v3916_v30  ;;  %v5233_v33 = vpop.f32.mrb[55].mxu1  ;;  %v5363_v37 = vmax.f32 %v5331_v23, 0.0  ;;  %v4044_v38 = vmax.f32 %v4012_v24, 0.0 }
 0x267   : > { %v4047_v35 = vmax.f32 %v4015_v28, 0.0  ;;  %v5330_v36 = vadd.f32 %v9147_v14, %v5233_v33  ;;  %v5361_v41 = vmax.f32 %v5329_v27, 0.0 }
 0x268   : > { %v5364_v39 = vmax.f32 %v5332_v31, 0.0  ;;  %v4045_v40 = vmax.f32 %v4013_v32, 0.0 }
 0x269   : > { %v7013_v42 = vpack.c.bf16 %v4047_v35, %v4046_v34  ;;  %v5362_v43 = vmax.f32 %v5330_v36, 0.0 }
 0x26a   : > { %v7093_v44 = vpack.c.bf16 %v5364_v39, %v5363_v37  ;;  %v7008_v45 = vpack.c.bf16 %v4045_v40, %v4044_v38  ;;  %v7892_v46 = vpop.f32.mrb[56].mxu0 }
 0x26b   : > { %7157 = vst [vmem:[%s9165_s12 + $0x158] sm:$0xff] %v7013_v42   ;;  %v7088_v47 = vpack.c.bf16 %v5362_v43, %v5361_v41  ;;  %v4018_v48 = vadd.f32 %v7892_v46, %v9147_v14  ;;  %v8036_v49 = vpop.f32.mrb[56].mxu1  ;;  %v3929_v50 = vpop.f32.mrb[57].mxu0 }
 0x26c   : > { %7173 = vst [vmem:[%s9165_s12 + $0x1d8] sm:$0xff] %v7093_v44   ;;  %7156 = vst [vmem:[%s9165_s12 + $0x150] sm:$0xff] %v7008_v45   ;;  %v5335_v51 = vadd.f32 %v8036_v49, %v9147_v14  ;;  %v4016_v52 = vadd.f32 %v9147_v14, %v3929_v50  ;;  %v5246_v53 = vpop.f32.mrb[57].mxu1  ;;  %v7893_v54 = vpop.f32.mrb[58].mxu0 }
 0x26d   : > { %7172 = vst [vmem:[%s9165_s12 + $0x1d0] sm:$0xff] %v7088_v47   ;;  %v5333_v55 = vadd.f32 %v9147_v14, %v5246_v53  ;;  %v4019_v56 = vadd.f32 %v7893_v54, %v9147_v14  ;;  %v8037_v57 = vpop.f32.mrb[58].mxu1  ;;  %v3932_v58 = vpop.f32.mrb[59].mxu0  ;;  %v4050_v62 = vmax.f32 %v4018_v48, 0.0 }
 0x26e   : > { %v5336_v59 = vadd.f32 %v8037_v57, %v9147_v14  ;;  %v4017_v60 = vadd.f32 %v9147_v14, %v3932_v58  ;;  %v5249_v61 = vpop.f32.mrb[59].mxu1  ;;  %v5367_v1 = vmax.f32 %v5335_v51, 0.0  ;;  %v4048_v2 = vmax.f32 %v4016_v52, 0.0 }
 0x26f   : > { %v4051_v63 = vmax.f32 %v4019_v56, 0.0  ;;  %v5334_v0 = vadd.f32 %v9147_v14, %v5249_v61  ;;  %v5365_v5 = vmax.f32 %v5333_v55, 0.0 }
 0x270   : > { %v5368_v3 = vmax.f32 %v5336_v59, 0.0  ;;  %v4049_v4 = vmax.f32 %v4017_v60, 0.0 }
 0x271   : > { %v7023_v6 = vpack.c.bf16 %v4051_v63, %v4050_v62  ;;  %v5366_v7 = vmax.f32 %v5334_v0, 0.0 }
 0x272   : > { %v7103_v8 = vpack.c.bf16 %v5368_v3, %v5367_v1  ;;  %v7018_v9 = vpack.c.bf16 %v4049_v4, %v4048_v2  ;;  %v7896_v10 = vpop.f32.mrb[60].mxu0 }
 0x273   : > { %7159 = vst [vmem:[%s9165_s12 + $0x168] sm:$0xff] %v7023_v6   ;;  %v7098_v11 = vpack.c.bf16 %v5366_v7, %v5365_v5  ;;  %v4022_v14 = vadd.f32 %v8611_v12, %v7896_v10  ;;  %v8040_v13 = vpop.f32.mrb[60].mxu1  ;;  %v3945_v15 = vpop.f32.mrb[61].mxu0 }
 0x274   : > { %7175 = vst [vmem:[%s9165_s12 + $0x1e8] sm:$0xff] %v7103_v8   ;;  %7158 = vst [vmem:[%s9165_s12 + $0x160] sm:$0xff] %v7018_v9   ;;  %v5339_v16 = vadd.f32 %v8611_v12, %v8040_v13  ;;  %v4020_v17 = vadd.f32 %v8611_v12, %v3945_v15  ;;  %v5262_v18 = vpop.f32.mrb[61].mxu1  ;;  %v7897_v19 = vpop.f32.mrb[62].mxu0 }
 0x275   : > { %7174 = vst [vmem:[%s9165_s12 + $0x1e0] sm:$0xff] %v7098_v11   ;;  %v5337_v20 = vadd.f32 %v8611_v12, %v5262_v18  ;;  %v4023_v21 = vadd.f32 %v8611_v12, %v7897_v19  ;;  %v8041_v22 = vpop.f32.mrb[62].mxu1  ;;  %v3948_v23 = vpop.f32.mrb[63].mxu0  ;;  %v4054_v27 = vmax.f32 %v4022_v14, 0.0 }
 0x276   : > { %v5340_v24 = vadd.f32 %v8611_v12, %v8041_v22  ;;  %v4021_v25 = vadd.f32 %v8611_v12, %v3948_v23  ;;  %v5265_v26 = vpop.f32.mrb[63].mxu1  ;;  %v5371_v30 = vmax.f32 %v5339_v16, 0.0  ;;  %v4052_v31 = vmax.f32 %v4020_v17, 0.0 }
 0x277   : > { %v4055_v28 = vmax.f32 %v4023_v21, 0.0  ;;  %v5338_v29 = vadd.f32 %v8611_v12, %v5265_v26  ;;  %v5369_v34 = vmax.f32 %v5337_v20, 0.0 }
 0x278   : > { %v5372_v32 = vmax.f32 %v5340_v24, 0.0  ;;  %v4053_v33 = vmax.f32 %v4021_v25, 0.0 }
 0x279   : > { %v7033_v35 = vpack.c.bf16 %v4055_v28, %v4054_v27  ;;  %v5370_v36 = vmax.f32 %v5338_v29, 0.0 }
 0x27a   : > { %v7113_v37 = vpack.c.bf16 %v5372_v32, %v5371_v30  ;;  %v7028_v38 = vpack.c.bf16 %v4053_v33, %v4052_v31 }
 0x27b   : > { %7161 = vst [vmem:[%s9165_s12 + $0x178] sm:$0xff] %v7033_v35   ;;  %v7108_v39 = vpack.c.bf16 %v5370_v36, %v5369_v34 }
 0x27c   : > { %7177 = vst [vmem:[%s9165_s12 + $0x1f8] sm:$0xff] %v7113_v37   ;;  %7160 = vst [vmem:[%s9165_s12 + $0x170] sm:$0xff] %v7028_v38  }
 0x27d   : > { %7176 = vst [vmem:[%s9165_s12 + $0x1f0] sm:$0xff] %v7108_v39  }
 0x27e PF: > { %s13_s14 = sadd.s32 1, %s8634_s14   ;;  %s9373_s12 = smov %s8630_s13 }
 0x27f   : > { %p10_p5 = scmp.ge.s32.totalorder %s13_s14, 4   ;;  %s9374_s13 = smov %s9376_s15 }
 0x281   :  { %12 = sbr.rel (!%p10_p5) target bundleno = 2 (0x2), region = 78 }

// kernel: res_block_forward.5
= control target key start
LH: loop header
LB: loop body
LE: loop exit
PB: predicated region body
PF: predicated region fallthrough
CT: control target
= control target key end

     0   :  { %s3161_s12 = smov 0   ;;  %s3530_s0 = inlined_call_operand.vmem [shape: bf16[32,9,9,128], index: 0, kind: input, shape index: {}]   ;;  %s3531_s1 = inlined_call_operand.vmem [shape: bf16[9,128,128], index: 1, kind: input, shape index: {}]   ;;  %s3532_s2 = inlined_call_operand.vmem [shape: f32[1,128], index: 2, kind: input, shape index: {}]   ;;  %s3533_s3 = inlined_call_operand.vmem [shape: bf16[8,8,8,128], index: 3, kind: output, shape index: {}]  }
   0x1 LB: > { %s3167_s13 = sadd.s32 4294967295, %s3139_s12   ;;  %p2284_p0 = scmp.ge.s32.totalorder %s3139_s12, 1  ;;  %s3139_s12 = sphi %s3161_s12, %s13_s12  }
   0x2   : > { %p139_p1 = scmp.lt.s32.totalorder %s3139_s12, 9 }
   0x4   : > { %p140_p2 = pnand %p2284_p0, %p139_p1 }
   0x5   : > { %v3037_v0 = vld [vmem:[%s3531_s1] sm:$0xff] (!%p140_p2)   ;;  %s2285_s16 = sshll.u32 (!%p140_p2), %s3167_s13, 2  ;;  %v3039_v2 = vld [vmem:[%s3531_s1 + $0x8] sm:$0xff] (!%p140_p2)   ;;  %v3041_v4 = vld [vmem:[%s3531_s1 + $0x10] sm:$0xff] (!%p140_p2)   ;;  %vm557_vm0 = vsmask.f32 (!%p140_p2), 3328 }
   0x6   : > { %143 = sbr.rel (%p140_p2) target bundleno = 391 (0x187), region = 32  ;;  %v3038_v1 = vld [vmem:[%s3531_s1 + $0x100] sm:$0xff] (!%p140_p2)   ;;  %p165_p3 = scmp.lt.s32.totalorder (!%p140_p2), %s2285_s16, 31  ;;  %2732 = vmatprep.subr.bf16.mxu1 (!%p140_p2), %v3037_v0  ;;  %v3040_v3 = vld [vmem:[%s3531_s1 + $0x108] sm:$0xff] (!%p140_p2)   ;;  %v3042_v5 = vld [vmem:[%s3531_s1 + $0x110] sm:$0xff] (!%p140_p2)  }
   0x7   : > { %2828 = vmatprep.subr.bf16.mxu0 (!%p140_p2), %v3038_v1  ;;  %2733 = vmatpush3.bf16.msra.mxu1 (!%p140_p2), %v3037_v0  ;;  %v3043_v6 = vld [vmem:[%s3531_s1 + $0x18] sm:$0xff] (!%p140_p2)   ;;  %v3045_v8 = vld [vmem:[%s3531_s1 + $0x20] sm:$0xff] (!%p140_p2)   ;;  %v3047_v10 = vld [vmem:[%s3531_s1 + $0x28] sm:$0xff] (!%p140_p2)   ;;  %vm558_vm1 = vsmask.f32 (!%p140_p2), 7440  ;;  %p171_p4 = scmp.lt.s32.totalorder (!%p140_p2), %s3167_s13, 7 }
   0x8   : > { %2829 = vmatpush3.bf16.msra.mxu0 (!%p140_p2), %v3038_v1  ;;  %2734 = vmatprep.subr.bf16.mxu1 (!%p140_p2), %v3039_v2  ;;  %v3044_v7 = vld [vmem:[%s3531_s1 + $0x118] sm:$0xff] (!%p140_p2)   ;;  %v3046_v9 = vld [vmem:[%s3531_s1 + $0x120] sm:$0xff] (!%p140_p2)   ;;  %v3048_v12 = vld [vmem:[%s3531_s1 + $0x128] sm:$0xff] (!%p140_p2)  }
   0x9   : > { %2830 = vmatprep.subr.bf16.mxu0 (!%p140_p2), %v3040_v3  ;;  %v3049_v14 = vld [vmem:[%s3531_s1 + $0x30] sm:$0xff] (!%p140_p2)   ;;  %v3051_v16 = vld [vmem:[%s3531_s1 + $0x38] sm:$0xff] (!%p140_p2)   ;;  %v3054_v18 = vld [vmem:[%s3531_s1 + $0x40] sm:$0xff] (!%p140_p2)  }
   0xa   : > { %v3050_v15 = vld [vmem:[%s3531_s1 + $0x130] sm:$0xff] (!%p140_p2)   ;;  %v3052_v17 = vld [vmem:[%s3531_s1 + $0x138] sm:$0xff] (!%p140_p2)   ;;  %v3056_v19 = vld [vmem:[%s3531_s1 + $0x140] sm:$0xff] (!%p140_p2)  }
   0xb   : > { %2735 = vmatpush3.bf16.msra.mxu1 (!%p140_p2), %v3039_v2  ;;  %v3059_v22 = vld [vmem:[%s3531_s1 + $0x48] sm:$0xff] (!%p140_p2)   ;;  %v3061_v26 = vld [vmem:[%s3531_s1 + $0x50] sm:$0xff] (!%p140_p2)   ;;  %v3063_v28 = vld [vmem:[%s3531_s1 + $0x58] sm:$0xff] (!%p140_p2)  }
   0xc   : > { %2831 = vmatpush3.bf16.msra.mxu0 (!%p140_p2), %v3040_v3  ;;  %2736 = vmatprep.subr.bf16.mxu1 (!%p140_p2), %v3041_v4  ;;  %v3060_v23 = vld [vmem:[%s3531_s1 + $0x148] sm:$0xff] (!%p140_p2)   ;;  %v3062_v27 = vld [vmem:[%s3531_s1 + $0x150] sm:$0xff] (!%p140_p2)   ;;  %v3064_v31 = vld [vmem:[%s3531_s1 + $0x158] sm:$0xff] (!%p140_p2)  }
   0xd   : > { %s3537_s16 = smov (!%p165_p3, %s2285_s16), 31  ;;  %2832 = vmatprep.subr.bf16.mxu0 %v3042_v5  ;;  %v3065_v38 = vld [vmem:[%s3531_s1 + $0x60] sm:$0xff]   ;;  %v3067_v47 = vld [vmem:[%s3531_s1 + $0x68] sm:$0xff]   ;;  %vm3276_vm2 = vmor %vm557_vm0, %vm558_vm1  ;;  %s3539_s13 = smov (!%p171_p4, %s3167_s13), 7 }
   0xe   : > { %s3028_s4 = smul.u32 72, %s3537_s16  ;;  %v3066_v43 = vld [vmem:[%s3531_s1 + $0x160] sm:$0xff]   ;;  %v3068_v50 = vld [vmem:[%s3531_s1 + $0x168] sm:$0xff]   ;;  %v3070_v2 = vld [vmem:[%s3531_s1 + $0x70] sm:$0xff]   ;;  %s2600_s19 = sshll.u32 %s3539_s13, 5 }
   0xf   : > { %2737 = vmatpush3.bf16.msra.mxu1 %v3041_v4  ;;  %s175_s22 = scalar_lea.vmem %s3533_s3, %s2600_s19 }
  0x10   : > { %2833 = vmatpush3.bf16.msra.mxu0 %v3042_v5  ;;  %2738 = vmatprep.subr.bf16.mxu1 %v3043_v6  ;;  %s3205_s11 = scalar_lea.vmem %s3530_s0, %s3028_s4 }
  0x11   : > { %2834 = vmatprep.subr.bf16.mxu0 %v3044_v7  ;;  %v3053_v11 = vld [vmem:[%s3205_s11] ss:$8 sps:$4 sm:$0xff]   ;;  %v3057_v20 = vld [vmem:[%s3205_s11 + $0x10] ss:$8 sps:$4 sm:$0xff]   ;;  %v2438_v34 = vld [vmem:[%s3205_s11 + $0x94] sm:$0x1] }
  0x12   : > { %2748 = vmatprep.mubr.bf16.mxu1 %v3053_v11  ;;  %v3055_v13 = vld [vmem:[%s3205_s11 + $0xd8] ss:$8 sps:$4 sm:$0xff]   ;;  %v3058_v21 = vld [vmem:[%s3205_s11 + $0xe8] ss:$8 sps:$4 sm:$0xff]   ;;  %v2440_v39 = vld [vmem:[%s3205_s11 + $0x9c] sm:$0x1] }
  0x13   : > { %2739 = vmatpush3.bf16.msra.mxu1 %v3043_v6  ;;  %2844 = vmatprep.mubr.bf16.mxu0 %v3055_v13  ;;  %v3069_v24 = vld [vmem:[%s3205_s11 + $0x20] ss:$8 sps:$4 sm:$0xff]   ;;  %v3073_v29 = vld [vmem:[%s3205_s11 + $0x30] ss:$8 sps:$4 sm:$0xff]   ;;  %v1242_v40 = vshll.u32 %v2438_v34, 16  ;;  %v1256_v46 = vshll.u32 %v2440_v39, 16 }
  0x14   : > { %2835 = vmatpush3.bf16.msra.mxu0 %v3044_v7  ;;  %2740 = vmatprep.subr.bf16.mxu1 %v3045_v8  ;;  %v3071_v25 = vld [vmem:[%s3205_s11 + $0xf8] ss:$8 sps:$4 sm:$0xff]   ;;  %v3074_v30 = vld [vmem:[%s3205_s11 + $0x108] ss:$8 sps:$4 sm:$0xff]   ;;  %v2442_v57 = vld [vmem:[%s3205_s11 + $0xa4] sm:$0x1] }
  0x15   : > { %2836 = vmatprep.subr.bf16.mxu0 %v3046_v9  ;;  %v3077_v32 = vld [vmem:[%s3205_s11 + $0x48] ss:$8 sps:$4 sm:$0xff]   ;;  %v2439_v35 = vld [vmem:[%s3205_s11 + $0x98] sm:$0xf]  ;;  %v1244_v52 = vrot.slane %v1242_v40, 5  ;;  %v1258_v55 = vrot.slane %v1256_v46, 5 }
  0x16   : > { %v2437_v33 = vld [vmem:[%s3205_s11 + $0x90] sm:$0xf]  ;;  %v1247_v41 = vshrl.u32 %v2439_v35, 16  ;;  %v1250_v42 = vshll.u32 %v2439_v35, 16  ;;  %v2441_v56 = vld [vmem:[%s3205_s11 + $0xa0] sm:$0xf] }
  0x17   : > { %2741 = vmatpush3.bf16.msra.mxu1 %v3045_v8  ;;  %v1233_v36 = vshrl.u32 %v2437_v33, 16  ;;  %v1236_v37 = vshll.u32 %v2437_v33, 16  ;;  %v2443_v59 = vld [vmem:[%s3205_s11 + $0xa8] sm:$0xf]  ;;  %v2444_v60 = vld [vmem:[%s3205_s11 + $0xac] sm:$0x1] }
  0x18   : > { %2837 = vmatpush3.bf16.msra.mxu0 %v3046_v9  ;;  %2742 = vmatprep.subr.bf16.mxu1 %v3047_v10  ;;  %v1249_v48 = vrot.slane %v1247_v41, 4  ;;  %v1252_v49 = vrot.slane %v1250_v42, 5  ;;  %v1261_v61 = vshrl.u32 %v2441_v56, 16  ;;  %v1264_v63 = vshll.u32 %v2441_v56, 16  ;;  %v3072_v6 = vld [vmem:[%s3531_s1 + $0x170] sm:$0xff]  }
  0x19   : > { %2838 = vmatprep.subr.bf16.mxu0 %v3048_v12  ;;  %v1235_v44 = vrot.slane %v1233_v36, 4  ;;  %v1238_v45 = vrot.slane %v1236_v37, 5  ;;  %v1270_v0 = vshll.u32 %v2442_v57, 16  ;;  %v1275_v1 = vshrl.u32 %v2443_v59, 16  ;;  %v3091_v37 = vld [vmem:[%s3205_s11 + $0x68] ss:$8 sps:$4 sm:$0xff]  }
  0x1a   : > { %v1253_v54 = vor.u32 %v1252_v49, %v1249_v48  ;;  %v1263_v4 = vrot.slane %v1261_v61, 4  ;;  %v1278_v5 = vshll.u32 %v2443_v59, 16  ;;  %v1266_v8 = vrot.slane %v1264_v63, 5  ;;  %v3094_v48 = vld [vmem:[%s3205_s11 + $0x78] ss:$8 sps:$4 sm:$0xff]  }
  0x1b   : > { %2743 = vmatpush3.bf16.msra.mxu1 %v3047_v10  ;;  %v1239_v51 = vor.u32 %v1238_v45, %v1235_v44  ;;  %v1277_v9 = vrot.slane %v1275_v1, 4  ;;  %v1284_v10 = vshll.u32 %v2444_v60, 16  ;;  %v2449_v49 = vld [vmem:[%s3205_s11 + $0xc0] sm:$0xf]  ;;  %v3085_v59 = vld [vmem:[%s3531_s1 + $0x98] sm:$0xff]  }
  0x1c   : > { %2839 = vmatpush3.bf16.msra.mxu0 %v3048_v12  ;;  %2744 = vmatprep.subr.bf16.mxu1 %v3049_v14  ;;  %v1254_v62 = vrot.slane %v1253_v54, 4  ;;  %v1272_v12 = vrot.slane %v1270_v0, 5  ;;  %v1280_v13 = vrot.slane %v1278_v5, 5  ;;  %v1317_v56 = vshrl.u32 %v2449_v49, 16 }
  0x1d   : > { %2840 = vmatprep.subr.bf16.mxu0 %v3050_v15  ;;  %v1240_v58 = vrot.slane %v1239_v51, 4  ;;  %v2451_v51 = vld [vmem:[%s3205_s11 + $0xc8] sm:$0xf]  ;;  %v1320_v57 = vshll.u32 %v2449_v49, 16 }
  0x1e   : > { %v1259_v7 = vsel %vm3276_vm2, %v1254_v62, %v1258_v55  ;;  %v2452_v55 = vld [vmem:[%s3205_s11 + $0xcc] sm:$0x1]  ;;  %v1331_v61 = vshrl.u32 %v2451_v51, 16  ;;  %v1334_v62 = vshll.u32 %v2451_v51, 16  ;;  %v1319_v1 = vrot.slane %v1317_v56, 4 }
  0x1f   : > { %2745 = vmatpush3.bf16.msra.mxu1 %v3049_v14  ;;  %v1245_v3 = vsel %vm3276_vm2, %v1240_v58, %v1244_v52  ;;  %v3075_v14 = vld [vmem:[%s3531_s1 + $0x78] sm:$0xff]   ;;  %v3084_v52 = vld [vmem:[%s3531_s1 + $0x190] sm:$0xff]   ;;  %v1340_v63 = vshll.u32 %v2452_v55, 16 }
  0x20   : > { %2841 = vmatpush3.bf16.msra.mxu0 %v3050_v15  ;;  %2746 = vmatprep.subr.bf16.mxu1 %v3051_v16  ;;  %v2469_v11 = vcombine.low %v1245_v3, %v1259_v7  ;;  %v1267_v15 = vor.u32 %v1266_v8, %v1263_v4  ;;  %v3086_v4 = vld [vmem:[%s3531_s1 + $0x198] sm:$0xff]   ;;  %v1336_v7 = vrot.slane %v1334_v62, 5 }
  0x21   : > { %2842 = vmatprep.subr.bf16.mxu0 %v3052_v17  ;;  %v1342_v8 = vrot.slane %v1340_v63, 5 }
  0x23   : > { %2747 = vmatpush3.bf16.msra.mxu1 %v3051_v16  ;;  %v1281_v16 = vor.u32 %v1280_v13, %v1277_v9  ;;  %v3087_v13 = vld [vmem:[%s3531_s1 + $0xa0] sm:$0xff]  }
  0x24   : > { %2843 = vmatpush3.bf16.msra.mxu0 %v3052_v17  ;;  %2756 = vmatprep.subr.bf16.mxu1 %v3054_v18  ;;  %v1268_v17 = vrot.slane %v1267_v15, 4 }
  0x25   : > { %2852 = vmatprep.subr.bf16.mxu0 %v3056_v19 }
  0x26   : > { %2749 = vmatmul.mubr.bf16.vlgmr.msra.gmra.mrb[0].mxu1 %v3057_v20  ;;  %v1282_v20 = vrot.slane %v1281_v16, 4  ;;  %v543_v16 = vld [vmem:[%s3205_s11 + $0x8] sm:$0xf] }
  0x27   : > { %2757 = vmatpush3.bf16.msra.mxu1 %v3054_v18  ;;  %2845 = vmatmul.mubr.bf16.vlgmr.msra.gmra.mrb[0].mxu0 %v3058_v21  ;;  %v1286_v18 = vrot.slane %v1284_v10, 5  ;;  %v3078_v21 = vld [vmem:[%s3531_s1 + $0x80] sm:$0xff]  }
  0x28   : > { %2853 = vmatpush3.bf16.msra.mxu0 %v3056_v19  ;;  %2758 = vmatprep.subr.bf16.mxu1 %v3059_v22  ;;  %v3076_v19 = vld [vmem:[%s3531_s1 + $0x178] sm:$0xff]  }
  0x29   : > { %2854 = vmatprep.subr.bf16.mxu0 %v3060_v23  ;;  %2752 = vmatprep.mubr.bf16.mxu1 %v3069_v24  ;;  %v3079_v24 = vld [vmem:[%s3531_s1 + $0x180] sm:$0xff]  }
  0x2a   : > { %2848 = vmatprep.mubr.bf16.mxu0 %v3071_v25  ;;  %v3080_v25 = vld [vmem:[%s3205_s11 + $0x58] ss:$8 sps:$4 sm:$0xff]  }
  0x2b   : > { %2759 = vmatpush3.bf16.msra.mxu1 %v3059_v22  ;;  %v1273_v22 = vsel %vm3276_vm2, %v1268_v17, %v1272_v12  ;;  %v542_v12 = vld [vmem:[%s3205_s11 + $0x4] sm:$0x1]  ;;  %v544_v17 = vld [vmem:[%s3205_s11 + $0xc] sm:$0x1] }
  0x2c   : > { %2855 = vmatpush3.bf16.msra.mxu0 %v3060_v23  ;;  %2760 = vmatprep.subr.bf16.mxu1 %v3061_v26  ;;  %v1287_v23 = vsel %vm3276_vm2, %v1282_v20, %v1286_v18 }
  0x2d   : > { %2856 = vmatprep.subr.bf16.mxu0 %v3062_v27 }
  0x2e   : > { %2753 = vmatmul.mubr.bf16.gmra.mrb[4].mxu1 %v3073_v29  ;;  %v3082_v29 = vld [vmem:[%s3531_s1 + $0x188] sm:$0xff]  }
  0x2f   : > { %2761 = vmatpush3.bf16.msra.mxu1 %v3061_v26  ;;  %2849 = vmatmul.mubr.bf16.gmra.mrb[4].mxu0 %v3074_v30  ;;  %v3081_v26 = vld [vmem:[%s3531_s1 + $0x88] sm:$0xff]   ;;  %v2446_v30 = vld [vmem:[%s3205_s11 + $0xb4] sm:$0x1] }
  0x30   : > { %2857 = vmatpush3.bf16.msra.mxu0 %v3062_v27  ;;  %2762 = vmatprep.subr.bf16.mxu1 %v3063_v28  ;;  %v2445_v27 = vld [vmem:[%s3205_s11 + $0xb0] sm:$0xf]  ;;  %v1298_v35 = vshll.u32 %v2446_v30, 16 }
  0x31   : > { %2858 = vmatprep.subr.bf16.mxu0 %v3064_v31  ;;  %2772 = vmatprep.mubr.bf16.mxu1 %v3077_v32  ;;  %v2448_v32 = vld [vmem:[%s3205_s11 + $0xbc] sm:$0x1]  ;;  %v1289_v33 = vshrl.u32 %v2445_v27, 16  ;;  %v1292_v34 = vshll.u32 %v2445_v27, 16  ;;  %v584_v27 = vshll.u32 %v544_v17, 16 }
  0x32   : > { %2868 = vmatprep.mubr.bf16.mxu0 %v2469_v11  ;;  %v1312_v39 = vshll.u32 %v2448_v32, 16  ;;  %v1300_v44 = vrot.slane %v1298_v35, 5  ;;  %v541_v11 = vld [vmem:[%s3205_s11] sm:$0xf]  ;;  %v3089_v32 = vld [vmem:[%s3531_s1 + $0xa8] sm:$0xff]  }
  0x33   : > { %2763 = vmatpush3.bf16.msra.mxu1 %v3063_v28  ;;  %v2470_v28 = vcombine.low %v1273_v22, %v1287_v23  ;;  %v1291_v40 = vrot.slane %v1289_v33, 4  ;;  %v1294_v41 = vrot.slane %v1292_v34, 5  ;;  %v561_v18 = vshrl.u32 %v541_v11, 16  ;;  %v552_v17 = vld [vmem:[%s3205_s11 + $0x2c] sm:$0x1] }
  0x34   : > { %2859 = vmatpush3.bf16.msra.mxu0 %v3064_v31  ;;  %2764 = vmatprep.subr.bf16.mxu1 %v3065_v38  ;;  %v2447_v31 = vld [vmem:[%s3205_s11 + $0xb8] sm:$0xf]  ;;  %v1314_v46 = vrot.slane %v1312_v39, 5  ;;  %v575_v22 = vshrl.u32 %v543_v16, 16  ;;  %v578_v23 = vshll.u32 %v543_v16, 16 }
  0x35   : > { %2860 = vmatprep.subr.bf16.mxu0 %v3066_v43  ;;  %v1303_v36 = vshrl.u32 %v2447_v31, 16  ;;  %v551_v16 = vld [vmem:[%s3205_s11 + $0x28] sm:$0xf] }
  0x36   : > { %v577_v30 = vrot.slane %v575_v22, 4  ;;  %v631_v22 = vshrl.u32 %v551_v16, 16 }
  0x37   : > { %2765 = vmatpush3.bf16.msra.mxu1 %v3065_v38  ;;  %v1306_v38 = vshll.u32 %v2447_v31, 16  ;;  %v1305_v42 = vrot.slane %v1303_v36, 4  ;;  %v580_v31 = vrot.slane %v578_v23, 5  ;;  %v586_v36 = vrot.slane %v584_v27, 5 }
  0x38   : > { %2861 = vmatpush3.bf16.msra.mxu0 %v3066_v43  ;;  %2766 = vmatprep.subr.bf16.mxu1 %v3067_v47  ;;  %v3083_v43 = vld [vmem:[%s3531_s1 + $0x90] sm:$0xff]   ;;  %v634_v23 = vshll.u32 %v551_v16, 16  ;;  %v2554_v16 = vld [vmem:[%s3205_s11 + $0xc] sm:$0x1] }
  0x39   : > { %2862 = vmatprep.subr.bf16.mxu0 %v3068_v50  ;;  %v1308_v45 = vrot.slane %v1306_v38, 5  ;;  %v3090_v38 = vld [vmem:[%s3531_s1 + $0x1a8] sm:$0xff]  }
  0x3b   : > { %2767 = vmatpush3.bf16.msra.mxu1 %v3067_v47  ;;  %v1295_v47 = vor.u32 %v1294_v41, %v1291_v40  ;;  %v1309_v54 = vor.u32 %v1308_v45, %v1305_v42  ;;  %v581_v40 = vor.u32 %v580_v31, %v577_v30  ;;  %v545_v41 = vld [vmem:[%s3205_s11 + $0x10] sm:$0xf]  ;;  %v636_v31 = vrot.slane %v634_v23, 5 }
  0x3c   : > { %2863 = vmatpush3.bf16.msra.mxu0 %v3068_v50  ;;  %2768 = vmatprep.subr.bf16.mxu1 %v3070_v2  ;;  %v2450_v50 = vld [vmem:[%s3205_s11 + $0xc4] sm:$0x1]  ;;  %v589_v45 = vshrl.u32 %v545_v41, 16  ;;  %v553_v30 = vld [vmem:[%s3205_s11 + $0x30] sm:$0xf] }
  0x3d   : > { %2864 = vmatprep.subr.bf16.mxu0 %v3072_v6  ;;  %v1326_v58 = vshll.u32 %v2450_v50, 16  ;;  %v1296_v60 = vrot.slane %v1295_v47, 4  ;;  %v1310_v0 = vrot.slane %v1309_v54, 4  ;;  %v548_v47 = vld [vmem:[%s3205_s11 + $0x1c] sm:$0x1] }
  0x3f   : > { %2769 = vmatpush3.bf16.msra.mxu1 %v3070_v2  ;;  %v1322_v2 = vrot.slane %v1320_v57, 5  ;;  %v1328_v3 = vrot.slane %v1326_v58, 5  ;;  %v1301_v5 = vsel %vm3276_vm2, %v1296_v60, %v1300_v44  ;;  %v1315_v9 = vsel %vm3276_vm2, %v1310_v0, %v1314_v46  ;;  %v547_v44 = vld [vmem:[%s3205_s11 + $0x18] sm:$0xf]  ;;  %v3093_v60 = vld [vmem:[%s3531_s1 + $0x1b0] sm:$0xff]  }
  0x40   : > { %2865 = vmatpush3.bf16.msra.mxu0 %v3072_v6  ;;  %2770 = vmatprep.subr.bf16.mxu1 %v3075_v14  ;;  %v1333_v6 = vrot.slane %v1331_v61, 4  ;;  %v582_v46 = vrot.slane %v581_v40, 4  ;;  %v603_v50 = vshrl.u32 %v547_v44, 16  ;;  %v606_v54 = vshll.u32 %v547_v44, 16 }
  0x41   : > { %2866 = vmatprep.subr.bf16.mxu0 %v3076_v19  ;;  %v1323_v10 = vor.u32 %v1322_v2, %v1319_v1  ;;  %v612_v58 = vshll.u32 %v548_v47, 16 }
  0x42   : > { %v1337_v15 = vor.u32 %v1336_v7, %v1333_v6  ;;  %v587_v55 = vsel %vm3276_vm2, %v582_v46, %v586_v36  ;;  %v605_v57 = vrot.slane %v603_v50, 4  ;;  %v608_v63 = vrot.slane %v606_v54, 5  ;;  %v3096_v6 = vld [vmem:[%s3531_s1 + $0x1b8] sm:$0xff]   ;;  %v3097_v7 = vld [vmem:[%s3531_s1 + $0xc0] sm:$0xff]  }
  0x43   : > { %2771 = vmatpush3.bf16.msra.mxu1 %v3075_v14  ;;  %v2471_v14 = vcombine.low %v1301_v5, %v1315_v9  ;;  %v1324_v20 = vrot.slane %v1323_v10, 4  ;;  %v3099_v10 = vld [vmem:[%s3531_s1 + $0x1c0] sm:$0xff]   ;;  %v3105_v50 = vld [vmem:[%s3531_s1 + $0xd8] sm:$0xff]  }
  0x44   : > { %2867 = vmatpush3.bf16.msra.mxu0 %v3076_v19  ;;  %2780 = vmatprep.subr.bf16.mxu1 %v3078_v21  ;;  %v564_v19 = vshll.u32 %v541_v11, 16  ;;  %v609_v1 = vor.u32 %v608_v63, %v605_v57  ;;  %v3100_v11 = vld [vmem:[%s3205_s11 + $0x18] ss:$8 sps:$4 sm:$0xff]  }
  0x45   : > { %2876 = vmatprep.subr.bf16.mxu0 %v3079_v24 }
  0x46   : > { %2773 = vmatmul.mubr.bf16.vlgmr.msra.gmra.mrb[0].mxu1 %v3080_v25  ;;  %v563_v25 = vrot.slane %v561_v18, 4  ;;  %v610_v5 = vrot.slane %v609_v1, 4  ;;  %v3102_v18 = vld [vmem:[%s3531_s1 + $0x1c8] sm:$0xff]   ;;  %v3107_v1 = vld [vmem:[%s3531_s1 + $0xe0] sm:$0xff]  }
  0x47   : > { %2781 = vmatpush3.bf16.msra.mxu1 %v3078_v21  ;;  %2869 = vmatmul.mubr.bf16.vlgmr.msra.gmra.mrb[0].mxu0 %v2470_v28  ;;  %v570_v21 = vshll.u32 %v542_v12, 16  ;;  %v3088_v28 = vld [vmem:[%s3531_s1 + $0x1a0] sm:$0xff]  }
  0x48   : > { %2877 = vmatpush3.bf16.msra.mxu0 %v3079_v24  ;;  %2782 = vmatprep.subr.bf16.mxu1 %v3081_v26  ;;  %v1338_v24 = vrot.slane %v1337_v15, 4  ;;  %v549_v12 = vld [vmem:[%s3205_s11 + $0x20] sm:$0xf]  ;;  %v550_v15 = vld [vmem:[%s3205_s11 + $0x24] sm:$0x1] }
  0x49   : > { %2878 = vmatprep.subr.bf16.mxu0 %v3082_v29  ;;  %2776 = vmatprep.mubr.bf16.mxu1 %v3091_v37  ;;  %v572_v35 = vrot.slane %v570_v21, 5  ;;  %v3098_v37 = vld [vmem:[%s3205_s11 + $0x8] ss:$8 sps:$4 sm:$0xff]   ;;  %v626_v21 = vshll.u32 %v550_v15, 16 }
  0x4a   : > { %2872 = vmatprep.mubr.bf16.mxu0 %v2471_v14  ;;  %v1343_v33 = vsel %vm3276_vm2, %v1338_v24, %v1342_v8  ;;  %v3101_v14 = vld [vmem:[%s3531_s1 + $0xc8] sm:$0xff]   ;;  %v640_v24 = vshll.u32 %v552_v17, 16  ;;  %v2555_v17 = vld [vmem:[%s3205_s11 + $0x10] sm:$0xf] }
  0x4b   : > { %2783 = vmatpush3.bf16.msra.mxu1 %v3081_v26  ;;  %v566_v26 = vrot.slane %v564_v19, 5  ;;  %v617_v19 = vshrl.u32 %v549_v12, 16  ;;  %v2553_v15 = vld [vmem:[%s3205_s11 + $0x8] sm:$0xf]  ;;  %v1922_v23 = vshll.u32 %v2555_v17, 16 }
  0x4c   : > { %2879 = vmatpush3.bf16.msra.mxu0 %v3082_v29  ;;  %2784 = vmatprep.subr.bf16.mxu1 %v3083_v43  ;;  %v1329_v29 = vsel %vm3276_vm2, %v1324_v20, %v1328_v3  ;;  %v614_v3 = vrot.slane %v612_v58, 5  ;;  %v620_v20 = vshll.u32 %v549_v12, 16  ;;  %v3113_v58 = vld [vmem:[%s3205_s11 + $0x38] ss:$8 sps:$4 sm:$0xff]  }
  0x4d   : > { %2880 = vmatprep.subr.bf16.mxu0 %v3084_v52  ;;  %v567_v34 = vor.u32 %v566_v26, %v563_v25  ;;  %v2472_v39 = vcombine.low %v1329_v29, %v1343_v33  ;;  %v3111_v25 = vld [vmem:[%s3205_s11 + $0x28] ss:$8 sps:$4 sm:$0xff]   ;;  %v619_v26 = vrot.slane %v617_v19, 4  ;;  %v633_v29 = vrot.slane %v631_v22, 4  ;;  %v554_v33 = vld [vmem:[%s3205_s11 + $0x34] sm:$0x1] }
  0x4e   : > { %2777 = vmatmul.mubr.bf16.gmra.mrb[4].mxu1 %v3094_v48  ;;  %v592_v48 = vshll.u32 %v545_v41, 16  ;;  %v615_v9 = vsel %vm3276_vm2, %v610_v5, %v614_v3  ;;  %v622_v27 = vrot.slane %v620_v20, 5  ;;  %v654_v40 = vshll.u32 %v554_v33, 16  ;;  %v3104_v41 = vld [vmem:[%s3531_s1 + $0x1d0] sm:$0xff]   ;;  %v3108_v5 = vld [vmem:[%s3531_s1 + $0x1e0] sm:$0xff]   ;;  %v3115_v12 = vld [vmem:[%s3531_s1 + $0xf8] sm:$0xff]  }
  0x4f   : > { %2785 = vmatpush3.bf16.msra.mxu1 %v3083_v43  ;;  %v568_v42 = vrot.slane %v567_v34, 4  ;;  %v546_v43 = vld [vmem:[%s3205_s11 + $0x14] sm:$0x1]  ;;  %2873 = vmatmul.mubr.bf16.gmra.mrb[4].mxu0 %v2472_v39  ;;  %v555_v34 = vld [vmem:[%s3205_s11 + $0x38] sm:$0xf]  ;;  %v648_v39 = vshll.u32 %v553_v30, 16 }
  0x50   : > { %2881 = vmatpush3.bf16.msra.mxu0 %v3084_v52  ;;  %2786 = vmatprep.subr.bf16.mxu1 %v3085_v59  ;;  %v598_v49 = vshll.u32 %v546_v43, 16  ;;  %v591_v52 = vrot.slane %v589_v45, 4  ;;  %v594_v56 = vrot.slane %v592_v48, 5  ;;  %v623_v36 = vor.u32 %v622_v27, %v619_v26  ;;  %v2564_v33 = vld [vmem:[%s3205_s11 + $0x34] sm:$0x1] }
  0x51   : > { %2882 = vmatprep.subr.bf16.mxu0 %v3086_v4  ;;  %v573_v51 = vsel %vm3276_vm2, %v568_v42, %v572_v35  ;;  %2892 = vmatprep.mubr.bf16.mxu0 %v3098_v37  ;;  %v3103_v35 = vld [vmem:[%s3531_s1 + $0xd0] sm:$0xff]   ;;  %v556_v37 = vld [vmem:[%s3205_s11 + $0x3c] sm:$0x1]  ;;  %v637_v42 = vor.u32 %v636_v31, %v633_v29  ;;  %v659_v43 = vshrl.u32 %v555_v34, 16  ;;  %v662_v44 = vshll.u32 %v555_v34, 16 }
  0x52   : > { %v2353_v61 = vcombine.low %v573_v51, %v587_v55  ;;  %v600_v62 = vrot.slane %v598_v49, 5  ;;  %v595_v0 = vor.u32 %v594_v56, %v591_v52  ;;  %v668_v45 = vshll.u32 %v556_v37, 16  ;;  %v2563_v29 = vld [vmem:[%s3205_s11 + $0x30] sm:$0xf]  ;;  %v3120_v34 = vld [vmem:[%s3205_s11 + $0x60] ss:$8 sps:$4 sm:$0xff]  }
  0x53   : > { %2787 = vmatpush3.bf16.msra.mxu1 %v3085_v59  ;;  %v3092_v59 = vld [vmem:[%s3531_s1 + $0xb0] sm:$0xff]   ;;  %v624_v46 = vrot.slane %v623_v36, 4  ;;  %v650_v48 = vrot.slane %v648_v39, 5  ;;  %v656_v49 = vrot.slane %v654_v40, 5  ;;  %v638_v51 = vrot.slane %v637_v42, 4  ;;  %v3122_v39 = vld [vmem:[%s3531_s1 + $0x208] sm:$0xff]  }
  0x54   : > { %2883 = vmatpush3.bf16.msra.mxu0 %v3086_v4  ;;  %2788 = vmatprep.subr.bf16.mxu1 %v3087_v13  ;;  %v596_v2 = vrot.slane %v595_v0, 4  ;;  %v3095_v4 = vld [vmem:[%s3531_s1 + $0xb8] sm:$0xff]   ;;  %v661_v52 = vrot.slane %v659_v43, 4  ;;  %v664_v54 = vrot.slane %v662_v44, 5  ;;  %v670_v55 = vrot.slane %v668_v45, 5 }
  0x55   : > { %2884 = vmatprep.subr.bf16.mxu0 %v3088_v28  ;;  %2796 = vmatprep.mubr.bf16.mxu1 %v2353_v61  ;;  %v3106_v61 = vld [vmem:[%s3531_s1 + $0x1d8] sm:$0xff]   ;;  %v1905_v19 = vshrl.u32 %v2553_v15, 16  ;;  %v1908_v20 = vshll.u32 %v2553_v15, 16  ;;  %v1919_v22 = vshrl.u32 %v2555_v17, 16  ;;  %v1978_v42 = vshll.u32 %v2563_v29, 16  ;;  %v3129_v15 = vld [vmem:[%s3531_s1 + $0x220] sm:$0xff]  }
  0x56   : > { %v601_v8 = vsel %vm3276_vm2, %v596_v2, %v600_v62  ;;  %v1984_v43 = vshll.u32 %v2564_v33, 16  ;;  %v3123_v44 = vld [vmem:[%s3205_s11 + $0xb0] ss:$8 sps:$4 sm:$0xff]  }
  0x57   : > { %2789 = vmatpush3.bf16.msra.mxu1 %v3087_v13  ;;  %v2354_v13 = vcombine.low %v601_v8, %v615_v9  ;;  %v3109_v8 = vld [vmem:[%s3531_s1 + $0xe8] sm:$0xff]   ;;  %v1907_v26 = vrot.slane %v1905_v19, 4  ;;  %v1910_v27 = vrot.slane %v1908_v20, 5  ;;  %v1921_v31 = vrot.slane %v1919_v22, 4 }
  0x58   : > { %2885 = vmatpush3.bf16.msra.mxu0 %v3088_v28  ;;  %2790 = vmatprep.subr.bf16.mxu1 %v3089_v32  ;;  %v628_v28 = vrot.slane %v626_v21, 5  ;;  %v3110_v9 = vld [vmem:[%s3531_s1 + $0x1e8] sm:$0xff]   ;;  %v1914_v21 = vshll.u32 %v2554_v16, 16 }
  0x59   : > { %2886 = vmatprep.subr.bf16.mxu0 %v3090_v38  ;;  %v3130_v20 = vld [vmem:[%s3531_s1 + $0x228] sm:$0xff]  }
  0x5a   : > { %v629_v56 = vsel %vm3276_vm2, %v624_v46, %v628_v28  ;;  %v2562_v28 = vld [vmem:[%s3205_s11 + $0x2c] sm:$0x1]  ;;  %v1916_v45 = vrot.slane %v1914_v21, 5  ;;  %v2566_v21 = vld [vmem:[%s3205_s11 + $0x3c] sm:$0x1] }
  0x5b   : > { %2791 = vmatpush3.bf16.msra.mxu1 %v3089_v32  ;;  %v642_v32 = vrot.slane %v640_v24, 5 }
  0x5c   : > { %2887 = vmatpush3.bf16.msra.mxu0 %v3090_v38  ;;  %2792 = vmatprep.subr.bf16.mxu1 %v3092_v59  ;;  %v645_v38 = vshrl.u32 %v553_v30, 16  ;;  %v3119_v30 = vld [vmem:[%s3205_s11 + $0xa0] ss:$8 sps:$4 sm:$0xff]  }
  0x5d   : > { %2888 = vmatprep.subr.bf16.mxu0 %v3093_v60 }
  0x5e   : > { %v647_v47 = vrot.slane %v645_v38, 4  ;;  %v1970_v38 = vshll.u32 %v2562_v28, 16 }
  0x5f   : > { %2793 = vmatpush3.bf16.msra.mxu1 %v3092_v59  ;;  %v643_v59 = vsel %vm3276_vm2, %v638_v51, %v642_v32  ;;  %v1924_v32 = vrot.slane %v1922_v23, 5 }
  0x60   : > { %2889 = vmatpush3.bf16.msra.mxu0 %v3093_v60  ;;  %2794 = vmatprep.subr.bf16.mxu1 %v3095_v4  ;;  %v651_v57 = vor.u32 %v650_v48, %v647_v47  ;;  %v665_v60 = vor.u32 %v664_v54, %v661_v52  ;;  %v2355_v62 = vcombine.low %v629_v56, %v643_v59  ;;  %v1980_v54 = vrot.slane %v1978_v42, 5 }
  0x61   : > { %2890 = vmatprep.subr.bf16.mxu0 %v3096_v6  ;;  %v1925_v40 = vor.u32 %v1924_v32, %v1921_v31  ;;  %v1972_v56 = vrot.slane %v1970_v38, 5  ;;  %v1986_v59 = vrot.slane %v1984_v43, 5  ;;  %v2558_v31 = vld [vmem:[%s3205_s11 + $0x1c] sm:$0x1]  ;;  %v2560_v32 = vld [vmem:[%s3205_s11 + $0x24] sm:$0x1] }
  0x62   : > { %v652_v63 = vrot.slane %v651_v57, 4  ;;  %v666_v0 = vrot.slane %v665_v60, 4  ;;  %v3127_v57 = vld [vmem:[%s3531_s1 + $0x210] sm:$0xff]  }
  0x63   : > { %2795 = vmatpush3.bf16.msra.mxu1 %v3095_v4  ;;  %v3118_v4 = vld [vmem:[%s3205_s11 + $0x50] ss:$8 sps:$4 sm:$0xff]   ;;  %v1926_v51 = vrot.slane %v1925_v40, 4 }
  0x64   : > { %2891 = vmatpush3.bf16.msra.mxu0 %v3096_v6  ;;  %2804 = vmatprep.subr.bf16.mxu1 %v3097_v7  ;;  %v657_v2 = vsel %vm3276_vm2, %v652_v63, %v656_v49  ;;  %v671_v3 = vsel %vm3276_vm2, %v666_v0, %v670_v55  ;;  %v3124_v49 = vld [vmem:[%s3205_s11 + $0x70] ss:$8 sps:$4 sm:$0xff]  }
  0x65   : > { %2900 = vmatprep.subr.bf16.mxu0 %v3099_v10  ;;  %v2356_v6 = vcombine.low %v657_v2, %v671_v3  ;;  %v3128_v3 = vld [vmem:[%s3531_s1 + $0x218] sm:$0xff]  }
  0x66   : > { %2797 = vmatmul.mubr.bf16.vlgmr.msra.gmra.mrb[0].mxu1 %v2354_v13  ;;  %v3116_v13 = vld [vmem:[%s3531_s1 + $0x1f8] sm:$0xff]  }
  0x67   : > { %2805 = vmatpush3.bf16.msra.mxu1 %v3097_v7  ;;  %2893 = vmatmul.mubr.bf16.vlgmr.msra.gmra.mrb[0].mxu0 %v3100_v11  ;;  %v3117_v7 = vld [vmem:[%s3205_s11 + $0x90] ss:$8 sps:$4 sm:$0xff]  }
  0x68   : > { %2901 = vmatpush3.bf16.msra.mxu0 %v3099_v10  ;;  %2806 = vmatprep.subr.bf16.mxu1 %v3101_v14  ;;  %v3112_v10 = vld [vmem:[%s3531_s1 + $0xf0] sm:$0xff]  }
  0x69   : > { %2902 = vmatprep.subr.bf16.mxu0 %v3102_v18  ;;  %2896 = vmatprep.mubr.bf16.mxu0 %v3111_v25  ;;  %v3114_v11 = vld [vmem:[%s3531_s1 + $0x1f0] sm:$0xff]   ;;  %v2561_v25 = vld [vmem:[%s3205_s11 + $0x28] sm:$0xf] }
  0x6a   : > { %2800 = vmatprep.mubr.bf16.mxu1 %v2355_v62  ;;  %v1961_v36 = vshrl.u32 %v2561_v25, 16  ;;  %v1964_v37 = vshll.u32 %v2561_v25, 16 }
  0x6b   : > { %2807 = vmatpush3.bf16.msra.mxu1 %v3101_v14  ;;  %v3121_v14 = vld [vmem:[%s3531_s1 + $0x200] sm:$0xff]  }
  0x6c   : > { %2903 = vmatpush3.bf16.msra.mxu0 %v3102_v18  ;;  %2808 = vmatprep.subr.bf16.mxu1 %v3103_v35  ;;  %v2556_v18 = vld [vmem:[%s3205_s11 + $0x14] sm:$0x1]  ;;  %v1963_v47 = vrot.slane %v1961_v36, 4  ;;  %v1966_v48 = vrot.slane %v1964_v37, 5 }
  0x6d   : > { %2904 = vmatprep.subr.bf16.mxu0 %v3104_v41  ;;  %v1928_v24 = vshll.u32 %v2556_v18, 16  ;;  %v3131_v37 = vld [vmem:[%s3531_s1 + $0x230] sm:$0xff]  }
  0x6e   : > { %2801 = vmatmul.mubr.bf16.gmra.mrb[4].mxu1 %v2356_v6  ;;  %v1967_v55 = vor.u32 %v1966_v48, %v1963_v47  ;;  %v2567_v6 = vld [vmem:[%s3205_s11 + $0x40] sm:$0xf] }
  0x6f   : > { %2809 = vmatpush3.bf16.msra.mxu1 %v3103_v35  ;;  %2897 = vmatmul.mubr.bf16.gmra.mrb[4].mxu0 %v3113_v58  ;;  %v1911_v35 = vor.u32 %v1910_v27, %v1907_v26  ;;  %v1930_v46 = vrot.slane %v1928_v24, 5 }
  0x70   : > { %2905 = vmatpush3.bf16.msra.mxu0 %v3104_v41  ;;  %2810 = vmatprep.subr.bf16.mxu1 %v3105_v50  ;;  %v1975_v41 = vshrl.u32 %v2563_v29, 16  ;;  %v1968_v60 = vrot.slane %v1967_v55, 4 }
  0x71   : > { %2906 = vmatprep.subr.bf16.mxu0 %v3106_v61  ;;  %2916 = vmatprep.mubr.bf16.mxu0 %v3118_v4  ;;  %v1931_v63 = vsel %vm3276_vm2, %v1926_v51, %v1930_v46  ;;  %v3132_v46 = vld [vmem:[%s3531_s1 + $0x238] sm:$0xff]  }
  0x72   : > { %2820 = vmatprep.mubr.bf16.mxu1 %v3117_v7  ;;  %v1977_v52 = vrot.slane %v1975_v41, 4  ;;  %v1973_v2 = vsel %vm3276_vm2, %v1968_v60, %v1972_v56  ;;  %v1956_v41 = vshll.u32 %v2560_v32, 16 }
  0x73   : > { %2811 = vmatpush3.bf16.msra.mxu1 %v3105_v50  ;;  %v1912_v50 = vrot.slane %v1911_v35, 4 }
  0x74   : > { %2907 = vmatpush3.bf16.msra.mxu0 %v3106_v61  ;;  %2812 = vmatprep.subr.bf16.mxu1 %v3107_v1  ;;  %v1981_v58 = vor.u32 %v1980_v54, %v1977_v52  ;;  %v3125_v61 = vld [vmem:[%s3205_s11 + $0xc0] ss:$8 sps:$4 sm:$0xff]  }
  0x75   : > { %2908 = vmatprep.subr.bf16.mxu0 %v3108_v5  ;;  %v1917_v62 = vsel %vm3276_vm2, %v1912_v50, %v1916_v45  ;;  %v1958_v50 = vrot.slane %v1956_v41, 5 }
  0x76   : > { %v1982_v0 = vrot.slane %v1981_v58, 4  ;;  %v2585_v7 = vcombine.low %v1917_v62, %v1931_v63 }
  0x77   : > { %2813 = vmatpush3.bf16.msra.mxu1 %v3107_v1  ;;  %v3126_v1 = vld [vmem:[%s3205_s11 + $0x80] ss:$8 sps:$4 sm:$0xff]  }
  0x78   : > { %2909 = vmatpush3.bf16.msra.mxu0 %v3108_v5  ;;  %2814 = vmatprep.subr.bf16.mxu1 %v3109_v8  ;;  %v1987_v4 = vsel %vm3276_vm2, %v1982_v0, %v1986_v59  ;;  %v2565_v5 = vld [vmem:[%s3205_s11 + $0x38] sm:$0xf] }
  0x79   : > { %2910 = vmatprep.subr.bf16.mxu0 %v3110_v9 }
  0x7b   : > { %2815 = vmatpush3.bf16.msra.mxu1 %v3109_v8  ;;  %v2557_v8 = vld [vmem:[%s3205_s11 + $0x18] sm:$0xf] }
  0x7c   : > { %2911 = vmatpush3.bf16.msra.mxu0 %v3110_v9  ;;  %2816 = vmatprep.subr.bf16.mxu1 %v3112_v10  ;;  %v2559_v9 = vld [vmem:[%s3205_s11 + $0x20] sm:$0xf]  ;;  %v1933_v16 = vshrl.u32 %v2557_v8, 16  ;;  %v1936_v17 = vshll.u32 %v2557_v8, 16 }
  0x7d   : > { %2912 = vmatprep.subr.bf16.mxu0 %v3114_v11  ;;  %v1947_v18 = vshrl.u32 %v2559_v9, 16  ;;  %v1950_v19 = vshll.u32 %v2559_v9, 16  ;;  %v2597_v9 = vld [vmem:[%s3532_s2] ss:$0 sm:$0xff] }
  0x7e   : > { %v1935_v26 = vrot.slane %v1933_v16, 4  ;;  %v1938_v27 = vrot.slane %v1936_v17, 5 }
  0x7f   : > { %2817 = vmatpush3.bf16.msra.mxu1 %v3112_v10  ;;  %v2587_v10 = vcombine.low %v1973_v2, %v1987_v4  ;;  %v1949_v28 = vrot.slane %v1947_v18, 4  ;;  %v1952_v29 = vrot.slane %v1950_v19, 5 }
  0x80   : > { %2913 = vmatpush3.bf16.msra.mxu0 %v3114_v11  ;;  %2818 = vmatprep.subr.bf16.mxu1 %v3115_v12  ;;  %v1989_v11 = vshrl.u32 %v2565_v5, 16  ;;  %v1939_v38 = vor.u32 %v1938_v27, %v1935_v26 }
  0x81   : > { %2914 = vmatprep.subr.bf16.mxu0 %v3116_v13  ;;  %v1953_v40 = vor.u32 %v1952_v29, %v1949_v28 }
  0x82   : > { %v1991_v22 = vrot.slane %v1989_v11, 4  ;;  %v1940_v47 = vrot.slane %v1939_v38, 4 }
  0x83   : > { %2819 = vmatpush3.bf16.msra.mxu1 %v3115_v12  ;;  %v1992_v12 = vshll.u32 %v2565_v5, 16 }
  0x84   : > { %2915 = vmatpush3.bf16.msra.mxu0 %v3116_v13  ;;  %2948 = vmatprep.subr.bf16.mxu1 %v3121_v14  ;;  %v2003_v13 = vshrl.u32 %v2567_v6, 16 }
  0x85   : > { %2924 = vmatprep.subr.bf16.mxu0 %v3121_v14  ;;  %v1994_v23 = vrot.slane %v1992_v12, 5 }
  0x86   : > { %2821 = vmatmul.mubr.bf16.vlgmr.msra.gmra.mrb[0].mxu1 %v3119_v30  ;;  %v2005_v24 = vrot.slane %v2003_v13, 4  ;;  %v2568_v30 = vld [vmem:[%s3205_s11 + $0x44] sm:$0x1] }
  0x87   : > { %2917 = vmatmul.mubr.bf16.vlgmr.msra.gmra.mrb[0].mxu0 %v3120_v34  ;;  %2956 = vmatpush3.bf16.msra.mxu1 %v3121_v14  ;;  %v1995_v33 = vor.u32 %v1994_v23, %v1991_v22  ;;  %v1998_v34 = vshll.u32 %v2566_v21, 16  ;;  %v2012_v36 = vshll.u32 %v2568_v30, 16 }
  0x88   : > { %2925 = vmatpush3.bf16.msra.mxu0 %v3121_v14  ;;  %2949 = vmatprep.subr.bf16.mxu1 %v3122_v39  ;;  %v2006_v14 = vshll.u32 %v2567_v6, 16 }
  0x89   : > { %2926 = vmatprep.subr.bf16.mxu0 %v3122_v39  ;;  %2824 = vmatprep.mubr.bf16.mxu1 %v3123_v44  ;;  %v1996_v42 = vrot.slane %v1995_v33, 4  ;;  %v2000_v43 = vrot.slane %v1998_v34, 5  ;;  %v2014_v45 = vrot.slane %v2012_v36, 5 }
  0x8a   : > { %2920 = vmatprep.mubr.bf16.mxu0 %v3124_v49  ;;  %v2008_v25 = vrot.slane %v2006_v14, 5  ;;  %v1954_v49 = vrot.slane %v1953_v40, 4 }
  0x8b   : > { %2957 = vmatpush3.bf16.msra.mxu1 %v3122_v39  ;;  %v2001_v51 = vsel %vm3276_vm2, %v1996_v42, %v2000_v43 }
  0x8c   : > { %2927 = vmatpush3.bf16.msra.mxu0 %v3122_v39  ;;  %2950 = vmatprep.subr.bf16.mxu1 %v3127_v57  ;;  %v2009_v35 = vor.u32 %v2008_v25, %v2005_v24  ;;  %v1942_v39 = vshll.u32 %v2558_v31, 16  ;;  %v1959_v55 = vsel %vm3276_vm2, %v1954_v49, %v1958_v50 }
  0x8d   : > { %2928 = vmatprep.subr.bf16.mxu0 %v3127_v57 }
  0x8e   : > { %2825 = vmatmul.mubr.bf16.gmra.mrb[4].mxu1 %v3125_v61  ;;  %v2010_v44 = vrot.slane %v2009_v35, 4  ;;  %v1944_v48 = vrot.slane %v1942_v39, 5 }
  0x8f   : > { %2921 = vmatmul.mubr.bf16.gmra.mrb[4].mxu0 %v3126_v1  ;;  %2958 = vmatpush3.bf16.msra.mxu1 %v3127_v57 }
  0x90   : > { %2929 = vmatpush3.bf16.msra.mxu0 %v3127_v57  ;;  %2951 = vmatprep.subr.bf16.mxu1 %v3128_v3  ;;  %v2015_v52 = vsel %vm3276_vm2, %v2010_v44, %v2014_v45  ;;  %v1945_v54 = vsel %vm3276_vm2, %v1940_v47, %v1944_v48 }
  0x91   : > { %2930 = vmatprep.subr.bf16.mxu0 %v3128_v3  ;;  %2940 = vmatprep.mubr.bf16.mxu0 %v2585_v7  ;;  %v2588_v56 = vcombine.low %v2001_v51, %v2015_v52  ;;  %v2586_v57 = vcombine.low %v1945_v54, %v1959_v55 }
  0x92   : > { %2944 = vmatprep.mubr.bf16.mxu1 %v2587_v10 }
  0x93   : > { %2959 = vmatpush3.bf16.msra.mxu1 %v3128_v3 }
  0x94   : > { %2931 = vmatpush3.bf16.msra.mxu0 %v3128_v3  ;;  %2952 = vmatprep.subr.bf16.mxu1 %v3129_v15 }
  0x95   : > { %2932 = vmatprep.subr.bf16.mxu0 %v3129_v15 }
  0x97   : > { %2960 = vmatpush3.bf16.msra.mxu1 %v3129_v15 }
  0x98   : > { %2933 = vmatpush3.bf16.msra.mxu0 %v3129_v15  ;;  %2953 = vmatprep.subr.bf16.mxu1 %v3130_v20 }
  0x99   : > { %2934 = vmatprep.subr.bf16.mxu0 %v3130_v20 }
  0x9b   : > { %2961 = vmatpush3.bf16.msra.mxu1 %v3130_v20 }
  0x9c   : > { %2935 = vmatpush3.bf16.msra.mxu0 %v3130_v20  ;;  %2954 = vmatprep.subr.bf16.mxu1 %v3131_v37 }
  0x9d   : > { %2936 = vmatprep.subr.bf16.mxu0 %v3131_v37 }
  0x9f   : > { %2962 = vmatpush3.bf16.msra.mxu1 %v3131_v37 }
  0xa0   : > { %2937 = vmatpush3.bf16.msra.mxu0 %v3131_v37  ;;  %2955 = vmatprep.subr.bf16.mxu1 %v3132_v46 }
  0xa1   : > { %2938 = vmatprep.subr.bf16.mxu0 %v3132_v46 }
  0xa3   : > { %2963 = vmatpush3.bf16.msra.mxu1 %v3132_v46 }
  0xa4   : > { %2939 = vmatpush3.bf16.msra.mxu0 %v3132_v46 }
  0xa6   : > { %2945 = vmatmul.mubr.bf16.vlgmr.msra.gmra.mrb[8].mxu1 %v2588_v56 }
  0xa7   : > { %2941 = vmatmul.mubr.bf16.vlgmr.msra.gmra.mrb[0].mxu0 %v2586_v57 }
 0x159   : > { %v2822_v58 = vpop.f32.mrb[0].mxu1 }
 0x15a   : > { %v974_v59 = vpop.f32.mrb[1].mxu1 }
 0x15b   : > { %v2823_v60 = vpop.f32.mrb[2].mxu1 }
 0x15c   : > { %v977_v61 = vpop.f32.mrb[3].mxu1 }
 0x161   : > { %v2826_v62 = vpop.f32.mrb[4].mxu1 }
 0x162   : > { %v2922_v63 = vpop.f32.mrb[4].mxu0  ;;  %v990_v0 = vpop.f32.mrb[5].mxu1 }
 0x163   : > { %v2968_v1 = vadd.f32 %v2922_v63, %v2826_v62  ;;  %v1849_v2 = vpop.f32.mrb[5].mxu0  ;;  %v2827_v53 = vpop.f32.mrb[6].mxu1 }
 0x164   : > { %v2970_v3 = vadd.f32 %v1849_v2, %v990_v0  ;;  %v2923_v4 = vpop.f32.mrb[6].mxu0  ;;  %v993_v5 = vpop.f32.mrb[7].mxu1 }
 0x165   : > { %v2972_v6 = vadd.f32 %v2923_v4, %v2827_v53  ;;  %v1852_v7 = vpop.f32.mrb[7].mxu0 }
 0x166   : > { %v2974_v8 = vadd.f32 %v1852_v7, %v993_v5 }
 0x179   : > { %v2946_v10 = vpop.f32.mrb[8].mxu1 }
 0x17a   : > { %v2942_v11 = vpop.f32.mrb[0].mxu0  ;;  %v2969_v12 = vadd.f32 %v2968_v1, %v2946_v10  ;;  %v2147_v13 = vpop.f32.mrb[9].mxu1 }
 0x17b   : > { %v2964_v14 = vadd.f32 %v2942_v11, %v2822_v58  ;;  %v2131_v15 = vpop.f32.mrb[1].mxu0  ;;  %v2971_v16 = vadd.f32 %v2970_v3, %v2147_v13  ;;  %v2947_v17 = vpop.f32.mrb[10].mxu1 }
 0x17c   : > { %v2199_v18 = vadd.f32 %v2969_v12, %v2597_v9  ;;  %v2965_v19 = vadd.f32 %v2131_v15, %v974_v59  ;;  %v2943_v20 = vpop.f32.mrb[2].mxu0  ;;  %v2973_v21 = vadd.f32 %v2972_v6, %v2947_v17  ;;  %v2150_v22 = vpop.f32.mrb[11].mxu1 }
 0x17d   : > { %v2195_v23 = vadd.f32 %v2964_v14, %v2597_v9  ;;  %v2197_v24 = vadd.f32 %v2971_v16, %v2597_v9  ;;  %v2966_v25 = vadd.f32 %v2943_v20, %v2823_v60  ;;  %v2134_v26 = vpop.f32.mrb[3].mxu0  ;;  %v2975_v27 = vadd.f32 %v2974_v8, %v2150_v22 }
 0x17e   : > { %v2193_v28 = vadd.f32 %v2965_v19, %v2597_v9  ;;  %v2200_v29 = vadd.f32 %v2973_v21, %v2597_v9  ;;  %v2967_v30 = vadd.f32 %v2134_v26, %v977_v61  ;;  %v2207_v33 = vmax.f32 %v2199_v18, 0.0 }
 0x17f   : > { %v2196_v31 = vadd.f32 %v2966_v25, %v2597_v9  ;;  %v2198_v32 = vadd.f32 %v2975_v27, %v2597_v9  ;;  %v2203_v36 = vmax.f32 %v2195_v23, 0.0  ;;  %v2205_v37 = vmax.f32 %v2197_v24, 0.0 }
 0x180   : > { %v2208_v34 = vmax.f32 %v2200_v29, 0.0  ;;  %v2194_v35 = vadd.f32 %v2967_v30, %v2597_v9  ;;  %v2201_v40 = vmax.f32 %v2193_v28, 0.0 }
 0x181   : > { %v2204_v38 = vmax.f32 %v2196_v31, 0.0  ;;  %v2206_v39 = vmax.f32 %v2198_v32, 0.0 }
 0x182   : > { %v2619_v41 = vpack.c.bf16 %v2208_v34, %v2207_v33  ;;  %v2202_v42 = vmax.f32 %v2194_v35, 0.0 }
 0x183   : > { %v2609_v43 = vpack.c.bf16 %v2204_v38, %v2203_v36  ;;  %v2614_v44 = vpack.c.bf16 %v2206_v39, %v2205_v37 }
 0x184   : > { %2623 = vst [vmem:[%s175_s22 + $0x18] sm:$0xff] %v2619_v41   ;;  %v2604_v45 = vpack.c.bf16 %v2202_v42, %v2201_v40 }
 0x185   : > { %2621 = vst [vmem:[%s175_s22 + $0x8] sm:$0xff] %v2609_v43   ;;  %2622 = vst [vmem:[%s175_s22 + $0x10] sm:$0xff] %v2614_v44  }
 0x186   : > { %2605 = vst [vmem:[%s175_s22] sm:$0xff] %v2604_v45  }
 0x187 PF: > { %s13_s12 = sadd.s32 1, %s3139_s12  }
 0x188   : > { %p10_p5 = scmp.ge.s32.totalorder %s13_s12, 10  }
 0x18a   :  { %12 = sbr.rel (!%p10_p5) target bundleno = 1 (0x1), region = 75 }

// kernel: res_block_forward.6
= control target key start
LH: loop header
LB: loop body
LE: loop exit
PB: predicated region body
PF: predicated region fallthrough
CT: control target
= control target key end

     0   :  { %s1467_s12 = smov 0   ;;  %s1469_s13 = smov 0   ;;  %s1604_s0 = inlined_call_operand.vmem [shape: bf16[512,128], index: 0, kind: input, shape index: {}]   ;;  %s1605_s1 = inlined_call_operand.vmem [shape: bf16[128,128], index: 1, kind: input, shape index: {}]   ;;  %s1606_s2 = inlined_call_operand.vmem [shape: f32[1,128], index: 2, kind: input, shape index: {}]   ;;  %s1607_s3 = inlined_call_operand.vmem [shape: bf16[512,128], index: 3, kind: output, shape index: {}]  }
   0x1   :  { %s1471_s14 = smov 0  }
   0x2 LB: > { %s32_s15 = sadd.s32 1, %s1441_s13  ;;  %p1096_p0 = scmp.ge.s32.totalorder %s1445_s14, 1  ;;  %s1445_s14 = sphi %s1471_s14, %s13_s14   ;;  %s1441_s13 = sphi %s1469_s13, %s1609_s13   ;;  %s1437_s12 = sphi %s1467_s12, %s1608_s12  }
   0x3   : > { %p34_p1 = scmp.ge.s32.totalorder %s32_s15, 2  ;;  %p188_p2 = scmp.lt.s32.totalorder %s1445_s14, 3 }
   0x5   : > { %s1611_s15 = smov (%p34_p1, %s32_s15), 0  ;;  %p189_p3 = pnand %p1096_p0, %p188_p2 }
   0x6   : > { %v1399_v0 = vld [vmem:[%s1605_s1] sm:$0xff] (!%p189_p3)   ;;  %s1097_s18 = sshll.u32 (!%p189_p3), %s1437_s12, 5  ;;  %v1400_v1 = vld [vmem:[%s1605_s1 + $0x8] sm:$0xff] (!%p189_p3)   ;;  %v1401_v2 = vld [vmem:[%s1605_s1 + $0x10] sm:$0xff] (!%p189_p3)  }
   0x7   : > { %192 = sbr.rel (%p189_p3) target bundleno = 283 (0x11b), region = 32  ;;  %p230_p4 = scmp.lt.s32.totalorder (!%p189_p3), %s1097_s18, 63  ;;  %1311 = vmatprep.subr.bf16.mxu0 (!%p189_p3), %v1399_v0  ;;  %1359 = vmatprep.subr.bf16.mxu1 (!%p189_p3), %v1399_v0  ;;  %v1402_v3 = vld [vmem:[%s1605_s1 + $0x18] sm:$0xff] (!%p189_p3)   ;;  %v1403_v6 = vld [vmem:[%s1605_s1 + $0x20] sm:$0xff] (!%p189_p3)   ;;  %v1404_v7 = vld [vmem:[%s1605_s1 + $0x28] sm:$0xff] (!%p189_p3)  }
   0x8   : > { %1312 = vmatpush3.bf16.msra.mxu0 (!%p189_p3), %v1399_v0  ;;  %1367 = vmatpush3.bf16.msra.mxu1 (!%p189_p3), %v1399_v0  ;;  %v1405_v8 = vld [vmem:[%s1605_s1 + $0x30] sm:$0xff] (!%p189_p3)   ;;  %v1406_v9 = vld [vmem:[%s1605_s1 + $0x38] sm:$0xff] (!%p189_p3)   ;;  %v1538_v25 = vld [vmem:[%s1606_s2] ss:$0 sm:$0xff] (!%p189_p3) }
   0x9   : > { %1313 = vmatprep.subr.bf16.mxu0 (!%p189_p3), %v1400_v1  ;;  %1360 = vmatprep.subr.bf16.mxu1 (!%p189_p3), %v1400_v1 }
   0xc   : > { %1314 = vmatpush3.bf16.msra.mxu0 (!%p189_p3), %v1400_v1  ;;  %1368 = vmatpush3.bf16.msra.mxu1 (!%p189_p3), %v1400_v1 }
   0xd   : > { %1315 = vmatprep.subr.bf16.mxu0 (!%p189_p3), %v1401_v2  ;;  %1361 = vmatprep.subr.bf16.mxu1 (!%p189_p3), %v1401_v2 }
   0xe   : > { %s1613_s18 = smov (!%p230_p4, %s1097_s18), 63 }
   0xf   : > { %s1098_s23 = sshll.u32 %s1613_s18, 2 }
  0x10   : > { %s1502_s26 = scalar_lea.vmem %s1604_s0, %s1098_s23  ;;  %1316 = vmatpush3.bf16.msra.mxu0 %v1401_v2  ;;  %1369 = vmatpush3.bf16.msra.mxu1 %v1401_v2  ;;  %s1551_s17 = scalar_lea.vmem %s1607_s3, %s1098_s23 }
  0x11   : > { %v1407_v4 = vld [vmem:[%s1502_s26] sm:$0xff]   ;;  %1317 = vmatprep.subr.bf16.mxu0 %v1402_v3  ;;  %1362 = vmatprep.subr.bf16.mxu1 %v1402_v3  ;;  %v1409_v10 = vld [vmem:[%s1502_s26 + $0x8] sm:$0xff]   ;;  %v1411_v12 = vld [vmem:[%s1502_s26 + $0x10] sm:$0xff]  }
  0x12   : > { %v1408_v5 = vld [vmem:[%s1502_s26 + $0x40] sm:$0xff]   ;;  %1327 = vmatprep.mubr.bf16.mxu0 %v1407_v4  ;;  %v1410_v11 = vld [vmem:[%s1502_s26 + $0x48] sm:$0xff]   ;;  %v1412_v13 = vld [vmem:[%s1502_s26 + $0x50] sm:$0xff]  }
  0x13   : > { %1343 = vmatprep.mubr.bf16.mxu1 %v1408_v5  ;;  %v1413_v14 = vld [vmem:[%s1502_s26 + $0x18] sm:$0xff]   ;;  %v1415_v16 = vld [vmem:[%s1502_s26 + $0x20] sm:$0xff]   ;;  %v1417_v18 = vld [vmem:[%s1502_s26 + $0x28] sm:$0xff]  }
  0x14   : > { %1318 = vmatpush3.bf16.msra.mxu0 %v1402_v3  ;;  %1370 = vmatpush3.bf16.msra.mxu1 %v1402_v3  ;;  %v1414_v15 = vld [vmem:[%s1502_s26 + $0x58] sm:$0xff]   ;;  %v1416_v17 = vld [vmem:[%s1502_s26 + $0x60] sm:$0xff]   ;;  %v1418_v19 = vld [vmem:[%s1502_s26 + $0x68] sm:$0xff]  }
  0x15   : > { %1319 = vmatprep.subr.bf16.mxu0 %v1403_v6  ;;  %1363 = vmatprep.subr.bf16.mxu1 %v1403_v6  ;;  %v1419_v20 = vld [vmem:[%s1502_s26 + $0x30] sm:$0xff]   ;;  %v1421_v22 = vld [vmem:[%s1502_s26 + $0x38] sm:$0xff]  }
  0x16   : > { %v1420_v21 = vld [vmem:[%s1502_s26 + $0x70] sm:$0xff]   ;;  %v1422_v23 = vld [vmem:[%s1502_s26 + $0x78] sm:$0xff]  }
  0x18   : > { %1320 = vmatpush3.bf16.msra.mxu0 %v1403_v6  ;;  %1371 = vmatpush3.bf16.msra.mxu1 %v1403_v6 }
  0x19   : > { %1321 = vmatprep.subr.bf16.mxu0 %v1404_v7  ;;  %1364 = vmatprep.subr.bf16.mxu1 %v1404_v7 }
  0x1c   : > { %1322 = vmatpush3.bf16.msra.mxu0 %v1404_v7  ;;  %1372 = vmatpush3.bf16.msra.mxu1 %v1404_v7 }
  0x1d   : > { %1323 = vmatprep.subr.bf16.mxu0 %v1405_v8  ;;  %1365 = vmatprep.subr.bf16.mxu1 %v1405_v8 }
  0x20   : > { %1324 = vmatpush3.bf16.msra.mxu0 %v1405_v8  ;;  %1373 = vmatpush3.bf16.msra.mxu1 %v1405_v8 }
  0x21   : > { %1325 = vmatprep.subr.bf16.mxu0 %v1406_v9  ;;  %1366 = vmatprep.subr.bf16.mxu1 %v1406_v9 }
  0x24   : > { %1326 = vmatpush3.bf16.msra.mxu0 %v1406_v9  ;;  %1374 = vmatpush3.bf16.msra.mxu1 %v1406_v9 }
  0x27   : > { %1328 = vmatmul.mubr.bf16.vlgmr.msra.gmra.mrb[0].mxu0 %v1409_v10  ;;  %1344 = vmatmul.mubr.bf16.vlgmr.msra.gmra.mrb[0].mxu1 %v1410_v11 }
  0x28   : > { %1331 = vmatprep.mubr.bf16.mxu0 %v1411_v12  ;;  %1347 = vmatprep.mubr.bf16.mxu1 %v1412_v13 }
  0x2f   : > { %1332 = vmatmul.mubr.bf16.gmra.mrb[4].mxu0 %v1413_v14  ;;  %1348 = vmatmul.mubr.bf16.gmra.mrb[4].mxu1 %v1414_v15 }
  0x30   : > { %1335 = vmatprep.mubr.bf16.mxu0 %v1415_v16  ;;  %1351 = vmatprep.mubr.bf16.mxu1 %v1416_v17 }
  0x37   : > { %1336 = vmatmul.mubr.bf16.gmra.mrb[8].mxu0 %v1417_v18  ;;  %1352 = vmatmul.mubr.bf16.gmra.mrb[8].mxu1 %v1418_v19 }
  0x38   : > { %1339 = vmatprep.mubr.bf16.mxu0 %v1419_v20  ;;  %1355 = vmatprep.mubr.bf16.mxu1 %v1420_v21 }
  0x3f   : > { %1340 = vmatmul.mubr.bf16.gmra.mrb[12].mxu0 %v1421_v22  ;;  %1356 = vmatmul.mubr.bf16.gmra.mrb[12].mxu1 %v1422_v23 }
  0xfa   : > { %v1329_v24 = vpop.f32.mrb[0].mxu0  ;;  %v1345_v26 = vpop.f32.mrb[0].mxu1 }
  0xfb   : > { %v554_v27 = vpop.f32.mrb[1].mxu0  ;;  %v618_v28 = vpop.f32.mrb[1].mxu1  ;;  %v789_v31 = vadd.f32 %v1329_v24, %v1538_v25  ;;  %v805_v32 = vadd.f32 %v1345_v26, %v1538_v25 }
  0xfc   : > { %v1330_v29 = vpop.f32.mrb[2].mxu0  ;;  %v1346_v30 = vpop.f32.mrb[2].mxu1  ;;  %v787_v37 = vadd.f32 %v1538_v25, %v554_v27  ;;  %v803_v38 = vadd.f32 %v1538_v25, %v618_v28 }
  0xfd   : > { %v790_v33 = vadd.f32 %v1330_v29, %v1538_v25  ;;  %v806_v34 = vadd.f32 %v1346_v30, %v1538_v25  ;;  %v557_v35 = vpop.f32.mrb[3].mxu0  ;;  %v621_v36 = vpop.f32.mrb[3].mxu1 }
  0xfe   : > { %v788_v39 = vadd.f32 %v1538_v25, %v557_v35  ;;  %v804_v40 = vadd.f32 %v1538_v25, %v621_v36 }
  0xff   : > { %v1200_v41 = vpack.c.bf16 %v790_v33, %v789_v31  ;;  %v1240_v42 = vpack.c.bf16 %v806_v34, %v805_v32 }
 0x100   : > { %v1195_v43 = vpack.c.bf16 %v788_v39, %v787_v37  ;;  %v1235_v44 = vpack.c.bf16 %v804_v40, %v803_v38 }
 0x101   : > { %1272 = vst [vmem:[%s1551_s17 + $0x8] sm:$0xff] %v1200_v41   ;;  %1280 = vst [vmem:[%s1551_s17 + $0x48] sm:$0xff] %v1240_v42  }
 0x102   : > { %1196 = vst [vmem:[%s1551_s17] sm:$0xff] %v1195_v43   ;;  %1279 = vst [vmem:[%s1551_s17 + $0x40] sm:$0xff] %v1235_v44   ;;  %v1333_v45 = vpop.f32.mrb[4].mxu0  ;;  %v1349_v46 = vpop.f32.mrb[4].mxu1 }
 0x103   : > { %v570_v47 = vpop.f32.mrb[5].mxu0  ;;  %v634_v48 = vpop.f32.mrb[5].mxu1  ;;  %v793_v51 = vadd.f32 %v1333_v45, %v1538_v25  ;;  %v809_v52 = vadd.f32 %v1349_v46, %v1538_v25 }
 0x104   : > { %v1334_v49 = vpop.f32.mrb[6].mxu0  ;;  %v1350_v50 = vpop.f32.mrb[6].mxu1  ;;  %v791_v57 = vadd.f32 %v1538_v25, %v570_v47  ;;  %v807_v58 = vadd.f32 %v1538_v25, %v634_v48 }
 0x105   : > { %v794_v53 = vadd.f32 %v1334_v49, %v1538_v25  ;;  %v810_v54 = vadd.f32 %v1350_v50, %v1538_v25  ;;  %v573_v55 = vpop.f32.mrb[7].mxu0  ;;  %v637_v56 = vpop.f32.mrb[7].mxu1 }
 0x106   : > { %v792_v59 = vadd.f32 %v1538_v25, %v573_v55  ;;  %v808_v60 = vadd.f32 %v1538_v25, %v637_v56 }
 0x107   : > { %v1210_v61 = vpack.c.bf16 %v794_v53, %v793_v51  ;;  %v1250_v62 = vpack.c.bf16 %v810_v54, %v809_v52 }
 0x108   : > { %v1205_v63 = vpack.c.bf16 %v792_v59, %v791_v57  ;;  %v1245_v0 = vpack.c.bf16 %v808_v60, %v807_v58 }
 0x109   : > { %1274 = vst [vmem:[%s1551_s17 + $0x18] sm:$0xff] %v1210_v61   ;;  %1282 = vst [vmem:[%s1551_s17 + $0x58] sm:$0xff] %v1250_v62  }
 0x10a   : > { %1273 = vst [vmem:[%s1551_s17 + $0x10] sm:$0xff] %v1205_v63   ;;  %1281 = vst [vmem:[%s1551_s17 + $0x50] sm:$0xff] %v1245_v0   ;;  %v1337_v1 = vpop.f32.mrb[8].mxu0  ;;  %v1353_v2 = vpop.f32.mrb[8].mxu1 }
 0x10b   : > { %v586_v3 = vpop.f32.mrb[9].mxu0  ;;  %v650_v4 = vpop.f32.mrb[9].mxu1  ;;  %v797_v7 = vadd.f32 %v1337_v1, %v1538_v25  ;;  %v813_v8 = vadd.f32 %v1353_v2, %v1538_v25 }
 0x10c   : > { %v1338_v5 = vpop.f32.mrb[10].mxu0  ;;  %v1354_v6 = vpop.f32.mrb[10].mxu1  ;;  %v795_v13 = vadd.f32 %v1538_v25, %v586_v3  ;;  %v811_v14 = vadd.f32 %v1538_v25, %v650_v4 }
 0x10d   : > { %v798_v9 = vadd.f32 %v1338_v5, %v1538_v25  ;;  %v814_v10 = vadd.f32 %v1354_v6, %v1538_v25  ;;  %v589_v11 = vpop.f32.mrb[11].mxu0  ;;  %v653_v12 = vpop.f32.mrb[11].mxu1 }
 0x10e   : > { %v796_v15 = vadd.f32 %v1538_v25, %v589_v11  ;;  %v812_v16 = vadd.f32 %v1538_v25, %v653_v12 }
 0x10f   : > { %v1220_v17 = vpack.c.bf16 %v798_v9, %v797_v7  ;;  %v1260_v18 = vpack.c.bf16 %v814_v10, %v813_v8 }
 0x110   : > { %v1215_v19 = vpack.c.bf16 %v796_v15, %v795_v13  ;;  %v1255_v20 = vpack.c.bf16 %v812_v16, %v811_v14 }
 0x111   : > { %1276 = vst [vmem:[%s1551_s17 + $0x28] sm:$0xff] %v1220_v17   ;;  %1284 = vst [vmem:[%s1551_s17 + $0x68] sm:$0xff] %v1260_v18  }
 0x112   : > { %1275 = vst [vmem:[%s1551_s17 + $0x20] sm:$0xff] %v1215_v19   ;;  %1283 = vst [vmem:[%s1551_s17 + $0x60] sm:$0xff] %v1255_v20   ;;  %v1341_v21 = vpop.f32.mrb[12].mxu0  ;;  %v1357_v22 = vpop.f32.mrb[12].mxu1 }
 0x113   : > { %v602_v23 = vpop.f32.mrb[13].mxu0  ;;  %v666_v24 = vpop.f32.mrb[13].mxu1  ;;  %v801_v28 = vadd.f32 %v1341_v21, %v1538_v25  ;;  %v817_v29 = vadd.f32 %v1357_v22, %v1538_v25 }
 0x114   : > { %v1342_v26 = vpop.f32.mrb[14].mxu0  ;;  %v1358_v27 = vpop.f32.mrb[14].mxu1  ;;  %v799_v34 = vadd.f32 %v1538_v25, %v602_v23  ;;  %v815_v35 = vadd.f32 %v1538_v25, %v666_v24 }
 0x115   : > { %v802_v30 = vadd.f32 %v1342_v26, %v1538_v25  ;;  %v818_v31 = vadd.f32 %v1358_v27, %v1538_v25  ;;  %v605_v32 = vpop.f32.mrb[15].mxu0  ;;  %v669_v33 = vpop.f32.mrb[15].mxu1 }
 0x116   : > { %v800_v36 = vadd.f32 %v1538_v25, %v605_v32  ;;  %v816_v37 = vadd.f32 %v1538_v25, %v669_v33 }
 0x117   : > { %v1230_v38 = vpack.c.bf16 %v802_v30, %v801_v28  ;;  %v1270_v39 = vpack.c.bf16 %v818_v31, %v817_v29 }
 0x118   : > { %v1225_v40 = vpack.c.bf16 %v800_v36, %v799_v34  ;;  %v1265_v41 = vpack.c.bf16 %v816_v37, %v815_v35 }
 0x119   : > { %1278 = vst [vmem:[%s1551_s17 + $0x38] sm:$0xff] %v1230_v38   ;;  %1286 = vst [vmem:[%s1551_s17 + $0x78] sm:$0xff] %v1270_v39  }
 0x11a   : > { %1277 = vst [vmem:[%s1551_s17 + $0x30] sm:$0xff] %v1225_v40   ;;  %1285 = vst [vmem:[%s1551_s17 + $0x70] sm:$0xff] %v1265_v41  }
 0x11b PF: > { %s13_s14 = sadd.s32 1, %s1445_s14   ;;  %s1608_s12 = smov %s1441_s13 }
 0x11c   : > { %p10_p5 = scmp.ge.s32.totalorder %s13_s14, 4   ;;  %s1609_s13 = smov %s1611_s15 }
 0x11e   :  { %12 = sbr.rel (!%p10_p5) target bundleno = 2 (0x2), region = 76 }

// kernel: res_block_forward.7
= control target key start
LH: loop header
LB: loop body
LE: loop exit
PB: predicated region body
PF: predicated region fallthrough
CT: control target
= control target key end

     0   :  { %s1469_s15 = smov 0   ;;  %s1471_s16 = smov 0   ;;  %s1644_s0 = inlined_call_operand.vmem [shape: bf16[512,128], index: 0, kind: input, shape index: {}]   ;;  %s1645_s1 = inlined_call_operand.vmem [shape: bf16[128,128], index: 1, kind: input, shape index: {}]   ;;  %s1646_s2 = inlined_call_operand.vmem [shape: f32[1,128], index: 2, kind: input, shape index: {}]   ;;  %s1647_s3 = inlined_call_operand.vmem [shape: bf16[512,128], index: 3, kind: input, shape index: {}]   ;;  %s1648_s4 = inlined_call_operand.vmem [shape: f32[512,128], index: 4, kind: output, shape index: {}]  }
   0x1   :  { %s1473_s17 = smov 0  }
   0x2 LB: > { %s33_s18 = sadd.s32 1, %s1438_s16  ;;  %p1171_p0 = scmp.ge.s32.totalorder %s1442_s17, 1  ;;  %s1442_s17 = sphi %s1473_s17, %s14_s17   ;;  %s1438_s16 = sphi %s1471_s16, %s1650_s16   ;;  %s1434_s15 = sphi %s1469_s15, %s1649_s15  }
   0x3   : > { %p35_p1 = scmp.ge.s32.totalorder %s33_s18, 2  ;;  %p229_p2 = scmp.lt.s32.totalorder %s1442_s17, 3 }
   0x5   : > { %s1652_s18 = smov (%p35_p1, %s33_s18), 0  ;;  %p230_p3 = pnand %p1171_p0, %p229_p2 }
   0x6   : > { %v1396_v0 = vld [vmem:[%s1645_s1] sm:$0xff] (!%p230_p3)   ;;  %s1172_s21 = sshll.u32 (!%p230_p3), %s1434_s15, 5  ;;  %v1397_v1 = vld [vmem:[%s1645_s1 + $0x8] sm:$0xff] (!%p230_p3)   ;;  %v1398_v2 = vld [vmem:[%s1645_s1 + $0x10] sm:$0xff] (!%p230_p3)  }
   0x7   : > { %233 = sbr.rel (%p230_p3) target bundleno = 285 (0x11d), region = 36  ;;  %p281_p4 = scmp.lt.s32.totalorder (!%p230_p3), %s1172_s21, 63  ;;  %1308 = vmatprep.subr.bf16.mxu0 (!%p230_p3), %v1396_v0  ;;  %1356 = vmatprep.subr.bf16.mxu1 (!%p230_p3), %v1396_v0  ;;  %v1399_v3 = vld [vmem:[%s1645_s1 + $0x18] sm:$0xff] (!%p230_p3)   ;;  %v1400_v6 = vld [vmem:[%s1645_s1 + $0x20] sm:$0xff] (!%p230_p3)   ;;  %v1401_v7 = vld [vmem:[%s1645_s1 + $0x28] sm:$0xff] (!%p230_p3)  }
   0x8   : > { %1309 = vmatpush3.bf16.msra.mxu0 (!%p230_p3), %v1396_v0  ;;  %1364 = vmatpush3.bf16.msra.mxu1 (!%p230_p3), %v1396_v0  ;;  %v1402_v8 = vld [vmem:[%s1645_s1 + $0x30] sm:$0xff] (!%p230_p3)   ;;  %v1403_v9 = vld [vmem:[%s1645_s1 + $0x38] sm:$0xff] (!%p230_p3)   ;;  %v1551_v28 = vld [vmem:[%s1646_s2] ss:$0 sm:$0xff] (!%p230_p3) }
   0x9   : > { %1310 = vmatprep.subr.bf16.mxu0 (!%p230_p3), %v1397_v1  ;;  %1357 = vmatprep.subr.bf16.mxu1 (!%p230_p3), %v1397_v1 }
   0xc   : > { %1311 = vmatpush3.bf16.msra.mxu0 (!%p230_p3), %v1397_v1  ;;  %1365 = vmatpush3.bf16.msra.mxu1 (!%p230_p3), %v1397_v1 }
   0xd   : > { %1312 = vmatprep.subr.bf16.mxu0 (!%p230_p3), %v1398_v2  ;;  %1358 = vmatprep.subr.bf16.mxu1 (!%p230_p3), %v1398_v2 }
   0xe   : > { %s1654_s21 = smov (!%p281_p4, %s1172_s21), 63 }
   0xf   : > { %s1173_s26 = sshll.u32 %s1654_s21, 2  ;;  %s1177_s23 = sshll.u32 %s1654_s21, 3 }
  0x10   : > { %s1504_s29 = scalar_lea.vmem %s1644_s0, %s1173_s26  ;;  %1313 = vmatpush3.bf16.msra.mxu0 %v1398_v2  ;;  %1366 = vmatpush3.bf16.msra.mxu1 %v1398_v2  ;;  %s1542_s19 = scalar_lea.vmem %s1647_s3, %s1173_s26 }
  0x11   : > { %v1404_v4 = vld [vmem:[%s1504_s29] sm:$0xff]   ;;  %1314 = vmatprep.subr.bf16.mxu0 %v1399_v3  ;;  %1359 = vmatprep.subr.bf16.mxu1 %v1399_v3  ;;  %v1406_v10 = vld [vmem:[%s1504_s29 + $0x8] sm:$0xff]   ;;  %v1408_v12 = vld [vmem:[%s1504_s29 + $0x10] sm:$0xff]   ;;  %s1563_s25 = scalar_lea.vmem %s1648_s4, %s1177_s23 }
  0x12   : > { %v1405_v5 = vld [vmem:[%s1504_s29 + $0x40] sm:$0xff]   ;;  %1324 = vmatprep.mubr.bf16.mxu0 %v1404_v4  ;;  %v1407_v11 = vld [vmem:[%s1504_s29 + $0x48] sm:$0xff]   ;;  %v1409_v13 = vld [vmem:[%s1504_s29 + $0x50] sm:$0xff]  }
  0x13   : > { %1340 = vmatprep.mubr.bf16.mxu1 %v1405_v5  ;;  %v1410_v14 = vld [vmem:[%s1504_s29 + $0x18] sm:$0xff]   ;;  %v1412_v16 = vld [vmem:[%s1504_s29 + $0x20] sm:$0xff]   ;;  %v1414_v18 = vld [vmem:[%s1504_s29 + $0x28] sm:$0xff]  }
  0x14   : > { %1315 = vmatpush3.bf16.msra.mxu0 %v1399_v3  ;;  %1367 = vmatpush3.bf16.msra.mxu1 %v1399_v3  ;;  %v1411_v15 = vld [vmem:[%s1504_s29 + $0x58] sm:$0xff]   ;;  %v1413_v17 = vld [vmem:[%s1504_s29 + $0x60] sm:$0xff]   ;;  %v1415_v19 = vld [vmem:[%s1504_s29 + $0x68] sm:$0xff]  }
  0x15   : > { %1316 = vmatprep.subr.bf16.mxu0 %v1400_v6  ;;  %1360 = vmatprep.subr.bf16.mxu1 %v1400_v6  ;;  %v1416_v20 = vld [vmem:[%s1504_s29 + $0x30] sm:$0xff]   ;;  %v1418_v22 = vld [vmem:[%s1504_s29 + $0x38] sm:$0xff]   ;;  %v1269_v24 = vld [vmem:[%s1542_s19 + $0x8] sm:$0xff]  }
  0x16   : > { %v1417_v21 = vld [vmem:[%s1504_s29 + $0x70] sm:$0xff]   ;;  %v1419_v23 = vld [vmem:[%s1504_s29 + $0x78] sm:$0xff]   ;;  %v1277_v25 = vld [vmem:[%s1542_s19 + $0x48] sm:$0xff]   ;;  %v1211_v29 = vunpack.c.l.bf16 %v1269_v24  ;;  %v1212_v39 = vunpack.c.h.bf16 %v1269_v24 }
  0x17   : > { %v1206_v26 = vld [vmem:[%s1542_s19] sm:$0xff]   ;;  %v1243_v30 = vunpack.c.l.bf16 %v1277_v25  ;;  %v1244_v40 = vunpack.c.h.bf16 %v1277_v25  ;;  %v1271_v57 = vld [vmem:[%s1542_s19 + $0x18] sm:$0xff]   ;;  %v1270_v63 = vld [vmem:[%s1542_s19 + $0x10] sm:$0xff]  }
  0x18   : > { %1317 = vmatpush3.bf16.msra.mxu0 %v1400_v6  ;;  %1368 = vmatpush3.bf16.msra.mxu1 %v1400_v6  ;;  %v1276_v27 = vld [vmem:[%s1542_s19 + $0x40] sm:$0xff]   ;;  %v1207_v33 = vunpack.c.l.bf16 %v1206_v26  ;;  %v1208_v45 = vunpack.c.h.bf16 %v1206_v26  ;;  %v1279_v58 = vld [vmem:[%s1542_s19 + $0x58] sm:$0xff]   ;;  %v1278_v0 = vld [vmem:[%s1542_s19 + $0x50] sm:$0xff]   ;;  %v1216_v25 = vunpack.c.h.bf16 %v1270_v63 }
  0x19   : > { %1318 = vmatprep.subr.bf16.mxu0 %v1401_v7  ;;  %1361 = vmatprep.subr.bf16.mxu1 %v1401_v7  ;;  %v1239_v34 = vunpack.c.l.bf16 %v1276_v27  ;;  %v1240_v46 = vunpack.c.h.bf16 %v1276_v27  ;;  %v1248_v26 = vunpack.c.h.bf16 %v1278_v0 }
  0x1c   : > { %1319 = vmatpush3.bf16.msra.mxu0 %v1401_v7  ;;  %1369 = vmatpush3.bf16.msra.mxu1 %v1401_v7  ;;  %v1219_v7 = vunpack.c.l.bf16 %v1271_v57 }
  0x1d   : > { %1320 = vmatprep.subr.bf16.mxu0 %v1402_v8  ;;  %1362 = vmatprep.subr.bf16.mxu1 %v1402_v8 }
  0x20   : > { %1321 = vmatpush3.bf16.msra.mxu0 %v1402_v8  ;;  %1370 = vmatpush3.bf16.msra.mxu1 %v1402_v8  ;;  %v1251_v8 = vunpack.c.l.bf16 %v1279_v58 }
  0x21   : > { %1322 = vmatprep.subr.bf16.mxu0 %v1403_v9  ;;  %1363 = vmatprep.subr.bf16.mxu1 %v1403_v9 }
  0x24   : > { %1323 = vmatpush3.bf16.msra.mxu0 %v1403_v9  ;;  %1371 = vmatpush3.bf16.msra.mxu1 %v1403_v9 }
  0x27   : > { %1325 = vmatmul.mubr.bf16.vlgmr.msra.gmra.mrb[0].mxu0 %v1406_v10  ;;  %1341 = vmatmul.mubr.bf16.vlgmr.msra.gmra.mrb[0].mxu1 %v1407_v11 }
  0x28   : > { %1328 = vmatprep.mubr.bf16.mxu0 %v1408_v12  ;;  %1344 = vmatprep.mubr.bf16.mxu1 %v1409_v13  ;;  %v1215_v13 = vunpack.c.l.bf16 %v1270_v63 }
  0x2f   : > { %1329 = vmatmul.mubr.bf16.gmra.mrb[4].mxu0 %v1410_v14  ;;  %1345 = vmatmul.mubr.bf16.gmra.mrb[4].mxu1 %v1411_v15  ;;  %v1247_v14 = vunpack.c.l.bf16 %v1278_v0 }
  0x30   : > { %1332 = vmatprep.mubr.bf16.mxu0 %v1412_v16  ;;  %1348 = vmatprep.mubr.bf16.mxu1 %v1413_v17 }
  0x37   : > { %1333 = vmatmul.mubr.bf16.gmra.mrb[8].mxu0 %v1414_v18  ;;  %1349 = vmatmul.mubr.bf16.gmra.mrb[8].mxu1 %v1415_v19  ;;  %v1220_v19 = vunpack.c.h.bf16 %v1271_v57 }
  0x38   : > { %1336 = vmatprep.mubr.bf16.mxu0 %v1416_v20  ;;  %1352 = vmatprep.mubr.bf16.mxu1 %v1417_v21  ;;  %v1252_v20 = vunpack.c.h.bf16 %v1279_v58 }
  0x3f   : > { %1337 = vmatmul.mubr.bf16.gmra.mrb[12].mxu0 %v1418_v22  ;;  %1353 = vmatmul.mubr.bf16.gmra.mrb[12].mxu1 %v1419_v23 }
  0xfa   : > { %v1326_v31 = vpop.f32.mrb[0].mxu0  ;;  %v1342_v32 = vpop.f32.mrb[0].mxu1 }
  0xfb   : > { %v849_v35 = vadd.f32 %v1326_v31, %v1551_v28  ;;  %v865_v36 = vadd.f32 %v1342_v32, %v1551_v28  ;;  %v614_v37 = vpop.f32.mrb[1].mxu0  ;;  %v678_v38 = vpop.f32.mrb[1].mxu1 }
  0xfc   : > { %v847_v41 = vadd.f32 %v1551_v28, %v614_v37  ;;  %v863_v42 = vadd.f32 %v1551_v28, %v678_v38  ;;  %v1327_v43 = vpop.f32.mrb[2].mxu0  ;;  %v1343_v44 = vpop.f32.mrb[2].mxu1  ;;  %v1273_v38 = vld [vmem:[%s1542_s19 + $0x28] sm:$0xff]  }
  0xfd   : > { %v945_v47 = vadd.f32 %v1211_v29, %v849_v35  ;;  %v961_v48 = vadd.f32 %v1243_v30, %v865_v36  ;;  %v850_v49 = vadd.f32 %v1327_v43, %v1551_v28  ;;  %v866_v50 = vadd.f32 %v1343_v44, %v1551_v28  ;;  %v617_v51 = vpop.f32.mrb[3].mxu0  ;;  %v681_v52 = vpop.f32.mrb[3].mxu1  ;;  %v1272_v44 = vld [vmem:[%s1542_s19 + $0x20] sm:$0xff]  }
  0xfe   : > { %v943_v53 = vadd.f32 %v1207_v33, %v847_v41  ;;  %v959_v54 = vadd.f32 %v1239_v34, %v863_v42  ;;  %v848_v55 = vadd.f32 %v1551_v28, %v617_v51  ;;  %v864_v56 = vadd.f32 %v1551_v28, %v681_v52 }
  0xff   : > { %v977_v59 = vmax.f32 %v945_v47, 0.0  ;;  %v993_v60 = vmax.f32 %v961_v48, 0.0  ;;  %v946_v61 = vadd.f32 %v1212_v39, %v850_v49  ;;  %v962_v62 = vadd.f32 %v1244_v40, %v866_v50  ;;  %v1281_v39 = vld [vmem:[%s1542_s19 + $0x68] sm:$0xff]  }
 0x100   : > { %v975_v1 = vmax.f32 %v943_v53, 0.0  ;;  %v991_v2 = vmax.f32 %v959_v54, 0.0  ;;  %v944_v3 = vadd.f32 %v1208_v45, %v848_v55  ;;  %v960_v4 = vadd.f32 %v1240_v46, %v864_v56  ;;  %v1280_v45 = vld [vmem:[%s1542_s19 + $0x60] sm:$0xff]  }
 0x101   : > { %1009 = vst [vmem:[%s1563_s25 + $0x10] sm:$0xff] %v977_v59  ;;  %1025 = vst [vmem:[%s1563_s25 + $0x90] sm:$0xff] %v993_v60  ;;  %v978_v5 = vmax.f32 %v946_v61, 0.0  ;;  %v994_v6 = vmax.f32 %v962_v62, 0.0  ;;  %v1227_v52 = vunpack.c.l.bf16 %v1273_v38  ;;  %v1259_v53 = vunpack.c.l.bf16 %v1281_v39 }
 0x102   : > { %1007 = vst [vmem:[%s1563_s25] sm:$0xff] %v975_v1  ;;  %1023 = vst [vmem:[%s1563_s25 + $0x80] sm:$0xff] %v991_v2  ;;  %v976_v9 = vmax.f32 %v944_v3, 0.0  ;;  %v992_v10 = vmax.f32 %v960_v4, 0.0  ;;  %v1330_v11 = vpop.f32.mrb[4].mxu0  ;;  %v1346_v12 = vpop.f32.mrb[4].mxu1  ;;  %v1223_v58 = vunpack.c.l.bf16 %v1272_v44  ;;  %v1255_v59 = vunpack.c.l.bf16 %v1280_v45 }
 0x103   : > { %1010 = vst [vmem:[%s1563_s25 + $0x18] sm:$0xff] %v978_v5  ;;  %1026 = vst [vmem:[%s1563_s25 + $0x98] sm:$0xff] %v994_v6  ;;  %v853_v15 = vadd.f32 %v1330_v11, %v1551_v28  ;;  %v869_v16 = vadd.f32 %v1346_v12, %v1551_v28  ;;  %v630_v17 = vpop.f32.mrb[5].mxu0  ;;  %v694_v18 = vpop.f32.mrb[5].mxu1  ;;  %v1228_v0 = vunpack.c.h.bf16 %v1273_v38  ;;  %v1260_v1 = vunpack.c.h.bf16 %v1281_v39 }
 0x104   : > { %1008 = vst [vmem:[%s1563_s25 + $0x8] sm:$0xff] %v976_v9  ;;  %1024 = vst [vmem:[%s1563_s25 + $0x88] sm:$0xff] %v992_v10  ;;  %v851_v21 = vadd.f32 %v1551_v28, %v630_v17  ;;  %v867_v22 = vadd.f32 %v1551_v28, %v694_v18  ;;  %v1331_v23 = vpop.f32.mrb[6].mxu0  ;;  %v1347_v24 = vpop.f32.mrb[6].mxu1  ;;  %v1224_v6 = vunpack.c.h.bf16 %v1272_v44  ;;  %v1275_v18 = vld [vmem:[%s1542_s19 + $0x38] sm:$0xff]  }
 0x105   : > { %v949_v27 = vadd.f32 %v1219_v7, %v853_v15  ;;  %v965_v29 = vadd.f32 %v1251_v8, %v869_v16  ;;  %v854_v30 = vadd.f32 %v1331_v23, %v1551_v28  ;;  %v870_v31 = vadd.f32 %v1347_v24, %v1551_v28  ;;  %v633_v32 = vpop.f32.mrb[7].mxu0  ;;  %v697_v33 = vpop.f32.mrb[7].mxu1  ;;  %v1274_v24 = vld [vmem:[%s1542_s19 + $0x30] sm:$0xff]  }
 0x106   : > { %v947_v34 = vadd.f32 %v1215_v13, %v851_v21  ;;  %v963_v35 = vadd.f32 %v1247_v14, %v867_v22  ;;  %v852_v36 = vadd.f32 %v1551_v28, %v633_v32  ;;  %v868_v37 = vadd.f32 %v1551_v28, %v697_v33 }
 0x107   : > { %v981_v40 = vmax.f32 %v949_v27, 0.0  ;;  %v997_v41 = vmax.f32 %v965_v29, 0.0  ;;  %v950_v42 = vadd.f32 %v1220_v19, %v854_v30  ;;  %v966_v43 = vadd.f32 %v1252_v20, %v870_v31  ;;  %v1283_v19 = vld [vmem:[%s1542_s19 + $0x78] sm:$0xff]  }
 0x108   : > { %v979_v46 = vmax.f32 %v947_v34, 0.0  ;;  %v995_v47 = vmax.f32 %v963_v35, 0.0  ;;  %v948_v48 = vadd.f32 %v1216_v25, %v852_v36  ;;  %v964_v49 = vadd.f32 %v1248_v26, %v868_v37  ;;  %v1282_v25 = vld [vmem:[%s1542_s19 + $0x70] sm:$0xff]  }
 0x109   : > { %1013 = vst [vmem:[%s1563_s25 + $0x30] sm:$0xff] %v981_v40  ;;  %1029 = vst [vmem:[%s1563_s25 + $0xb0] sm:$0xff] %v997_v41  ;;  %v982_v50 = vmax.f32 %v950_v42, 0.0  ;;  %v998_v51 = vmax.f32 %v966_v43, 0.0  ;;  %v1256_v7 = vunpack.c.h.bf16 %v1280_v45  ;;  %v1235_v33 = vunpack.c.l.bf16 %v1275_v18 }
 0x10a   : > { %1011 = vst [vmem:[%s1563_s25 + $0x20] sm:$0xff] %v979_v46  ;;  %1027 = vst [vmem:[%s1563_s25 + $0xa0] sm:$0xff] %v995_v47  ;;  %v980_v54 = vmax.f32 %v948_v48, 0.0  ;;  %v996_v55 = vmax.f32 %v964_v49, 0.0  ;;  %v1334_v56 = vpop.f32.mrb[8].mxu0  ;;  %v1350_v57 = vpop.f32.mrb[8].mxu1  ;;  %v1267_v34 = vunpack.c.l.bf16 %v1283_v19  ;;  %v1231_v39 = vunpack.c.l.bf16 %v1274_v24 }
 0x10b   : > { %1014 = vst [vmem:[%s1563_s25 + $0x38] sm:$0xff] %v982_v50  ;;  %1030 = vst [vmem:[%s1563_s25 + $0xb8] sm:$0xff] %v998_v51  ;;  %v857_v60 = vadd.f32 %v1334_v56, %v1551_v28  ;;  %v873_v61 = vadd.f32 %v1350_v57, %v1551_v28  ;;  %v646_v62 = vpop.f32.mrb[9].mxu0  ;;  %v710_v63 = vpop.f32.mrb[9].mxu1  ;;  %v1263_v40 = vunpack.c.l.bf16 %v1282_v25  ;;  %v1236_v45 = vunpack.c.h.bf16 %v1275_v18 }
 0x10c   : > { %1012 = vst [vmem:[%s1563_s25 + $0x28] sm:$0xff] %v980_v54  ;;  %1028 = vst [vmem:[%s1563_s25 + $0xa8] sm:$0xff] %v996_v55  ;;  %v855_v2 = vadd.f32 %v1551_v28, %v646_v62  ;;  %v871_v3 = vadd.f32 %v1551_v28, %v710_v63  ;;  %v1335_v4 = vpop.f32.mrb[10].mxu0  ;;  %v1351_v5 = vpop.f32.mrb[10].mxu1  ;;  %v1268_v46 = vunpack.c.h.bf16 %v1283_v19  ;;  %v1232_v51 = vunpack.c.h.bf16 %v1274_v24 }
 0x10d   : > { %v953_v8 = vadd.f32 %v1227_v52, %v857_v60  ;;  %v969_v9 = vadd.f32 %v1259_v53, %v873_v61  ;;  %v858_v10 = vadd.f32 %v1335_v4, %v1551_v28  ;;  %v874_v11 = vadd.f32 %v1351_v5, %v1551_v28  ;;  %v649_v12 = vpop.f32.mrb[11].mxu0  ;;  %v713_v13 = vpop.f32.mrb[11].mxu1 }
 0x10e   : > { %v951_v14 = vadd.f32 %v1223_v58, %v855_v2  ;;  %v967_v15 = vadd.f32 %v1255_v59, %v871_v3  ;;  %v856_v16 = vadd.f32 %v1551_v28, %v649_v12  ;;  %v872_v17 = vadd.f32 %v1551_v28, %v713_v13 }
 0x10f   : > { %v985_v20 = vmax.f32 %v953_v8, 0.0  ;;  %v1001_v21 = vmax.f32 %v969_v9, 0.0  ;;  %v954_v22 = vadd.f32 %v1228_v0, %v858_v10  ;;  %v970_v23 = vadd.f32 %v1260_v1, %v874_v11 }
 0x110   : > { %v983_v26 = vmax.f32 %v951_v14, 0.0  ;;  %v999_v27 = vmax.f32 %v967_v15, 0.0  ;;  %v952_v29 = vadd.f32 %v1224_v6, %v856_v16  ;;  %v968_v30 = vadd.f32 %v1256_v7, %v872_v17 }
 0x111   : > { %1017 = vst [vmem:[%s1563_s25 + $0x50] sm:$0xff] %v985_v20  ;;  %1033 = vst [vmem:[%s1563_s25 + $0xd0] sm:$0xff] %v1001_v21  ;;  %v986_v31 = vmax.f32 %v954_v22, 0.0  ;;  %v1002_v32 = vmax.f32 %v970_v23, 0.0  ;;  %v1264_v52 = vunpack.c.h.bf16 %v1282_v25 }
 0x112   : > { %1015 = vst [vmem:[%s1563_s25 + $0x40] sm:$0xff] %v983_v26  ;;  %1031 = vst [vmem:[%s1563_s25 + $0xc0] sm:$0xff] %v999_v27  ;;  %v984_v35 = vmax.f32 %v952_v29, 0.0  ;;  %v1000_v36 = vmax.f32 %v968_v30, 0.0  ;;  %v1338_v37 = vpop.f32.mrb[12].mxu0  ;;  %v1354_v38 = vpop.f32.mrb[12].mxu1 }
 0x113   : > { %1018 = vst [vmem:[%s1563_s25 + $0x58] sm:$0xff] %v986_v31  ;;  %1034 = vst [vmem:[%s1563_s25 + $0xd8] sm:$0xff] %v1002_v32  ;;  %v861_v41 = vadd.f32 %v1338_v37, %v1551_v28  ;;  %v877_v42 = vadd.f32 %v1354_v38, %v1551_v28  ;;  %v662_v43 = vpop.f32.mrb[13].mxu0  ;;  %v726_v44 = vpop.f32.mrb[13].mxu1 }
 0x114   : > { %1016 = vst [vmem:[%s1563_s25 + $0x48] sm:$0xff] %v984_v35  ;;  %1032 = vst [vmem:[%s1563_s25 + $0xc8] sm:$0xff] %v1000_v36  ;;  %v859_v47 = vadd.f32 %v1551_v28, %v662_v43  ;;  %v875_v48 = vadd.f32 %v1551_v28, %v726_v44  ;;  %v1339_v49 = vpop.f32.mrb[14].mxu0  ;;  %v1355_v50 = vpop.f32.mrb[14].mxu1 }
 0x115   : > { %v957_v53 = vadd.f32 %v1235_v33, %v861_v41  ;;  %v973_v54 = vadd.f32 %v1267_v34, %v877_v42  ;;  %v862_v55 = vadd.f32 %v1339_v49, %v1551_v28  ;;  %v878_v56 = vadd.f32 %v1355_v50, %v1551_v28  ;;  %v665_v57 = vpop.f32.mrb[15].mxu0  ;;  %v729_v58 = vpop.f32.mrb[15].mxu1 }
 0x116   : > { %v955_v59 = vadd.f32 %v1231_v39, %v859_v47  ;;  %v971_v60 = vadd.f32 %v1263_v40, %v875_v48  ;;  %v860_v61 = vadd.f32 %v1551_v28, %v665_v57  ;;  %v876_v62 = vadd.f32 %v1551_v28, %v729_v58 }
 0x117   : > { %v989_v63 = vmax.f32 %v957_v53, 0.0  ;;  %v1005_v0 = vmax.f32 %v973_v54, 0.0  ;;  %v958_v1 = vadd.f32 %v1236_v45, %v862_v55  ;;  %v974_v2 = vadd.f32 %v1268_v46, %v878_v56 }
 0x118   : > { %v987_v3 = vmax.f32 %v955_v59, 0.0  ;;  %v1003_v4 = vmax.f32 %v971_v60, 0.0  ;;  %v956_v5 = vadd.f32 %v1232_v51, %v860_v61  ;;  %v972_v6 = vadd.f32 %v1264_v52, %v876_v62 }
 0x119   : > { %1021 = vst [vmem:[%s1563_s25 + $0x70] sm:$0xff] %v989_v63  ;;  %1037 = vst [vmem:[%s1563_s25 + $0xf0] sm:$0xff] %v1005_v0  ;;  %v990_v7 = vmax.f32 %v958_v1, 0.0  ;;  %v1006_v8 = vmax.f32 %v974_v2, 0.0 }
 0x11a   : > { %1019 = vst [vmem:[%s1563_s25 + $0x60] sm:$0xff] %v987_v3  ;;  %1035 = vst [vmem:[%s1563_s25 + $0xe0] sm:$0xff] %v1003_v4  ;;  %v988_v9 = vmax.f32 %v956_v5, 0.0  ;;  %v1004_v28 = vmax.f32 %v972_v6, 0.0 }
 0x11b   : > { %1022 = vst [vmem:[%s1563_s25 + $0x78] sm:$0xff] %v990_v7  ;;  %1038 = vst [vmem:[%s1563_s25 + $0xf8] sm:$0xff] %v1006_v8 }
 0x11c   : > { %1020 = vst [vmem:[%s1563_s25 + $0x68] sm:$0xff] %v988_v9  ;;  %1036 = vst [vmem:[%s1563_s25 + $0xe8] sm:$0xff] %v1004_v28 }
 0x11d PF: > { %s14_s17 = sadd.s32 1, %s1442_s17   ;;  %s1649_s15 = smov %s1438_s16 }
 0x11e   : > { %p11_p5 = scmp.ge.s32.totalorder %s14_s17, 4   ;;  %s1650_s16 = smov %s1652_s18 }
 0x120   :  { %13 = sbr.rel (!%p11_p5) target bundleno = 2 (0x2), region = 83 }

</bundles_post_ra>
